<compile_context>
chip_gen: v7x
topology: tpu7x:2x2x1
jax: 0.10.0
libtpu: 0.0.40
codegen_flags: <defaults>
</compile_context>

<pallas_src>
import jax
import jax.numpy as jnp
from jax import lax
from jax.experimental import pallas as pl
from jax.experimental.pallas import tpu as pltpu


# ---------------------------------------------------------------------------
# small helpers
# ---------------------------------------------------------------------------
def _row_block(rows, cap=512):
    """Largest row-tile: full if small, else a multiple-of-8 divisor <= cap."""
    if rows <= cap:
        return rows
    for d in range(cap - cap % 8, 7, -8):
        if rows % d == 0:
            return d
    return rows


def _time_block(T, cap=16):
    """Time-chunk size: full if small, else the largest divisor of T <= cap."""
    if T <= cap:
        return T
    for d in range(cap, 0, -1):
        if T % d == 0:
            return d
    return T


def _lstm_cell_update(gates, c_prev, H):
    """PyTorch gate order (i, f, g, o) -> (h_new, c_new), all float32."""
    i = jax.nn.sigmoid(gates[:, 0 * H:1 * H])
    f = jax.nn.sigmoid(gates[:, 1 * H:2 * H])
    g = jnp.tanh(gates[:, 2 * H:3 * H])
    o = jax.nn.sigmoid(gates[:, 3 * H:4 * H])
    c_new = f * c_prev + i * g
    h_new = o * jnp.tanh(c_new)
    return h_new, c_new


# ---------------------------------------------------------------------------
# 1) batched input projection (hoisted out of the recurrence)
# ---------------------------------------------------------------------------
def _make_proj_kernel(n_src, n_out):
    def kernel(*refs):
        xs = refs[:n_src]
        ws = refs[n_src:n_src + n_out * n_src]
        bs = refs[n_src + n_out * n_src:n_src + n_out * n_src + n_out]
        outs = refs[n_src + n_out * n_src + n_out:]
        for oi in range(n_out):
            acc = bs[oi][...]                      # (1, G) f32, broadcasts
            for si in range(n_src):
                acc = acc + jnp.dot(xs[si][...], ws[oi * n_src + si][...],
                                    preferred_element_type=jnp.float32)
            outs[oi][...] = acc.astype(outs[oi].dtype)
    return kernel


def _projection(xs, ws, bs, row_block=512):
    """out[oi] = sum_si xs[si] @ ws[oi][si] + bs[oi]   (each out: (R, G) f32).

    xs: list of (R, I_si) activations (each read from HBM exactly once).
    ws: per-output list of per-source weights (I_si, G) (VMEM-resident).
    bs: per-output (1, G) biases.
    """
    n_src, n_out = len(xs), len(ws)
    R = xs[0].shape[0]
    G = ws[0][0].shape[1]
    TM = _row_block(R, row_block)

    row_idx = lambda r: (r, 0)
    const = lambda r: (0, 0)

    in_specs, args = [], []
    for x in xs:
        in_specs.append(pl.BlockSpec((TM, x.shape[1]), row_idx))
        args.append(x)
    for out_ws in ws:
        for w in out_ws:
            in_specs.append(pl.BlockSpec(w.shape, const))
            args.append(w)
    for b in bs:
        in_specs.append(pl.BlockSpec(b.shape, const))
        args.append(b)

    flops = 2 * R * G * sum(int(x.shape[1]) for x in xs) * n_out
    bytes_acc = (sum(int(x.size) * x.dtype.itemsize for x in xs)
                 + sum(int(w.size) * w.dtype.itemsize for ows in ws for w in ows)
                 + n_out * R * G * 4)

    outs = pl.pallas_call(
        _make_proj_kernel(n_src, n_out),
        out_shape=tuple(jax.ShapeDtypeStruct((R, G), jnp.float32)
                        for _ in range(n_out)),
        grid=(R // TM,),
        in_specs=in_specs,
        out_specs=tuple(pl.BlockSpec((TM, G), row_idx) for _ in range(n_out)),
        compiler_params=pltpu.CompilerParams(
            dimension_semantics=("parallel",)),
        cost_estimate=pl.CostEstimate(flops=flops, transcendentals=0,
                                      bytes_accessed=bytes_acc),
    )(*args)
    return list(outs)


# ---------------------------------------------------------------------------
# 2) bidirectional recurrence (intermediate layers): only h @ W_hh in the loop
# ---------------------------------------------------------------------------
def _recurrence_kernel(gf_ref, gb_ref, whf_ref, whb_ref, of_ref, ob_ref,
                       hf, cf, hb, cb):
    ct = pl.program_id(0)

    @pl.when(ct == 0)
    def _():
        hf[...] = jnp.zeros_like(hf)
        cf[...] = jnp.zeros_like(cf)
        hb[...] = jnp.zeros_like(hb)
        cb[...] = jnp.zeros_like(cb)

    Tt = gf_ref.shape[0]
    H = hf.shape[-1]

    def step(i, carry):
        # forward direction: local time index i within this chunk
        g = gf_ref[i] + jnp.dot(hf[...], whf_ref[...],
                                preferred_element_type=jnp.float32)
        h_new, c_new = _lstm_cell_update(g, cf[...], H)
        hf[...] = h_new
        cf[...] = c_new
        of_ref[i] = h_new.astype(of_ref.dtype)

        # backward direction: the gb/ob blocks are already the time-reversed
        # chunk (via their index_maps); iterate them back-to-front locally.
        j = Tt - 1 - i
        g = gb_ref[j] + jnp.dot(hb[...], whb_ref[...],
                                preferred_element_type=jnp.float32)
        h_new, c_new = _lstm_cell_update(g, cb[...], H)
        hb[...] = h_new
        cb[...] = c_new
        ob_ref[j] = h_new.astype(ob_ref.dtype)
        return carry

    lax.fori_loop(0, Tt, step, 0, unroll=True)


def bilstm_recurrence(gf, gb, wh_f, wh_b, out_dtype=jnp.bfloat16, time_cap=16):
    """gf/gb: (T, B, 4H) precomputed input gates. Returns (out_f, out_b) (T,B,H)."""
    T, B, H4 = gf.shape
    H = H4 // 4
    Tt = _time_block(T, time_cap)
    nct = T // Tt

    fwd_idx = lambda ct: (ct, 0, 0)
    bwd_idx = lambda ct: (nct - 1 - ct, 0, 0)
    const2 = lambda ct: (0, 0)

    o_item = jnp.dtype(out_dtype).itemsize
    cost = pl.CostEstimate(
        flops=2 * 2 * T * B * H * 4 * H,
        transcendentals=2 * T * B * 5 * H,
        bytes_accessed=(2 * T * B * 4 * H * 4          # gf + gb reads
                        + 2 * H * 4 * H * 4            # W_hh (resident)
                        + 2 * T * B * H * o_item))     # out_f + out_b writes

    out_f, out_b = pl.pallas_call(
        _recurrence_kernel,
        out_shape=(jax.ShapeDtypeStruct((T, B, H), out_dtype),
                   jax.ShapeDtypeStruct((T, B, H), out_dtype)),
        grid=(nct,),
        in_specs=[
            pl.BlockSpec((Tt, B, 4 * H), fwd_idx),     # fwd gate slab
            pl.BlockSpec((Tt, B, 4 * H), bwd_idx),     # bwd gate slab (reversed)
            pl.BlockSpec((H, 4 * H), const2),          # W_hh fwd (VMEM-resident)
            pl.BlockSpec((H, 4 * H), const2),          # W_hh bwd
        ],
        out_specs=(pl.BlockSpec((Tt, B, H), fwd_idx),
                   pl.BlockSpec((Tt, B, H), bwd_idx)),
        scratch_shapes=[pltpu.VMEM((B, H), jnp.float32)] * 4,   # hf, cf, hb, cb
        compiler_params=pltpu.CompilerParams(
            dimension_semantics=("arbitrary",)),       # serial recurrence
        cost_estimate=cost,
    )(gf, gb, wh_f, wh_b)
    return out_f, out_b


# ---------------------------------------------------------------------------
# 3) last layer: fwd recurrence + single zero-state bwd cell + fused Linear
# ---------------------------------------------------------------------------
def _last_layer_kernel(gf_ref, gbl_ref, whf_ref, fcwf_ref, fcwb_ref, fcb_ref,
                       o_ref, hf, cf):
    ct = pl.program_id(0)

    @pl.when(ct == 0)
    def _():
        hf[...] = jnp.zeros_like(hf)
        cf[...] = jnp.zeros_like(cf)

    Tt = gf_ref.shape[0]
    H = hf.shape[-1]

    def step(i, carry):
        g = gf_ref[i] + jnp.dot(hf[...], whf_ref[...],
                                preferred_element_type=jnp.float32)
        h_new, c_new = _lstm_cell_update(g, cf[...], H)
        hf[...] = h_new
        cf[...] = c_new
        return carry

    lax.fori_loop(0, Tt, step, 0, unroll=True)

    @pl.when(ct == pl.num_programs(0) - 1)
    def _():
        # out[:, -1, H:2H] is the reverse direction's FIRST step: zero initial
        # state, so the recurrent h @ W_hh term vanishes entirely.
        h_b, _ = _lstm_cell_update(gbl_ref[...], jnp.zeros_like(hf[...]), H)
        out = (jnp.dot(hf[...], fcwf_ref[...], preferred_element_type=jnp.float32)
               + jnp.dot(h_b, fcwb_ref[...], preferred_element_type=jnp.float32)
               + fcb_ref[...])
        o_ref[...] = out.astype(o_ref.dtype)


def bilstm_last_layer(gf, gb_last, wh_f, fcw_f, fcw_b, fc_b, time_cap=16):
    """gf: (T,B,4H) fwd gates; gb_last: (B,4H) bwd gates at t=T-1. -> (B, O)."""
    T, B, H4 = gf.shape
    H = H4 // 4
    O = fcw_f.shape[1]
    Tt = _time_block(T, time_cap)
    nct = T // Tt

    const2 = lambda ct: (0, 0)
    cost = pl.CostEstimate(
        flops=2 * T * B * H * 4 * H + 2 * B * 2 * H * O,
        transcendentals=(T + 1) * B * 5 * H,
        bytes_accessed=(T * B * 4 * H * 4 + B * 4 * H * 4
                        + (H * 4 * H + 2 * H * O + O) * 4 + B * O * 4))

    return pl.pallas_call(
        _last_layer_kernel,
        out_shape=jax.ShapeDtypeStruct((B, O), jnp.float32),
        grid=(nct,),
        in_specs=[
            pl.BlockSpec((Tt, B, 4 * H), lambda ct: (ct, 0, 0)),   # fwd gates
            pl.BlockSpec((B, 4 * H), const2),                      # bwd gates @ T-1
            pl.BlockSpec((H, 4 * H), const2),                      # W_hh fwd
            pl.BlockSpec((H, O), const2),                          # fc_w (fwd half)
            pl.BlockSpec((H, O), const2),                          # fc_w (bwd half)
            pl.BlockSpec((1, O), const2),                          # fc_b
        ],
        out_specs=pl.BlockSpec((B, O), const2),
        scratch_shapes=[pltpu.VMEM((B, H), jnp.float32)] * 2,      # hf, cf
        compiler_params=pltpu.CompilerParams(
            dimension_semantics=("arbitrary",)),
        cost_estimate=cost,
    )(gf, gb_last, wh_f, fcw_f, fcw_b, fc_b)


# ---------------------------------------------------------------------------
# full module forward
# ---------------------------------------------------------------------------
def lstm_forward(x, lstm_params, fc_w, fc_b, *, act_dtype=jnp.bfloat16):
    """x: (B, T, input_dim) -> (B, out_dim).

    lstm_params: list of layers; each layer is ((wi_f, wh_f, b_f), (wi_b, wh_b, b_b))
    with wi_*: (I_layer, 4H), wh_*: (H, 4H), b_* = b_ih + b_hh: (1, 4H)
    (i.e. already transposed from PyTorch's (4H, I) layout, gates ordered i,f,g,o).
    fc_w: (2H, out_dim), fc_b: (1, out_dim).
    """
    B, T, _ = x.shape
    num_layers = len(lstm_params)
    H = lstm_params[0][0][1].shape[0]

    # time-major, bf16 activations for the MXU input path
    srcs = [jnp.transpose(x, (1, 0, 2)).reshape(T * B, -1).astype(act_dtype)]

    for li, (fwd, bwd) in enumerate(lstm_params):
        wi_f, wh_f, b_f = fwd
        wi_b, wh_b, b_b = bwd
        is_last = (li == num_layers - 1)

        # Split W_ih per input source (prev fwd / prev bwd) -> no concat needed.
        if len(srcs) == 1:
            w_gf = [wi_f.astype(act_dtype)]
            w_gb = [wi_b.astype(act_dtype)]
        else:
            w_gf = [wi_f[:H].astype(act_dtype), wi_f[H:].astype(act_dtype)]
            w_gb = [wi_b[:H].astype(act_dtype), wi_b[H:].astype(act_dtype)]

        if not is_last:
            gf, gb = _projection(srcs, [w_gf, w_gb], [b_f, b_b])
            gf = gf.reshape(T, B, 4 * H)
            gb = gb.reshape(T, B, 4 * H)
            out_f, out_b = bilstm_recurrence(gf, gb, wh_f, wh_b,
                                             out_dtype=act_dtype)
            srcs = [out_f.reshape(T * B, H), out_b.reshape(T * B, H)]
        else:
            # Forward gates for every timestep; reverse gates only at t = T-1
            # (its first step is the only one feeding out[:, -1, :]).
            (gf,) = _projection(srcs, [w_gf], [b_f])
            gf = gf.reshape(T, B, 4 * H)
            last_srcs = [s.reshape(T, B, -1)[T - 1] for s in srcs]
            (gb_last,) = _projection(last_srcs, [w_gb], [b_b])
            return bilstm_last_layer(gf, gb_last, wh_f,
                                     fc_w[:H], fc_w[H:], fc_b)


# ----------------------------- pure-JAX reference ---------------------------
def _lstm_ref(x, lstm_params, fc_w, fc_b):
    B = x.shape[0]

    def cell(x_t, h, c, wi, wh, b):
        gates = x_t @ wi + h @ wh + b
        H = h.shape[-1]
        i = jax.nn.sigmoid(gates[:, :H])
        f = jax.nn.sigmoid(gates[:, H:2 * H])
        g = jnp.tanh(gates[:, 2 * H:3 * H])
        o = jax.nn.sigmoid(gates[:, 3 * H:4 * H])
        c = f * c + i * g
        h = o * jnp.tanh(c)
        return h, c

    def run_dir(xs, wi, wh, b):
        H = wh.shape[0]

        def step(carry, x_t):
            h, c = carry
            h, c = cell(x_t, h, c, wi, wh, b)
            return (h, c), h

        init = (jnp.zeros((B, H), jnp.float32), jnp.zeros((B, H), jnp.float32))
        _, ys = jax.lax.scan(step, init, xs)
        return ys

    xs = jnp.transpose(x, (1, 0, 2))
    for (wif, whf, bf), (wib, whb, bb) in lstm_params:
        out_f = run_dir(xs, wif, whf, bf)
        out_b = run_dir(xs[::-1], wib, whb, bb)[::-1]
        xs = jnp.concatenate([out_f, out_b], axis=-1)
    return xs[-1] @ fc_w + fc_b


if __name__ == "__main__":
    B, T = 4, 8
    INPUT_DIM, HIDDEN_DIM, NUM_LAYERS, OUT_DIM = 16, 32, 2, 8

    key = jax.random.PRNGKey(0)
    key, kx = jax.random.split(key)
    x = jax.random.normal(kx, (B, T, INPUT_DIM), dtype=jnp.float32)

    scale = 1.0 / (HIDDEN_DIM ** 0.5)
    lstm_params = []
    in_dim = INPUT_DIM
    for _ in range(NUM_LAYERS):
        dirs = []
        for _ in range(2):  # forward, reverse
            key, k1, k2, k3 = jax.random.split(key, 4)
            wi = jax.random.uniform(k1, (in_dim, 4 * HIDDEN_DIM), jnp.float32,
                                    -scale, scale)
            wh = jax.random.uniform(k2, (HIDDEN_DIM, 4 * HIDDEN_DIM), jnp.float32,
                                    -scale, scale)
            b = jax.random.uniform(k3, (1, 4 * HIDDEN_DIM), jnp.float32,
                                   -scale, scale)
            dirs.append((wi, wh, b))
        lstm_params.append(tuple(dirs))
        in_dim = 2 * HIDDEN_DIM

    key, k1, k2 = jax.random.split(key, 3)
    fc_w = jax.random.uniform(k1, (2 * HIDDEN_DIM, OUT_DIM), jnp.float32,
                              -scale, scale)
    fc_b = jax.random.uniform(k2, (1, OUT_DIM), jnp.float32, -scale, scale)

    out = jax.jit(lstm_forward)(x, lstm_params, fc_w, fc_b)
    out = jax.block_until_ready(out)

    ref = _lstm_ref(x, lstm_params, fc_w, fc_b)
    assert out.shape == (B, OUT_DIM), out.shape
    # bf16 inter-layer activations/projection weights -> slightly looser tolerance
    assert jnp.allclose(out, ref, rtol=3e-2, atol=3e-2), (
        float(jnp.max(jnp.abs(out - ref))), out, ref)

    print("KERNEL_OK")
</pallas_src>

<mosaic_0001>
module attributes {stable_mosaic.version = 11 : i64} {
  func.func @kernel(%arg0: i32, %arg1: memref<32x16xbf16, #tpu.memory_space<vmem>>, %arg2: memref<16x128xbf16, #tpu.memory_space<vmem>>, %arg3: memref<16x128xbf16, #tpu.memory_space<vmem>>, %arg4: memref<1x128xf32, #tpu.memory_space<vmem>>, %arg5: memref<1x128xf32, #tpu.memory_space<vmem>>, %arg6: memref<32x128xf32, #tpu.memory_space<vmem>>, %arg7: memref<32x128xf32, #tpu.memory_space<vmem>>) attributes {dimension_semantics = [#tpu.dimension_semantics<parallel>], iteration_bounds = array<i64: 1>, scalar_prefetch = 0 : i64, scratch_operands = 0 : i64, tpu.core_type = #tpu.core_type<tc>, window_params = [{transform_indices = @transform_0, window_bounds = array<i64: 32, 16>}, {pipeline_mode = #tpu.pipeline_mode<synchronous>, transform_indices = @transform_1, window_bounds = array<i64: 16, 128>}, {pipeline_mode = #tpu.pipeline_mode<synchronous>, transform_indices = @transform_2, window_bounds = array<i64: 16, 128>}, {pipeline_mode = #tpu.pipeline_mode<synchronous>, transform_indices = @transform_3, window_bounds = array<i64: 1, 128>}, {pipeline_mode = #tpu.pipeline_mode<synchronous>, transform_indices = @transform_4, window_bounds = array<i64: 1, 128>}, {transform_indices = @transform_5, window_bounds = array<i64: 32, 128>}, {transform_indices = @transform_6, window_bounds = array<i64: 32, 128>}]} {
    %c0 = arith.constant 0 : index
    %c0_0 = arith.constant 0 : index
    %0 = vector.load %arg4[%c0, %c0_0] : memref<1x128xf32, #tpu.memory_space<vmem>>, vector<1x128xf32>
    %c0_1 = arith.constant 0 : index
    %c0_2 = arith.constant 0 : index
    %1 = vector.load %arg1[%c0_1, %c0_2] : memref<32x16xbf16, #tpu.memory_space<vmem>>, vector<32x16xbf16>
    %c0_3 = arith.constant 0 : index
    %c0_4 = arith.constant 0 : index
    %2 = vector.load %arg2[%c0_3, %c0_4] : memref<16x128xbf16, #tpu.memory_space<vmem>>, vector<16x128xbf16>
    %cst = arith.constant dense<0.000000e+00> : vector<32x128xf32>
    %3 = tpu.matmul %1, %2, %cst {dimension_numbers = #tpu.dot_dimension_numbers<[1], [0], [0], [1], [0, 0, 1, 1], [], []>} : vector<32x16xbf16>, vector<16x128xbf16>, vector<32x128xf32> -> vector<32x128xf32>
    %4 = vector.broadcast %0 : vector<1x128xf32> to vector<32x128xf32>
    %5 = arith.addf %4, %3 : vector<32x128xf32>
    %c0_5 = arith.constant 0 : index
    %c0_6 = arith.constant 0 : index
    %6 = vector.load %arg6[%c0_5, %c0_6] : memref<32x128xf32, #tpu.memory_space<vmem>>, vector<32x128xf32>
    tpu.vector_store %arg6[%c0_5, %c0_6], %5 {strides = array<i32>} : memref<32x128xf32, #tpu.memory_space<vmem>>, vector<32x128xf32>,
    %c0_7 = arith.constant 0 : index
    %c0_8 = arith.constant 0 : index
    %7 = vector.load %arg5[%c0_7, %c0_8] : memref<1x128xf32, #tpu.memory_space<vmem>>, vector<1x128xf32>
    %c0_9 = arith.constant 0 : index
    %c0_10 = arith.constant 0 : index
    %8 = vector.load %arg1[%c0_9, %c0_10] : memref<32x16xbf16, #tpu.memory_space<vmem>>, vector<32x16xbf16>
    %c0_11 = arith.constant 0 : index
    %c0_12 = arith.constant 0 : index
    %9 = vector.load %arg3[%c0_11, %c0_12] : memref<16x128xbf16, #tpu.memory_space<vmem>>, vector<16x128xbf16>
    %cst_13 = arith.constant dense<0.000000e+00> : vector<32x128xf32>
    %10 = tpu.matmul %8, %9, %cst_13 {dimension_numbers = #tpu.dot_dimension_numbers<[1], [0], [0], [1], [0, 0, 1, 1], [], []>} : vector<32x16xbf16>, vector<16x128xbf16>, vector<32x128xf32> -> vector<32x128xf32>
    %11 = vector.broadcast %7 : vector<1x128xf32> to vector<32x128xf32>
    %12 = arith.addf %11, %10 : vector<32x128xf32>
    %c0_14 = arith.constant 0 : index
    %c0_15 = arith.constant 0 : index
    %13 = vector.load %arg7[%c0_14, %c0_15] : memref<32x128xf32, #tpu.memory_space<vmem>>, vector<32x128xf32>
    tpu.vector_store %arg7[%c0_14, %c0_15], %12 {strides = array<i32>} : memref<32x128xf32, #tpu.memory_space<vmem>>, vector<32x128xf32>,
    return
  }
  func.func @transform_0(%arg0: i32) -> (i32, i32) {
    %c0_i32 = arith.constant 0 : i32
    %c0_i32_0 = arith.constant 0 : i32
    return %arg0, %c0_i32 : i32, i32
  }
  func.func @transform_1(%arg0: i32) -> (i32, i32) {
    %c0_i32 = arith.constant 0 : i32
    %c0_i32_0 = arith.constant 0 : i32
    %c0_i32_1 = arith.constant 0 : i32
    return %c0_i32, %c0_i32_0 : i32, i32
  }
  func.func @transform_2(%arg0: i32) -> (i32, i32) {
    %c0_i32 = arith.constant 0 : i32
    %c0_i32_0 = arith.constant 0 : i32
    %c0_i32_1 = arith.constant 0 : i32
    return %c0_i32, %c0_i32_0 : i32, i32
  }
  func.func @transform_3(%arg0: i32) -> (i32, i32) {
    %c0_i32 = arith.constant 0 : i32
    %c0_i32_0 = arith.constant 0 : i32
    %c0_i32_1 = arith.constant 0 : i32
    return %c0_i32, %c0_i32_0 : i32, i32
  }
  func.func @transform_4(%arg0: i32) -> (i32, i32) {
    %c0_i32 = arith.constant 0 : i32
    %c0_i32_0 = arith.constant 0 : i32
    %c0_i32_1 = arith.constant 0 : i32
    return %c0_i32, %c0_i32_0 : i32, i32
  }
  func.func @transform_5(%arg0: i32) -> (i32, i32) {
    %c0_i32 = arith.constant 0 : i32
    %c0_i32_0 = arith.constant 0 : i32
    return %arg0, %c0_i32 : i32, i32
  }
  func.func @transform_6(%arg0: i32) -> (i32, i32) {
    %c0_i32 = arith.constant 0 : i32
    %c0_i32_0 = arith.constant 0 : i32
    return %arg0, %c0_i32 : i32, i32
  }
}

module attributes {stable_mosaic.version = 11 : i64} {
  func.func @kernel(%arg0: i32, %arg1: memref<4x32xbf16, #tpu.memory_space<vmem>>, %arg2: memref<4x32xbf16, #tpu.memory_space<vmem>>, %arg3: memref<32x128xbf16, #tpu.memory_space<vmem>>, %arg4: memref<32x128xbf16, #tpu.memory_space<vmem>>, %arg5: memref<1x128xf32, #tpu.memory_space<vmem>>, %arg6: memref<4x128xf32, #tpu.memory_space<vmem>>) attributes {dimension_semantics = [#tpu.dimension_semantics<parallel>], iteration_bounds = array<i64: 1>, scalar_prefetch = 0 : i64, scratch_operands = 0 : i64, tpu.core_type = #tpu.core_type<tc>, window_params = [{transform_indices = @transform_0, window_bounds = array<i64: 4, 32>}, {transform_indices = @transform_1, window_bounds = array<i64: 4, 32>}, {pipeline_mode = #tpu.pipeline_mode<synchronous>, transform_indices = @transform_2, window_bounds = array<i64: 32, 128>}, {pipeline_mode = #tpu.pipeline_mode<synchronous>, transform_indices = @transform_3, window_bounds = array<i64: 32, 128>}, {pipeline_mode = #tpu.pipeline_mode<synchronous>, transform_indices = @transform_4, window_bounds = array<i64: 1, 128>}, {transform_indices = @transform_5, window_bounds = array<i64: 4, 128>}]} {
    %c0 = arith.constant 0 : index
    %c0_0 = arith.constant 0 : index
    %0 = vector.load %arg5[%c0, %c0_0] : memref<1x128xf32, #tpu.memory_space<vmem>>, vector<1x128xf32>
    %c0_1 = arith.constant 0 : index
    %c0_2 = arith.constant 0 : index
    %1 = vector.load %arg1[%c0_1, %c0_2] : memref<4x32xbf16, #tpu.memory_space<vmem>>, vector<4x32xbf16>
    %c0_3 = arith.constant 0 : index
    %c0_4 = arith.constant 0 : index
    %2 = vector.load %arg3[%c0_3, %c0_4] : memref<32x128xbf16, #tpu.memory_space<vmem>>, vector<32x128xbf16>
    %cst = arith.constant dense<0.000000e+00> : vector<4x128xf32>
    %3 = tpu.matmul %1, %2, %cst {dimension_numbers = #tpu.dot_dimension_numbers<[1], [0], [0], [1], [0, 0, 1, 1], [], []>} : vector<4x32xbf16>, vector<32x128xbf16>, vector<4x128xf32> -> vector<4x128xf32>
    %4 = vector.broadcast %0 : vector<1x128xf32> to vector<4x128xf32>
    %5 = arith.addf %4, %3 : vector<4x128xf32>
    %c0_5 = arith.constant 0 : index
    %c0_6 = arith.constant 0 : index
    %6 = vector.load %arg2[%c0_5, %c0_6] : memref<4x32xbf16, #tpu.memory_space<vmem>>, vector<4x32xbf16>
    %c0_7 = arith.constant 0 : index
    %c0_8 = arith.constant 0 : index
    %7 = vector.load %arg4[%c0_7, %c0_8] : memref<32x128xbf16, #tpu.memory_space<vmem>>, vector<32x128xbf16>
    %cst_9 = arith.constant dense<0.000000e+00> : vector<4x128xf32>
    %8 = tpu.matmul %6, %7, %cst_9 {dimension_numbers = #tpu.dot_dimension_numbers<[1], [0], [0], [1], [0, 0, 1, 1], [], []>} : vector<4x32xbf16>, vector<32x128xbf16>, vector<4x128xf32> -> vector<4x128xf32>
    %9 = arith.addf %5, %8 : vector<4x128xf32>
    %c0_10 = arith.constant 0 : index
    %c0_11 = arith.constant 0 : index
    %10 = vector.load %arg6[%c0_10, %c0_11] : memref<4x128xf32, #tpu.memory_space<vmem>>, vector<4x128xf32>
    tpu.vector_store %arg6[%c0_10, %c0_11], %9 {strides = array<i32>} : memref<4x128xf32, #tpu.memory_space<vmem>>, vector<4x128xf32>,
    return
  }
  func.func @transform_0(%arg0: i32) -> (i32, i32) {
    %c0_i32 = arith.constant 0 : i32
    %c0_i32_0 = arith.constant 0 : i32
    return %arg0, %c0_i32 : i32, i32
  }
  func.func @transform_1(%arg0: i32) -> (i32, i32) {
    %c0_i32 = arith.constant 0 : i32
    %c0_i32_0 = arith.constant 0 : i32
    return %arg0, %c0_i32 : i32, i32
  }
  func.func @transform_2(%arg0: i32) -> (i32, i32) {
    %c0_i32 = arith.constant 0 : i32
    %c0_i32_0 = arith.constant 0 : i32
    %c0_i32_1 = arith.constant 0 : i32
    return %c0_i32, %c0_i32_0 : i32, i32
  }
  func.func @transform_3(%arg0: i32) -> (i32, i32) {
    %c0_i32 = arith.constant 0 : i32
    %c0_i32_0 = arith.constant 0 : i32
    %c0_i32_1 = arith.constant 0 : i32
    return %c0_i32, %c0_i32_0 : i32, i32
  }
  func.func @transform_4(%arg0: i32) -> (i32, i32) {
    %c0_i32 = arith.constant 0 : i32
    %c0_i32_0 = arith.constant 0 : i32
    %c0_i32_1 = arith.constant 0 : i32
    return %c0_i32, %c0_i32_0 : i32, i32
  }
  func.func @transform_5(%arg0: i32) -> (i32, i32) {
    %c0_i32 = arith.constant 0 : i32
    %c0_i32_0 = arith.constant 0 : i32
    return %arg0, %c0_i32 : i32, i32
  }
}

module attributes {stable_mosaic.version = 11 : i64} {
  func.func @kernel(%arg0: i32, %arg1: memref<32x32xbf16, #tpu.memory_space<vmem>>, %arg2: memref<32x32xbf16, #tpu.memory_space<vmem>>, %arg3: memref<32x128xbf16, #tpu.memory_space<vmem>>, %arg4: memref<32x128xbf16, #tpu.memory_space<vmem>>, %arg5: memref<1x128xf32, #tpu.memory_space<vmem>>, %arg6: memref<32x128xf32, #tpu.memory_space<vmem>>) attributes {dimension_semantics = [#tpu.dimension_semantics<parallel>], iteration_bounds = array<i64: 1>, scalar_prefetch = 0 : i64, scratch_operands = 0 : i64, tpu.core_type = #tpu.core_type<tc>, window_params = [{transform_indices = @transform_0, window_bounds = array<i64: 32, 32>}, {transform_indices = @transform_1, window_bounds = array<i64: 32, 32>}, {pipeline_mode = #tpu.pipeline_mode<synchronous>, transform_indices = @transform_2, window_bounds = array<i64: 32, 128>}, {pipeline_mode = #tpu.pipeline_mode<synchronous>, transform_indices = @transform_3, window_bounds = array<i64: 32, 128>}, {pipeline_mode = #tpu.pipeline_mode<synchronous>, transform_indices = @transform_4, window_bounds = array<i64: 1, 128>}, {transform_indices = @transform_5, window_bounds = array<i64: 32, 128>}]} {
    %c0 = arith.constant 0 : index
    %c0_0 = arith.constant 0 : index
    %0 = vector.load %arg5[%c0, %c0_0] : memref<1x128xf32, #tpu.memory_space<vmem>>, vector<1x128xf32>
    %c0_1 = arith.constant 0 : index
    %c0_2 = arith.constant 0 : index
    %1 = vector.load %arg1[%c0_1, %c0_2] : memref<32x32xbf16, #tpu.memory_space<vmem>>, vector<32x32xbf16>
    %c0_3 = arith.constant 0 : index
    %c0_4 = arith.constant 0 : index
    %2 = vector.load %arg3[%c0_3, %c0_4] : memref<32x128xbf16, #tpu.memory_space<vmem>>, vector<32x128xbf16>
    %cst = arith.constant dense<0.000000e+00> : vector<32x128xf32>
    %3 = tpu.matmul %1, %2, %cst {dimension_numbers = #tpu.dot_dimension_numbers<[1], [0], [0], [1], [0, 0, 1, 1], [], []>} : vector<32x32xbf16>, vector<32x128xbf16>, vector<32x128xf32> -> vector<32x128xf32>
    %4 = vector.broadcast %0 : vector<1x128xf32> to vector<32x128xf32>
    %5 = arith.addf %4, %3 : vector<32x128xf32>
    %c0_5 = arith.constant 0 : index
    %c0_6 = arith.constant 0 : index
    %6 = vector.load %arg2[%c0_5, %c0_6] : memref<32x32xbf16, #tpu.memory_space<vmem>>, vector<32x32xbf16>
    %c0_7 = arith.constant 0 : index
    %c0_8 = arith.constant 0 : index
    %7 = vector.load %arg4[%c0_7, %c0_8] : memref<32x128xbf16, #tpu.memory_space<vmem>>, vector<32x128xbf16>
    %cst_9 = arith.constant dense<0.000000e+00> : vector<32x128xf32>
    %8 = tpu.matmul %6, %7, %cst_9 {dimension_numbers = #tpu.dot_dimension_numbers<[1], [0], [0], [1], [0, 0, 1, 1], [], []>} : vector<32x32xbf16>, vector<32x128xbf16>, vector<32x128xf32> -> vector<32x128xf32>
    %9 = arith.addf %5, %8 : vector<32x128xf32>
    %c0_10 = arith.constant 0 : index
    %c0_11 = arith.constant 0 : index
    %10 = vector.load %arg6[%c0_10, %c0_11] : memref<32x128xf32, #tpu.memory_space<vmem>>, vector<32x128xf32>
    tpu.vector_store %arg6[%c0_10, %c0_11], %9 {strides = array<i32>} : memref<32x128xf32, #tpu.memory_space<vmem>>, vector<32x128xf32>,
    return
  }
  func.func @transform_0(%arg0: i32) -> (i32, i32) {
    %c0_i32 = arith.constant 0 : i32
    %c0_i32_0 = arith.constant 0 : i32
    return %arg0, %c0_i32 : i32, i32
  }
  func.func @transform_1(%arg0: i32) -> (i32, i32) {
    %c0_i32 = arith.constant 0 : i32
    %c0_i32_0 = arith.constant 0 : i32
    return %arg0, %c0_i32 : i32, i32
  }
  func.func @transform_2(%arg0: i32) -> (i32, i32) {
    %c0_i32 = arith.constant 0 : i32
    %c0_i32_0 = arith.constant 0 : i32
    %c0_i32_1 = arith.constant 0 : i32
    return %c0_i32, %c0_i32_0 : i32, i32
  }
  func.func @transform_3(%arg0: i32) -> (i32, i32) {
    %c0_i32 = arith.constant 0 : i32
    %c0_i32_0 = arith.constant 0 : i32
    %c0_i32_1 = arith.constant 0 : i32
    return %c0_i32, %c0_i32_0 : i32, i32
  }
  func.func @transform_4(%arg0: i32) -> (i32, i32) {
    %c0_i32 = arith.constant 0 : i32
    %c0_i32_0 = arith.constant 0 : i32
    %c0_i32_1 = arith.constant 0 : i32
    return %c0_i32, %c0_i32_0 : i32, i32
  }
  func.func @transform_5(%arg0: i32) -> (i32, i32) {
    %c0_i32 = arith.constant 0 : i32
    %c0_i32_0 = arith.constant 0 : i32
    return %arg0, %c0_i32 : i32, i32
  }
}

module attributes {stable_mosaic.version = 11 : i64} {
  func.func @_recurrence_kernel(%arg0: i32, %arg1: memref<8x4x128xf32, #tpu.memory_space<vmem>>, %arg2: memref<8x4x128xf32, #tpu.memory_space<vmem>>, %arg3: memref<32x128xf32, #tpu.memory_space<vmem>>, %arg4: memref<32x128xf32, #tpu.memory_space<vmem>>, %arg5: memref<8x4x32xbf16, #tpu.memory_space<vmem>>, %arg6: memref<8x4x32xbf16, #tpu.memory_space<vmem>>, %arg7: memref<4x32xf32, #tpu.memory_space<vmem>>, %arg8: memref<4x32xf32, #tpu.memory_space<vmem>>, %arg9: memref<4x32xf32, #tpu.memory_space<vmem>>, %arg10: memref<4x32xf32, #tpu.memory_space<vmem>>) attributes {dimension_semantics = [#tpu.dimension_semantics<arbitrary>], iteration_bounds = array<i64: 1>, scalar_prefetch = 0 : i64, scratch_operands = 4 : i64, tpu.core_type = #tpu.core_type<tc>, window_params = [{transform_indices = @transform_0, window_bounds = array<i64: 8, 4, 128>}, {transform_indices = @transform_1, window_bounds = array<i64: 8, 4, 128>}, {pipeline_mode = #tpu.pipeline_mode<synchronous>, transform_indices = @transform_2, window_bounds = array<i64: 32, 128>}, {pipeline_mode = #tpu.pipeline_mode<synchronous>, transform_indices = @transform_3, window_bounds = array<i64: 32, 128>}, {transform_indices = @transform_4, window_bounds = array<i64: 8, 4, 32>}, {transform_indices = @transform_5, window_bounds = array<i64: 8, 4, 32>}]} {
    %c0_i32 = arith.constant 0 : i32
    %0 = arith.cmpi eq, %arg0, %c0_i32 : i32
    %1 = arith.extui %0 : i1 to i32
    %c0_i32_0 = arith.constant 0 : i32
    %2 = arith.cmpi ne, %1, %c0_i32_0 : i32
    scf.if %2 {
      %cst_296 = arith.constant 0.000000e+00 : f32
      %651 = vector.broadcast %cst_296 : f32 to vector<4x32xf32>
      %c0_297 = arith.constant 0 : index
      %c0_298 = arith.constant 0 : index
      %652 = vector.load %arg7[%c0_297, %c0_298] : memref<4x32xf32, #tpu.memory_space<vmem>>, vector<4x32xf32>
      tpu.vector_store %arg7[%c0_297, %c0_298], %651 {strides = array<i32>} : memref<4x32xf32, #tpu.memory_space<vmem>>, vector<4x32xf32>,
      %cst_299 = arith.constant 0.000000e+00 : f32
      %653 = vector.broadcast %cst_299 : f32 to vector<4x32xf32>
      %c0_300 = arith.constant 0 : index
      %c0_301 = arith.constant 0 : index
      %654 = vector.load %arg8[%c0_300, %c0_301] : memref<4x32xf32, #tpu.memory_space<vmem>>, vector<4x32xf32>
      tpu.vector_store %arg8[%c0_300, %c0_301], %653 {strides = array<i32>} : memref<4x32xf32, #tpu.memory_space<vmem>>, vector<4x32xf32>,
      %cst_302 = arith.constant 0.000000e+00 : f32
      %655 = vector.broadcast %cst_302 : f32 to vector<4x32xf32>
      %c0_303 = arith.constant 0 : index
      %c0_304 = arith.constant 0 : index
      %656 = vector.load %arg9[%c0_303, %c0_304] : memref<4x32xf32, #tpu.memory_space<vmem>>, vector<4x32xf32>
      tpu.vector_store %arg9[%c0_303, %c0_304], %655 {strides = array<i32>} : memref<4x32xf32, #tpu.memory_space<vmem>>, vector<4x32xf32>,
      %cst_305 = arith.constant 0.000000e+00 : f32
      %657 = vector.broadcast %cst_305 : f32 to vector<4x32xf32>
      %c0_306 = arith.constant 0 : index
      %c0_307 = arith.constant 0 : index
      %658 = vector.load %arg10[%c0_306, %c0_307] : memref<4x32xf32, #tpu.memory_space<vmem>>, vector<4x32xf32>
      tpu.vector_store %arg10[%c0_306, %c0_307], %657 {strides = array<i32>} : memref<4x32xf32, #tpu.memory_space<vmem>>, vector<4x32xf32>,
    } else {
    }
    %c0_i32_1 = arith.constant 0 : i32
    %3 = arith.index_cast %c0_i32_1 : i32 to index
    %c0 = arith.constant 0 : index
    %c0_2 = arith.constant 0 : index
    %4 = vector.load %arg1[%3, %c0, %c0_2] : memref<8x4x128xf32, #tpu.memory_space<vmem>>, vector<1x4x128xf32>
    %5 = vector.shape_cast %4 : vector<1x4x128xf32> to vector<4x128xf32>
    %c0_3 = arith.constant 0 : index
    %c0_4 = arith.constant 0 : index
    %6 = vector.load %arg7[%c0_3, %c0_4] : memref<4x32xf32, #tpu.memory_space<vmem>>, vector<4x32xf32>
    %c0_5 = arith.constant 0 : index
    %c0_6 = arith.constant 0 : index
    %7 = vector.load %arg3[%c0_5, %c0_6] : memref<32x128xf32, #tpu.memory_space<vmem>>, vector<32x128xf32>
    %cst = arith.constant dense<0.000000e+00> : vector<4x128xf32>
    %8 = tpu.matmul %6, %7, %cst {dimension_numbers = #tpu.dot_dimension_numbers<[1], [0], [0], [1], [0, 0, 1, 1], [], []>} : vector<4x32xf32>, vector<32x128xf32>, vector<4x128xf32> -> vector<4x128xf32>
    %9 = arith.addf %5, %8 : vector<4x128xf32>
    %c0_7 = arith.constant 0 : index
    %c0_8 = arith.constant 0 : index
    %10 = vector.load %arg8[%c0_7, %c0_8] : memref<4x32xf32, #tpu.memory_space<vmem>>, vector<4x32xf32>
    %11 = vector.extract_strided_slice %9 {offsets = [0, 0], sizes = [4, 32], strides = [1, 1]} : vector<4x128xf32> to vector<4x32xf32>
    %12 = arith.negf %11 : vector<4x32xf32>
    %13 = math.exp %12 : vector<4x32xf32>
    %cst_9 = arith.constant 1.000000e+00 : f32
    %14 = vector.broadcast %cst_9 : f32 to vector<4x32xf32>
    %15 = arith.addf %14, %13 : vector<4x32xf32>
    %16 = arith.divf %14, %15 : vector<4x32xf32>
    %17 = vector.extract_strided_slice %9 {offsets = [0, 32], sizes = [4, 32], strides = [1, 1]} : vector<4x128xf32> to vector<4x32xf32>
    %18 = arith.negf %17 : vector<4x32xf32>
    %19 = math.exp %18 : vector<4x32xf32>
    %cst_10 = arith.constant 1.000000e+00 : f32
    %20 = vector.broadcast %cst_10 : f32 to vector<4x32xf32>
    %21 = arith.addf %20, %19 : vector<4x32xf32>
    %22 = arith.divf %20, %21 : vector<4x32xf32>
    %23 = vector.extract_strided_slice %9 {offsets = [0, 64], sizes = [4, 32], strides = [1, 1]} : vector<4x128xf32> to vector<4x32xf32>
    %24 = math.tanh %23 : vector<4x32xf32>
    %25 = vector.extract_strided_slice %9 {offsets = [0, 96], sizes = [4, 32], strides = [1, 1]} : vector<4x128xf32> to vector<4x32xf32>
    %26 = arith.negf %25 : vector<4x32xf32>
    %27 = math.exp %26 : vector<4x32xf32>
    %cst_11 = arith.constant 1.000000e+00 : f32
    %28 = vector.broadcast %cst_11 : f32 to vector<4x32xf32>
    %29 = arith.addf %28, %27 : vector<4x32xf32>
    %30 = arith.divf %28, %29 : vector<4x32xf32>
    %31 = arith.mulf %22, %10 : vector<4x32xf32>
    %32 = arith.mulf %16, %24 : vector<4x32xf32>
    %33 = arith.addf %31, %32 : vector<4x32xf32>
    %34 = math.tanh %33 : vector<4x32xf32>
    %35 = arith.mulf %30, %34 : vector<4x32xf32>
    %c0_12 = arith.constant 0 : index
    %c0_13 = arith.constant 0 : index
    %36 = vector.load %arg7[%c0_12, %c0_13] : memref<4x32xf32, #tpu.memory_space<vmem>>, vector<4x32xf32>
    tpu.vector_store %arg7[%c0_12, %c0_13], %35 {strides = array<i32>} : memref<4x32xf32, #tpu.memory_space<vmem>>, vector<4x32xf32>,
    %c0_14 = arith.constant 0 : index
    %c0_15 = arith.constant 0 : index
    %37 = vector.load %arg8[%c0_14, %c0_15] : memref<4x32xf32, #tpu.memory_space<vmem>>, vector<4x32xf32>
    tpu.vector_store %arg8[%c0_14, %c0_15], %33 {strides = array<i32>} : memref<4x32xf32, #tpu.memory_space<vmem>>, vector<4x32xf32>,
    %38 = arith.truncf %35 : vector<4x32xf32> to vector<4x32xbf16>
    %39 = arith.index_cast %c0_i32_1 : i32 to index
    %c0_16 = arith.constant 0 : index
    %c0_17 = arith.constant 0 : index
    %40 = vector.load %arg5[%39, %c0_16, %c0_17] : memref<8x4x32xbf16, #tpu.memory_space<vmem>>, vector<1x4x32xbf16>
    %41 = vector.shape_cast %40 : vector<1x4x32xbf16> to vector<4x32xbf16>
    %42 = vector.shape_cast %38 : vector<4x32xbf16> to vector<1x4x32xbf16>
    tpu.vector_store %arg5[%39, %c0_16, %c0_17], %42 {strides = array<i32>} : memref<8x4x32xbf16, #tpu.memory_space<vmem>>, vector<1x4x32xbf16>,
    %c7_i32 = arith.constant 7 : i32
    %43 = arith.subi %c7_i32, %c0_i32_1 : i32
    %44 = arith.index_cast %43 : i32 to index
    %c0_18 = arith.constant 0 : index
    %c0_19 = arith.constant 0 : index
    %45 = vector.load %arg2[%44, %c0_18, %c0_19] : memref<8x4x128xf32, #tpu.memory_space<vmem>>, vector<1x4x128xf32>
    %46 = vector.shape_cast %45 : vector<1x4x128xf32> to vector<4x128xf32>
    %c0_20 = arith.constant 0 : index
    %c0_21 = arith.constant 0 : index
    %47 = vector.load %arg9[%c0_20, %c0_21] : memref<4x32xf32, #tpu.memory_space<vmem>>, vector<4x32xf32>
    %c0_22 = arith.constant 0 : index
    %c0_23 = arith.constant 0 : index
    %48 = vector.load %arg4[%c0_22, %c0_23] : memref<32x128xf32, #tpu.memory_space<vmem>>, vector<32x128xf32>
    %cst_24 = arith.constant dense<0.000000e+00> : vector<4x128xf32>
    %49 = tpu.matmul %47, %48, %cst_24 {dimension_numbers = #tpu.dot_dimension_numbers<[1], [0], [0], [1], [0, 0, 1, 1], [], []>} : vector<4x32xf32>, vector<32x128xf32>, vector<4x128xf32> -> vector<4x128xf32>
    %50 = arith.addf %46, %49 : vector<4x128xf32>
    %c0_25 = arith.constant 0 : index
    %c0_26 = arith.constant 0 : index
    %51 = vector.load %arg10[%c0_25, %c0_26] : memref<4x32xf32, #tpu.memory_space<vmem>>, vector<4x32xf32>
    %52 = vector.extract_strided_slice %50 {offsets = [0, 0], sizes = [4, 32], strides = [1, 1]} : vector<4x128xf32> to vector<4x32xf32>
    %53 = arith.negf %52 : vector<4x32xf32>
    %54 = math.exp %53 : vector<4x32xf32>
    %cst_27 = arith.constant 1.000000e+00 : f32
    %55 = vector.broadcast %cst_27 : f32 to vector<4x32xf32>
    %56 = arith.addf %55, %54 : vector<4x32xf32>
    %57 = arith.divf %55, %56 : vector<4x32xf32>
    %58 = vector.extract_strided_slice %50 {offsets = [0, 32], sizes = [4, 32], strides = [1, 1]} : vector<4x128xf32> to vector<4x32xf32>
    %59 = arith.negf %58 : vector<4x32xf32>
    %60 = math.exp %59 : vector<4x32xf32>
    %cst_28 = arith.constant 1.000000e+00 : f32
    %61 = vector.broadcast %cst_28 : f32 to vector<4x32xf32>
    %62 = arith.addf %61, %60 : vector<4x32xf32>
    %63 = arith.divf %61, %62 : vector<4x32xf32>
    %64 = vector.extract_strided_slice %50 {offsets = [0, 64], sizes = [4, 32], strides = [1, 1]} : vector<4x128xf32> to vector<4x32xf32>
    %65 = math.tanh %64 : vector<4x32xf32>
    %66 = vector.extract_strided_slice %50 {offsets = [0, 96], sizes = [4, 32], strides = [1, 1]} : vector<4x128xf32> to vector<4x32xf32>
    %67 = arith.negf %66 : vector<4x32xf32>
    %68 = math.exp %67 : vector<4x32xf32>
    %cst_29 = arith.constant 1.000000e+00 : f32
    %69 = vector.broadcast %cst_29 : f32 to vector<4x32xf32>
    %70 = arith.addf %69, %68 : vector<4x32xf32>
    %71 = arith.divf %69, %70 : vector<4x32xf32>
    %72 = arith.mulf %63, %51 : vector<4x32xf32>
    %73 = arith.mulf %57, %65 : vector<4x32xf32>
    %74 = arith.addf %72, %73 : vector<4x32xf32>
    %75 = math.tanh %74 : vector<4x32xf32>
    %76 = arith.mulf %71, %75 : vector<4x32xf32>
    %c0_30 = arith.constant 0 : index
    %c0_31 = arith.constant 0 : index
    %77 = vector.load %arg9[%c0_30, %c0_31] : memref<4x32xf32, #tpu.memory_space<vmem>>, vector<4x32xf32>
    tpu.vector_store %arg9[%c0_30, %c0_31], %76 {strides = array<i32>} : memref<4x32xf32, #tpu.memory_space<vmem>>, vector<4x32xf32>,
    %c0_32 = arith.constant 0 : index
    %c0_33 = arith.constant 0 : index
    %78 = vector.load %arg10[%c0_32, %c0_33] : memref<4x32xf32, #tpu.memory_space<vmem>>, vector<4x32xf32>
    tpu.vector_store %arg10[%c0_32, %c0_33], %74 {strides = array<i32>} : memref<4x32xf32, #tpu.memory_space<vmem>>, vector<4x32xf32>,
    %79 = arith.truncf %76 : vector<4x32xf32> to vector<4x32xbf16>
    %80 = arith.index_cast %43 : i32 to index
    %c0_34 = arith.constant 0 : index
    %c0_35 = arith.constant 0 : index
    %81 = vector.load %arg6[%80, %c0_34, %c0_35] : memref<8x4x32xbf16, #tpu.memory_space<vmem>>, vector<1x4x32xbf16>
    %82 = vector.shape_cast %81 : vector<1x4x32xbf16> to vector<4x32xbf16>
    %83 = vector.shape_cast %79 : vector<4x32xbf16> to vector<1x4x32xbf16>
    tpu.vector_store %arg6[%80, %c0_34, %c0_35], %83 {strides = array<i32>} : memref<8x4x32xbf16, #tpu.memory_space<vmem>>, vector<1x4x32xbf16>,
    %c1_i32 = arith.constant 1 : i32
    %84 = arith.index_cast %c1_i32 : i32 to index
    %c0_36 = arith.constant 0 : index
    %c0_37 = arith.constant 0 : index
    %85 = vector.load %arg1[%84, %c0_36, %c0_37] : memref<8x4x128xf32, #tpu.memory_space<vmem>>, vector<1x4x128xf32>
    %86 = vector.shape_cast %85 : vector<1x4x128xf32> to vector<4x128xf32>
    %c0_38 = arith.constant 0 : index
    %c0_39 = arith.constant 0 : index
    %87 = vector.load %arg7[%c0_38, %c0_39] : memref<4x32xf32, #tpu.memory_space<vmem>>, vector<4x32xf32>
    %c0_40 = arith.constant 0 : index
    %c0_41 = arith.constant 0 : index
    %88 = vector.load %arg3[%c0_40, %c0_41] : memref<32x128xf32, #tpu.memory_space<vmem>>, vector<32x128xf32>
    %cst_42 = arith.constant dense<0.000000e+00> : vector<4x128xf32>
    %89 = tpu.matmul %87, %88, %cst_42 {dimension_numbers = #tpu.dot_dimension_numbers<[1], [0], [0], [1], [0, 0, 1, 1], [], []>} : vector<4x32xf32>, vector<32x128xf32>, vector<4x128xf32> -> vector<4x128xf32>
    %90 = arith.addf %86, %89 : vector<4x128xf32>
    %c0_43 = arith.constant 0 : index
    %c0_44 = arith.constant 0 : index
    %91 = vector.load %arg8[%c0_43, %c0_44] : memref<4x32xf32, #tpu.memory_space<vmem>>, vector<4x32xf32>
    %92 = vector.extract_strided_slice %90 {offsets = [0, 0], sizes = [4, 32], strides = [1, 1]} : vector<4x128xf32> to vector<4x32xf32>
    %93 = arith.negf %92 : vector<4x32xf32>
    %94 = math.exp %93 : vector<4x32xf32>
    %cst_45 = arith.constant 1.000000e+00 : f32
    %95 = vector.broadcast %cst_45 : f32 to vector<4x32xf32>
    %96 = arith.addf %95, %94 : vector<4x32xf32>
    %97 = arith.divf %95, %96 : vector<4x32xf32>
    %98 = vector.extract_strided_slice %90 {offsets = [0, 32], sizes = [4, 32], strides = [1, 1]} : vector<4x128xf32> to vector<4x32xf32>
    %99 = arith.negf %98 : vector<4x32xf32>
    %100 = math.exp %99 : vector<4x32xf32>
    %cst_46 = arith.constant 1.000000e+00 : f32
    %101 = vector.broadcast %cst_46 : f32 to vector<4x32xf32>
    %102 = arith.addf %101, %100 : vector<4x32xf32>
    %103 = arith.divf %101, %102 : vector<4x32xf32>
    %104 = vector.extract_strided_slice %90 {offsets = [0, 64], sizes = [4, 32], strides = [1, 1]} : vector<4x128xf32> to vector<4x32xf32>
    %105 = math.tanh %104 : vector<4x32xf32>
    %106 = vector.extract_strided_slice %90 {offsets = [0, 96], sizes = [4, 32], strides = [1, 1]} : vector<4x128xf32> to vector<4x32xf32>
    %107 = arith.negf %106 : vector<4x32xf32>
    %108 = math.exp %107 : vector<4x32xf32>
    %cst_47 = arith.constant 1.000000e+00 : f32
    %109 = vector.broadcast %cst_47 : f32 to vector<4x32xf32>
    %110 = arith.addf %109, %108 : vector<4x32xf32>
    %111 = arith.divf %109, %110 : vector<4x32xf32>
    %112 = arith.mulf %103, %91 : vector<4x32xf32>
    %113 = arith.mulf %97, %105 : vector<4x32xf32>
    %114 = arith.addf %112, %113 : vector<4x32xf32>
    %115 = math.tanh %114 : vector<4x32xf32>
    %116 = arith.mulf %111, %115 : vector<4x32xf32>
    %c0_48 = arith.constant 0 : index
    %c0_49 = arith.constant 0 : index
    %117 = vector.load %arg7[%c0_48, %c0_49] : memref<4x32xf32, #tpu.memory_space<vmem>>, vector<4x32xf32>
    tpu.vector_store %arg7[%c0_48, %c0_49], %116 {strides = array<i32>} : memref<4x32xf32, #tpu.memory_space<vmem>>, vector<4x32xf32>,
    %c0_50 = arith.constant 0 : index
    %c0_51 = arith.constant 0 : index
    %118 = vector.load %arg8[%c0_50, %c0_51] : memref<4x32xf32, #tpu.memory_space<vmem>>, vector<4x32xf32>
    tpu.vector_store %arg8[%c0_50, %c0_51], %114 {strides = array<i32>} : memref<4x32xf32, #tpu.memory_space<vmem>>, vector<4x32xf32>,
    %119 = arith.truncf %116 : vector<4x32xf32> to vector<4x32xbf16>
    %120 = arith.index_cast %c1_i32 : i32 to index
    %c0_52 = arith.constant 0 : index
    %c0_53 = arith.constant 0 : index
    %121 = vector.load %arg5[%120, %c0_52, %c0_53] : memref<8x4x32xbf16, #tpu.memory_space<vmem>>, vector<1x4x32xbf16>
    %122 = vector.shape_cast %121 : vector<1x4x32xbf16> to vector<4x32xbf16>
    %123 = vector.shape_cast %119 : vector<4x32xbf16> to vector<1x4x32xbf16>
    tpu.vector_store %arg5[%120, %c0_52, %c0_53], %123 {strides = array<i32>} : memref<8x4x32xbf16, #tpu.memory_space<vmem>>, vector<1x4x32xbf16>,
    %c7_i32_54 = arith.constant 7 : i32
    %124 = arith.subi %c7_i32_54, %c1_i32 : i32
    %125 = arith.index_cast %124 : i32 to index
    %c0_55 = arith.constant 0 : index
    %c0_56 = arith.constant 0 : index
    %126 = vector.load %arg2[%125, %c0_55, %c0_56] : memref<8x4x128xf32, #tpu.memory_space<vmem>>, vector<1x4x128xf32>
    %127 = vector.shape_cast %126 : vector<1x4x128xf32> to vector<4x128xf32>
    %c0_57 = arith.constant 0 : index
    %c0_58 = arith.constant 0 : index
    %128 = vector.load %arg9[%c0_57, %c0_58] : memref<4x32xf32, #tpu.memory_space<vmem>>, vector<4x32xf32>
    %c0_59 = arith.constant 0 : index
    %c0_60 = arith.constant 0 : index
    %129 = vector.load %arg4[%c0_59, %c0_60] : memref<32x128xf32, #tpu.memory_space<vmem>>, vector<32x128xf32>
    %cst_61 = arith.constant dense<0.000000e+00> : vector<4x128xf32>
    %130 = tpu.matmul %128, %129, %cst_61 {dimension_numbers = #tpu.dot_dimension_numbers<[1], [0], [0], [1], [0, 0, 1, 1], [], []>} : vector<4x32xf32>, vector<32x128xf32>, vector<4x128xf32> -> vector<4x128xf32>
    %131 = arith.addf %127, %130 : vector<4x128xf32>
    %c0_62 = arith.constant 0 : index
    %c0_63 = arith.constant 0 : index
    %132 = vector.load %arg10[%c0_62, %c0_63] : memref<4x32xf32, #tpu.memory_space<vmem>>, vector<4x32xf32>
    %133 = vector.extract_strided_slice %131 {offsets = [0, 0], sizes = [4, 32], strides = [1, 1]} : vector<4x128xf32> to vector<4x32xf32>
    %134 = arith.negf %133 : vector<4x32xf32>
    %135 = math.exp %134 : vector<4x32xf32>
    %cst_64 = arith.constant 1.000000e+00 : f32
    %136 = vector.broadcast %cst_64 : f32 to vector<4x32xf32>
    %137 = arith.addf %136, %135 : vector<4x32xf32>
    %138 = arith.divf %136, %137 : vector<4x32xf32>
    %139 = vector.extract_strided_slice %131 {offsets = [0, 32], sizes = [4, 32], strides = [1, 1]} : vector<4x128xf32> to vector<4x32xf32>
    %140 = arith.negf %139 : vector<4x32xf32>
    %141 = math.exp %140 : vector<4x32xf32>
    %cst_65 = arith.constant 1.000000e+00 : f32
    %142 = vector.broadcast %cst_65 : f32 to vector<4x32xf32>
    %143 = arith.addf %142, %141 : vector<4x32xf32>
    %144 = arith.divf %142, %143 : vector<4x32xf32>
    %145 = vector.extract_strided_slice %131 {offsets = [0, 64], sizes = [4, 32], strides = [1, 1]} : vector<4x128xf32> to vector<4x32xf32>
    %146 = math.tanh %145 : vector<4x32xf32>
    %147 = vector.extract_strided_slice %131 {offsets = [0, 96], sizes = [4, 32], strides = [1, 1]} : vector<4x128xf32> to vector<4x32xf32>
    %148 = arith.negf %147 : vector<4x32xf32>
    %149 = math.exp %148 : vector<4x32xf32>
    %cst_66 = arith.constant 1.000000e+00 : f32
    %150 = vector.broadcast %cst_66 : f32 to vector<4x32xf32>
    %151 = arith.addf %150, %149 : vector<4x32xf32>
    %152 = arith.divf %150, %151 : vector<4x32xf32>
    %153 = arith.mulf %144, %132 : vector<4x32xf32>
    %154 = arith.mulf %138, %146 : vector<4x32xf32>
    %155 = arith.addf %153, %154 : vector<4x32xf32>
    %156 = math.tanh %155 : vector<4x32xf32>
    %157 = arith.mulf %152, %156 : vector<4x32xf32>
    %c0_67 = arith.constant 0 : index
    %c0_68 = arith.constant 0 : index
    %158 = vector.load %arg9[%c0_67, %c0_68] : memref<4x32xf32, #tpu.memory_space<vmem>>, vector<4x32xf32>
    tpu.vector_store %arg9[%c0_67, %c0_68], %157 {strides = array<i32>} : memref<4x32xf32, #tpu.memory_space<vmem>>, vector<4x32xf32>,
    %c0_69 = arith.constant 0 : index
    %c0_70 = arith.constant 0 : index
    %159 = vector.load %arg10[%c0_69, %c0_70] : memref<4x32xf32, #tpu.memory_space<vmem>>, vector<4x32xf32>
    tpu.vector_store %arg10[%c0_69, %c0_70], %155 {strides = array<i32>} : memref<4x32xf32, #tpu.memory_space<vmem>>, vector<4x32xf32>,
    %160 = arith.truncf %157 : vector<4x32xf32> to vector<4x32xbf16>
    %161 = arith.index_cast %124 : i32 to index
    %c0_71 = arith.constant 0 : index
    %c0_72 = arith.constant 0 : index
    %162 = vector.load %arg6[%161, %c0_71, %c0_72] : memref<8x4x32xbf16, #tpu.memory_space<vmem>>, vector<1x4x32xbf16>
    %163 = vector.shape_cast %162 : vector<1x4x32xbf16> to vector<4x32xbf16>
    %164 = vector.shape_cast %160 : vector<4x32xbf16> to vector<1x4x32xbf16>
    tpu.vector_store %arg6[%161, %c0_71, %c0_72], %164 {strides = array<i32>} : memref<8x4x32xbf16, #tpu.memory_space<vmem>>, vector<1x4x32xbf16>,
    %c2_i32 = arith.constant 2 : i32
    %165 = arith.index_cast %c2_i32 : i32 to index
    %c0_73 = arith.constant 0 : index
    %c0_74 = arith.constant 0 : index
    %166 = vector.load %arg1[%165, %c0_73, %c0_74] : memref<8x4x128xf32, #tpu.memory_space<vmem>>, vector<1x4x128xf32>
    %167 = vector.shape_cast %166 : vector<1x4x128xf32> to vector<4x128xf32>
    %c0_75 = arith.constant 0 : index
    %c0_76 = arith.constant 0 : index
    %168 = vector.load %arg7[%c0_75, %c0_76] : memref<4x32xf32, #tpu.memory_space<vmem>>, vector<4x32xf32>
    %c0_77 = arith.constant 0 : index
    %c0_78 = arith.constant 0 : index
    %169 = vector.load %arg3[%c0_77, %c0_78] : memref<32x128xf32, #tpu.memory_space<vmem>>, vector<32x128xf32>
    %cst_79 = arith.constant dense<0.000000e+00> : vector<4x128xf32>
    %170 = tpu.matmul %168, %169, %cst_79 {dimension_numbers = #tpu.dot_dimension_numbers<[1], [0], [0], [1], [0, 0, 1, 1], [], []>} : vector<4x32xf32>, vector<32x128xf32>, vector<4x128xf32> -> vector<4x128xf32>
    %171 = arith.addf %167, %170 : vector<4x128xf32>
    %c0_80 = arith.constant 0 : index
    %c0_81 = arith.constant 0 : index
    %172 = vector.load %arg8[%c0_80, %c0_81] : memref<4x32xf32, #tpu.memory_space<vmem>>, vector<4x32xf32>
    %173 = vector.extract_strided_slice %171 {offsets = [0, 0], sizes = [4, 32], strides = [1, 1]} : vector<4x128xf32> to vector<4x32xf32>
    %174 = arith.negf %173 : vector<4x32xf32>
    %175 = math.exp %174 : vector<4x32xf32>
    %cst_82 = arith.constant 1.000000e+00 : f32
    %176 = vector.broadcast %cst_82 : f32 to vector<4x32xf32>
    %177 = arith.addf %176, %175 : vector<4x32xf32>
    %178 = arith.divf %176, %177 : vector<4x32xf32>
    %179 = vector.extract_strided_slice %171 {offsets = [0, 32], sizes = [4, 32], strides = [1, 1]} : vector<4x128xf32> to vector<4x32xf32>
    %180 = arith.negf %179 : vector<4x32xf32>
    %181 = math.exp %180 : vector<4x32xf32>
    %cst_83 = arith.constant 1.000000e+00 : f32
    %182 = vector.broadcast %cst_83 : f32 to vector<4x32xf32>
    %183 = arith.addf %182, %181 : vector<4x32xf32>
    %184 = arith.divf %182, %183 : vector<4x32xf32>
    %185 = vector.extract_strided_slice %171 {offsets = [0, 64], sizes = [4, 32], strides = [1, 1]} : vector<4x128xf32> to vector<4x32xf32>
    %186 = math.tanh %185 : vector<4x32xf32>
    %187 = vector.extract_strided_slice %171 {offsets = [0, 96], sizes = [4, 32], strides = [1, 1]} : vector<4x128xf32> to vector<4x32xf32>
    %188 = arith.negf %187 : vector<4x32xf32>
    %189 = math.exp %188 : vector<4x32xf32>
    %cst_84 = arith.constant 1.000000e+00 : f32
    %190 = vector.broadcast %cst_84 : f32 to vector<4x32xf32>
    %191 = arith.addf %190, %189 : vector<4x32xf32>
    %192 = arith.divf %190, %191 : vector<4x32xf32>
    %193 = arith.mulf %184, %172 : vector<4x32xf32>
    %194 = arith.mulf %178, %186 : vector<4x32xf32>
    %195 = arith.addf %193, %194 : vector<4x32xf32>
    %196 = math.tanh %195 : vector<4x32xf32>
    %197 = arith.mulf %192, %196 : vector<4x32xf32>
    %c0_85 = arith.constant 0 : index
    %c0_86 = arith.constant 0 : index
    %198 = vector.load %arg7[%c0_85, %c0_86] : memref<4x32xf32, #tpu.memory_space<vmem>>, vector<4x32xf32>
    tpu.vector_store %arg7[%c0_85, %c0_86], %197 {strides = array<i32>} : memref<4x32xf32, #tpu.memory_space<vmem>>, vector<4x32xf32>,
    %c0_87 = arith.constant 0 : index
    %c0_88 = arith.constant 0 : index
    %199 = vector.load %arg8[%c0_87, %c0_88] : memref<4x32xf32, #tpu.memory_space<vmem>>, vector<4x32xf32>
    tpu.vector_store %arg8[%c0_87, %c0_88], %195 {strides = array<i32>} : memref<4x32xf32, #tpu.memory_space<vmem>>, vector<4x32xf32>,
    %200 = arith.truncf %197 : vector<4x32xf32> to vector<4x32xbf16>
    %201 = arith.index_cast %c2_i32 : i32 to index
    %c0_89 = arith.constant 0 : index
    %c0_90 = arith.constant 0 : index
    %202 = vector.load %arg5[%201, %c0_89, %c0_90] : memref<8x4x32xbf16, #tpu.memory_space<vmem>>, vector<1x4x32xbf16>
    %203 = vector.shape_cast %202 : vector<1x4x32xbf16> to vector<4x32xbf16>
    %204 = vector.shape_cast %200 : vector<4x32xbf16> to vector<1x4x32xbf16>
    tpu.vector_store %arg5[%201, %c0_89, %c0_90], %204 {strides = array<i32>} : memref<8x4x32xbf16, #tpu.memory_space<vmem>>, vector<1x4x32xbf16>,
    %c7_i32_91 = arith.constant 7 : i32
    %205 = arith.subi %c7_i32_91, %c2_i32 : i32
    %206 = arith.index_cast %205 : i32 to index
    %c0_92 = arith.constant 0 : index
    %c0_93 = arith.constant 0 : index
    %207 = vector.load %arg2[%206, %c0_92, %c0_93] : memref<8x4x128xf32, #tpu.memory_space<vmem>>, vector<1x4x128xf32>
    %208 = vector.shape_cast %207 : vector<1x4x128xf32> to vector<4x128xf32>
    %c0_94 = arith.constant 0 : index
    %c0_95 = arith.constant 0 : index
    %209 = vector.load %arg9[%c0_94, %c0_95] : memref<4x32xf32, #tpu.memory_space<vmem>>, vector<4x32xf32>
    %c0_96 = arith.constant 0 : index
    %c0_97 = arith.constant 0 : index
    %210 = vector.load %arg4[%c0_96, %c0_97] : memref<32x128xf32, #tpu.memory_space<vmem>>, vector<32x128xf32>
    %cst_98 = arith.constant dense<0.000000e+00> : vector<4x128xf32>
    %211 = tpu.matmul %209, %210, %cst_98 {dimension_numbers = #tpu.dot_dimension_numbers<[1], [0], [0], [1], [0, 0, 1, 1], [], []>} : vector<4x32xf32>, vector<32x128xf32>, vector<4x128xf32> -> vector<4x128xf32>
    %212 = arith.addf %208, %211 : vector<4x128xf32>
    %c0_99 = arith.constant 0 : index
    %c0_100 = arith.constant 0 : index
    %213 = vector.load %arg10[%c0_99, %c0_100] : memref<4x32xf32, #tpu.memory_space<vmem>>, vector<4x32xf32>
    %214 = vector.extract_strided_slice %212 {offsets = [0, 0], sizes = [4, 32], strides = [1, 1]} : vector<4x128xf32> to vector<4x32xf32>
    %215 = arith.negf %214 : vector<4x32xf32>
    %216 = math.exp %215 : vector<4x32xf32>
    %cst_101 = arith.constant 1.000000e+00 : f32
    %217 = vector.broadcast %cst_101 : f32 to vector<4x32xf32>
    %218 = arith.addf %217, %216 : vector<4x32xf32>
    %219 = arith.divf %217, %218 : vector<4x32xf32>
    %220 = vector.extract_strided_slice %212 {offsets = [0, 32], sizes = [4, 32], strides = [1, 1]} : vector<4x128xf32> to vector<4x32xf32>
    %221 = arith.negf %220 : vector<4x32xf32>
    %222 = math.exp %221 : vector<4x32xf32>
    %cst_102 = arith.constant 1.000000e+00 : f32
    %223 = vector.broadcast %cst_102 : f32 to vector<4x32xf32>
    %224 = arith.addf %223, %222 : vector<4x32xf32>
    %225 = arith.divf %223, %224 : vector<4x32xf32>
    %226 = vector.extract_strided_slice %212 {offsets = [0, 64], sizes = [4, 32], strides = [1, 1]} : vector<4x128xf32> to vector<4x32xf32>
    %227 = math.tanh %226 : vector<4x32xf32>
    %228 = vector.extract_strided_slice %212 {offsets = [0, 96], sizes = [4, 32], strides = [1, 1]} : vector<4x128xf32> to vector<4x32xf32>
    %229 = arith.negf %228 : vector<4x32xf32>
    %230 = math.exp %229 : vector<4x32xf32>
    %cst_103 = arith.constant 1.000000e+00 : f32
    %231 = vector.broadcast %cst_103 : f32 to vector<4x32xf32>
    %232 = arith.addf %231, %230 : vector<4x32xf32>
    %233 = arith.divf %231, %232 : vector<4x32xf32>
    %234 = arith.mulf %225, %213 : vector<4x32xf32>
    %235 = arith.mulf %219, %227 : vector<4x32xf32>
    %236 = arith.addf %234, %235 : vector<4x32xf32>
    %237 = math.tanh %236 : vector<4x32xf32>
    %238 = arith.mulf %233, %237 : vector<4x32xf32>
    %c0_104 = arith.constant 0 : index
    %c0_105 = arith.constant 0 : index
    %239 = vector.load %arg9[%c0_104, %c0_105] : memref<4x32xf32, #tpu.memory_space<vmem>>, vector<4x32xf32>
    tpu.vector_store %arg9[%c0_104, %c0_105], %238 {strides = array<i32>} : memref<4x32xf32, #tpu.memory_space<vmem>>, vector<4x32xf32>,
    %c0_106 = arith.constant 0 : index
    %c0_107 = arith.constant 0 : index
    %240 = vector.load %arg10[%c0_106, %c0_107] : memref<4x32xf32, #tpu.memory_space<vmem>>, vector<4x32xf32>
    tpu.vector_store %arg10[%c0_106, %c0_107], %236 {strides = array<i32>} : memref<4x32xf32, #tpu.memory_space<vmem>>, vector<4x32xf32>,
    %241 = arith.truncf %238 : vector<4x32xf32> to vector<4x32xbf16>
    %242 = arith.index_cast %205 : i32 to index
    %c0_108 = arith.constant 0 : index
    %c0_109 = arith.constant 0 : index
    %243 = vector.load %arg6[%242, %c0_108, %c0_109] : memref<8x4x32xbf16, #tpu.memory_space<vmem>>, vector<1x4x32xbf16>
    %244 = vector.shape_cast %243 : vector<1x4x32xbf16> to vector<4x32xbf16>
    %245 = vector.shape_cast %241 : vector<4x32xbf16> to vector<1x4x32xbf16>
    tpu.vector_store %arg6[%242, %c0_108, %c0_109], %245 {strides = array<i32>} : memref<8x4x32xbf16, #tpu.memory_space<vmem>>, vector<1x4x32xbf16>,
    %c3_i32 = arith.constant 3 : i32
    %246 = arith.index_cast %c3_i32 : i32 to index
    %c0_110 = arith.constant 0 : index
    %c0_111 = arith.constant 0 : index
    %247 = vector.load %arg1[%246, %c0_110, %c0_111] : memref<8x4x128xf32, #tpu.memory_space<vmem>>, vector<1x4x128xf32>
    %248 = vector.shape_cast %247 : vector<1x4x128xf32> to vector<4x128xf32>
    %c0_112 = arith.constant 0 : index
    %c0_113 = arith.constant 0 : index
    %249 = vector.load %arg7[%c0_112, %c0_113] : memref<4x32xf32, #tpu.memory_space<vmem>>, vector<4x32xf32>
    %c0_114 = arith.constant 0 : index
    %c0_115 = arith.constant 0 : index
    %250 = vector.load %arg3[%c0_114, %c0_115] : memref<32x128xf32, #tpu.memory_space<vmem>>, vector<32x128xf32>
    %cst_116 = arith.constant dense<0.000000e+00> : vector<4x128xf32>
    %251 = tpu.matmul %249, %250, %cst_116 {dimension_numbers = #tpu.dot_dimension_numbers<[1], [0], [0], [1], [0, 0, 1, 1], [], []>} : vector<4x32xf32>, vector<32x128xf32>, vector<4x128xf32> -> vector<4x128xf32>
    %252 = arith.addf %248, %251 : vector<4x128xf32>
    %c0_117 = arith.constant 0 : index
    %c0_118 = arith.constant 0 : index
    %253 = vector.load %arg8[%c0_117, %c0_118] : memref<4x32xf32, #tpu.memory_space<vmem>>, vector<4x32xf32>
    %254 = vector.extract_strided_slice %252 {offsets = [0, 0], sizes = [4, 32], strides = [1, 1]} : vector<4x128xf32> to vector<4x32xf32>
    %255 = arith.negf %254 : vector<4x32xf32>
    %256 = math.exp %255 : vector<4x32xf32>
    %cst_119 = arith.constant 1.000000e+00 : f32
    %257 = vector.broadcast %cst_119 : f32 to vector<4x32xf32>
    %258 = arith.addf %257, %256 : vector<4x32xf32>
    %259 = arith.divf %257, %258 : vector<4x32xf32>
    %260 = vector.extract_strided_slice %252 {offsets = [0, 32], sizes = [4, 32], strides = [1, 1]} : vector<4x128xf32> to vector<4x32xf32>
    %261 = arith.negf %260 : vector<4x32xf32>
    %262 = math.exp %261 : vector<4x32xf32>
    %cst_120 = arith.constant 1.000000e+00 : f32
    %263 = vector.broadcast %cst_120 : f32 to vector<4x32xf32>
    %264 = arith.addf %263, %262 : vector<4x32xf32>
    %265 = arith.divf %263, %264 : vector<4x32xf32>
    %266 = vector.extract_strided_slice %252 {offsets = [0, 64], sizes = [4, 32], strides = [1, 1]} : vector<4x128xf32> to vector<4x32xf32>
    %267 = math.tanh %266 : vector<4x32xf32>
    %268 = vector.extract_strided_slice %252 {offsets = [0, 96], sizes = [4, 32], strides = [1, 1]} : vector<4x128xf32> to vector<4x32xf32>
    %269 = arith.negf %268 : vector<4x32xf32>
    %270 = math.exp %269 : vector<4x32xf32>
    %cst_121 = arith.constant 1.000000e+00 : f32
    %271 = vector.broadcast %cst_121 : f32 to vector<4x32xf32>
    %272 = arith.addf %271, %270 : vector<4x32xf32>
    %273 = arith.divf %271, %272 : vector<4x32xf32>
    %274 = arith.mulf %265, %253 : vector<4x32xf32>
    %275 = arith.mulf %259, %267 : vector<4x32xf32>
    %276 = arith.addf %274, %275 : vector<4x32xf32>
    %277 = math.tanh %276 : vector<4x32xf32>
    %278 = arith.mulf %273, %277 : vector<4x32xf32>
    %c0_122 = arith.constant 0 : index
    %c0_123 = arith.constant 0 : index
    %279 = vector.load %arg7[%c0_122, %c0_123] : memref<4x32xf32, #tpu.memory_space<vmem>>, vector<4x32xf32>
    tpu.vector_store %arg7[%c0_122, %c0_123], %278 {strides = array<i32>} : memref<4x32xf32, #tpu.memory_space<vmem>>, vector<4x32xf32>,
    %c0_124 = arith.constant 0 : index
    %c0_125 = arith.constant 0 : index
    %280 = vector.load %arg8[%c0_124, %c0_125] : memref<4x32xf32, #tpu.memory_space<vmem>>, vector<4x32xf32>
    tpu.vector_store %arg8[%c0_124, %c0_125], %276 {strides = array<i32>} : memref<4x32xf32, #tpu.memory_space<vmem>>, vector<4x32xf32>,
    %281 = arith.truncf %278 : vector<4x32xf32> to vector<4x32xbf16>
    %282 = arith.index_cast %c3_i32 : i32 to index
    %c0_126 = arith.constant 0 : index
    %c0_127 = arith.constant 0 : index
    %283 = vector.load %arg5[%282, %c0_126, %c0_127] : memref<8x4x32xbf16, #tpu.memory_space<vmem>>, vector<1x4x32xbf16>
    %284 = vector.shape_cast %283 : vector<1x4x32xbf16> to vector<4x32xbf16>
    %285 = vector.shape_cast %281 : vector<4x32xbf16> to vector<1x4x32xbf16>
    tpu.vector_store %arg5[%282, %c0_126, %c0_127], %285 {strides = array<i32>} : memref<8x4x32xbf16, #tpu.memory_space<vmem>>, vector<1x4x32xbf16>,
    %c7_i32_128 = arith.constant 7 : i32
    %286 = arith.subi %c7_i32_128, %c3_i32 : i32
    %287 = arith.index_cast %286 : i32 to index
    %c0_129 = arith.constant 0 : index
    %c0_130 = arith.constant 0 : index
    %288 = vector.load %arg2[%287, %c0_129, %c0_130] : memref<8x4x128xf32, #tpu.memory_space<vmem>>, vector<1x4x128xf32>
    %289 = vector.shape_cast %288 : vector<1x4x128xf32> to vector<4x128xf32>
    %c0_131 = arith.constant 0 : index
    %c0_132 = arith.constant 0 : index
    %290 = vector.load %arg9[%c0_131, %c0_132] : memref<4x32xf32, #tpu.memory_space<vmem>>, vector<4x32xf32>
    %c0_133 = arith.constant 0 : index
    %c0_134 = arith.constant 0 : index
    %291 = vector.load %arg4[%c0_133, %c0_134] : memref<32x128xf32, #tpu.memory_space<vmem>>, vector<32x128xf32>
    %cst_135 = arith.constant dense<0.000000e+00> : vector<4x128xf32>
    %292 = tpu.matmul %290, %291, %cst_135 {dimension_numbers = #tpu.dot_dimension_numbers<[1], [0], [0], [1], [0, 0, 1, 1], [], []>} : vector<4x32xf32>, vector<32x128xf32>, vector<4x128xf32> -> vector<4x128xf32>
    %293 = arith.addf %289, %292 : vector<4x128xf32>
    %c0_136 = arith.constant 0 : index
    %c0_137 = arith.constant 0 : index
    %294 = vector.load %arg10[%c0_136, %c0_137] : memref<4x32xf32, #tpu.memory_space<vmem>>, vector<4x32xf32>
    %295 = vector.extract_strided_slice %293 {offsets = [0, 0], sizes = [4, 32], strides = [1, 1]} : vector<4x128xf32> to vector<4x32xf32>
    %296 = arith.negf %295 : vector<4x32xf32>
    %297 = math.exp %296 : vector<4x32xf32>
    %cst_138 = arith.constant 1.000000e+00 : f32
    %298 = vector.broadcast %cst_138 : f32 to vector<4x32xf32>
    %299 = arith.addf %298, %297 : vector<4x32xf32>
    %300 = arith.divf %298, %299 : vector<4x32xf32>
    %301 = vector.extract_strided_slice %293 {offsets = [0, 32], sizes = [4, 32], strides = [1, 1]} : vector<4x128xf32> to vector<4x32xf32>
    %302 = arith.negf %301 : vector<4x32xf32>
    %303 = math.exp %302 : vector<4x32xf32>
    %cst_139 = arith.constant 1.000000e+00 : f32
    %304 = vector.broadcast %cst_139 : f32 to vector<4x32xf32>
    %305 = arith.addf %304, %303 : vector<4x32xf32>
    %306 = arith.divf %304, %305 : vector<4x32xf32>
    %307 = vector.extract_strided_slice %293 {offsets = [0, 64], sizes = [4, 32], strides = [1, 1]} : vector<4x128xf32> to vector<4x32xf32>
    %308 = math.tanh %307 : vector<4x32xf32>
    %309 = vector.extract_strided_slice %293 {offsets = [0, 96], sizes = [4, 32], strides = [1, 1]} : vector<4x128xf32> to vector<4x32xf32>
    %310 = arith.negf %309 : vector<4x32xf32>
    %311 = math.exp %310 : vector<4x32xf32>
    %cst_140 = arith.constant 1.000000e+00 : f32
    %312 = vector.broadcast %cst_140 : f32 to vector<4x32xf32>
    %313 = arith.addf %312, %311 : vector<4x32xf32>
    %314 = arith.divf %312, %313 : vector<4x32xf32>
    %315 = arith.mulf %306, %294 : vector<4x32xf32>
    %316 = arith.mulf %300, %308 : vector<4x32xf32>
    %317 = arith.addf %315, %316 : vector<4x32xf32>
    %318 = math.tanh %317 : vector<4x32xf32>
    %319 = arith.mulf %314, %318 : vector<4x32xf32>
    %c0_141 = arith.constant 0 : index
    %c0_142 = arith.constant 0 : index
    %320 = vector.load %arg9[%c0_141, %c0_142] : memref<4x32xf32, #tpu.memory_space<vmem>>, vector<4x32xf32>
    tpu.vector_store %arg9[%c0_141, %c0_142], %319 {strides = array<i32>} : memref<4x32xf32, #tpu.memory_space<vmem>>, vector<4x32xf32>,
    %c0_143 = arith.constant 0 : index
    %c0_144 = arith.constant 0 : index
    %321 = vector.load %arg10[%c0_143, %c0_144] : memref<4x32xf32, #tpu.memory_space<vmem>>, vector<4x32xf32>
    tpu.vector_store %arg10[%c0_143, %c0_144], %317 {strides = array<i32>} : memref<4x32xf32, #tpu.memory_space<vmem>>, vector<4x32xf32>,
    %322 = arith.truncf %319 : vector<4x32xf32> to vector<4x32xbf16>
    %323 = arith.index_cast %286 : i32 to index
    %c0_145 = arith.constant 0 : index
    %c0_146 = arith.constant 0 : index
    %324 = vector.load %arg6[%323, %c0_145, %c0_146] : memref<8x4x32xbf16, #tpu.memory_space<vmem>>, vector<1x4x32xbf16>
    %325 = vector.shape_cast %324 : vector<1x4x32xbf16> to vector<4x32xbf16>
    %326 = vector.shape_cast %322 : vector<4x32xbf16> to vector<1x4x32xbf16>
    tpu.vector_store %arg6[%323, %c0_145, %c0_146], %326 {strides = array<i32>} : memref<8x4x32xbf16, #tpu.memory_space<vmem>>, vector<1x4x32xbf16>,
    %c4_i32 = arith.constant 4 : i32
    %327 = arith.index_cast %c4_i32 : i32 to index
    %c0_147 = arith.constant 0 : index
    %c0_148 = arith.constant 0 : index
    %328 = vector.load %arg1[%327, %c0_147, %c0_148] : memref<8x4x128xf32, #tpu.memory_space<vmem>>, vector<1x4x128xf32>
    %329 = vector.shape_cast %328 : vector<1x4x128xf32> to vector<4x128xf32>
    %c0_149 = arith.constant 0 : index
    %c0_150 = arith.constant 0 : index
    %330 = vector.load %arg7[%c0_149, %c0_150] : memref<4x32xf32, #tpu.memory_space<vmem>>, vector<4x32xf32>
    %c0_151 = arith.constant 0 : index
    %c0_152 = arith.constant 0 : index
    %331 = vector.load %arg3[%c0_151, %c0_152] : memref<32x128xf32, #tpu.memory_space<vmem>>, vector<32x128xf32>
    %cst_153 = arith.constant dense<0.000000e+00> : vector<4x128xf32>
    %332 = tpu.matmul %330, %331, %cst_153 {dimension_numbers = #tpu.dot_dimension_numbers<[1], [0], [0], [1], [0, 0, 1, 1], [], []>} : vector<4x32xf32>, vector<32x128xf32>, vector<4x128xf32> -> vector<4x128xf32>
    %333 = arith.addf %329, %332 : vector<4x128xf32>
    %c0_154 = arith.constant 0 : index
    %c0_155 = arith.constant 0 : index
    %334 = vector.load %arg8[%c0_154, %c0_155] : memref<4x32xf32, #tpu.memory_space<vmem>>, vector<4x32xf32>
    %335 = vector.extract_strided_slice %333 {offsets = [0, 0], sizes = [4, 32], strides = [1, 1]} : vector<4x128xf32> to vector<4x32xf32>
    %336 = arith.negf %335 : vector<4x32xf32>
    %337 = math.exp %336 : vector<4x32xf32>
    %cst_156 = arith.constant 1.000000e+00 : f32
    %338 = vector.broadcast %cst_156 : f32 to vector<4x32xf32>
    %339 = arith.addf %338, %337 : vector<4x32xf32>
    %340 = arith.divf %338, %339 : vector<4x32xf32>
    %341 = vector.extract_strided_slice %333 {offsets = [0, 32], sizes = [4, 32], strides = [1, 1]} : vector<4x128xf32> to vector<4x32xf32>
    %342 = arith.negf %341 : vector<4x32xf32>
    %343 = math.exp %342 : vector<4x32xf32>
    %cst_157 = arith.constant 1.000000e+00 : f32
    %344 = vector.broadcast %cst_157 : f32 to vector<4x32xf32>
    %345 = arith.addf %344, %343 : vector<4x32xf32>
    %346 = arith.divf %344, %345 : vector<4x32xf32>
    %347 = vector.extract_strided_slice %333 {offsets = [0, 64], sizes = [4, 32], strides = [1, 1]} : vector<4x128xf32> to vector<4x32xf32>
    %348 = math.tanh %347 : vector<4x32xf32>
    %349 = vector.extract_strided_slice %333 {offsets = [0, 96], sizes = [4, 32], strides = [1, 1]} : vector<4x128xf32> to vector<4x32xf32>
    %350 = arith.negf %349 : vector<4x32xf32>
    %351 = math.exp %350 : vector<4x32xf32>
    %cst_158 = arith.constant 1.000000e+00 : f32
    %352 = vector.broadcast %cst_158 : f32 to vector<4x32xf32>
    %353 = arith.addf %352, %351 : vector<4x32xf32>
    %354 = arith.divf %352, %353 : vector<4x32xf32>
    %355 = arith.mulf %346, %334 : vector<4x32xf32>
    %356 = arith.mulf %340, %348 : vector<4x32xf32>
    %357 = arith.addf %355, %356 : vector<4x32xf32>
    %358 = math.tanh %357 : vector<4x32xf32>
    %359 = arith.mulf %354, %358 : vector<4x32xf32>
    %c0_159 = arith.constant 0 : index
    %c0_160 = arith.constant 0 : index
    %360 = vector.load %arg7[%c0_159, %c0_160] : memref<4x32xf32, #tpu.memory_space<vmem>>, vector<4x32xf32>
    tpu.vector_store %arg7[%c0_159, %c0_160], %359 {strides = array<i32>} : memref<4x32xf32, #tpu.memory_space<vmem>>, vector<4x32xf32>,
    %c0_161 = arith.constant 0 : index
    %c0_162 = arith.constant 0 : index
    %361 = vector.load %arg8[%c0_161, %c0_162] : memref<4x32xf32, #tpu.memory_space<vmem>>, vector<4x32xf32>
    tpu.vector_store %arg8[%c0_161, %c0_162], %357 {strides = array<i32>} : memref<4x32xf32, #tpu.memory_space<vmem>>, vector<4x32xf32>,
    %362 = arith.truncf %359 : vector<4x32xf32> to vector<4x32xbf16>
    %363 = arith.index_cast %c4_i32 : i32 to index
    %c0_163 = arith.constant 0 : index
    %c0_164 = arith.constant 0 : index
    %364 = vector.load %arg5[%363, %c0_163, %c0_164] : memref<8x4x32xbf16, #tpu.memory_space<vmem>>, vector<1x4x32xbf16>
    %365 = vector.shape_cast %364 : vector<1x4x32xbf16> to vector<4x32xbf16>
    %366 = vector.shape_cast %362 : vector<4x32xbf16> to vector<1x4x32xbf16>
    tpu.vector_store %arg5[%363, %c0_163, %c0_164], %366 {strides = array<i32>} : memref<8x4x32xbf16, #tpu.memory_space<vmem>>, vector<1x4x32xbf16>,
    %c7_i32_165 = arith.constant 7 : i32
    %367 = arith.subi %c7_i32_165, %c4_i32 : i32
    %368 = arith.index_cast %367 : i32 to index
    %c0_166 = arith.constant 0 : index
    %c0_167 = arith.constant 0 : index
    %369 = vector.load %arg2[%368, %c0_166, %c0_167] : memref<8x4x128xf32, #tpu.memory_space<vmem>>, vector<1x4x128xf32>
    %370 = vector.shape_cast %369 : vector<1x4x128xf32> to vector<4x128xf32>
    %c0_168 = arith.constant 0 : index
    %c0_169 = arith.constant 0 : index
    %371 = vector.load %arg9[%c0_168, %c0_169] : memref<4x32xf32, #tpu.memory_space<vmem>>, vector<4x32xf32>
    %c0_170 = arith.constant 0 : index
    %c0_171 = arith.constant 0 : index
    %372 = vector.load %arg4[%c0_170, %c0_171] : memref<32x128xf32, #tpu.memory_space<vmem>>, vector<32x128xf32>
    %cst_172 = arith.constant dense<0.000000e+00> : vector<4x128xf32>
    %373 = tpu.matmul %371, %372, %cst_172 {dimension_numbers = #tpu.dot_dimension_numbers<[1], [0], [0], [1], [0, 0, 1, 1], [], []>} : vector<4x32xf32>, vector<32x128xf32>, vector<4x128xf32> -> vector<4x128xf32>
    %374 = arith.addf %370, %373 : vector<4x128xf32>
    %c0_173 = arith.constant 0 : index
    %c0_174 = arith.constant 0 : index
    %375 = vector.load %arg10[%c0_173, %c0_174] : memref<4x32xf32, #tpu.memory_space<vmem>>, vector<4x32xf32>
    %376 = vector.extract_strided_slice %374 {offsets = [0, 0], sizes = [4, 32], strides = [1, 1]} : vector<4x128xf32> to vector<4x32xf32>
    %377 = arith.negf %376 : vector<4x32xf32>
    %378 = math.exp %377 : vector<4x32xf32>
    %cst_175 = arith.constant 1.000000e+00 : f32
    %379 = vector.broadcast %cst_175 : f32 to vector<4x32xf32>
    %380 = arith.addf %379, %378 : vector<4x32xf32>
    %381 = arith.divf %379, %380 : vector<4x32xf32>
    %382 = vector.extract_strided_slice %374 {offsets = [0, 32], sizes = [4, 32], strides = [1, 1]} : vector<4x128xf32> to vector<4x32xf32>
    %383 = arith.negf %382 : vector<4x32xf32>
    %384 = math.exp %383 : vector<4x32xf32>
    %cst_176 = arith.constant 1.000000e+00 : f32
    %385 = vector.broadcast %cst_176 : f32 to vector<4x32xf32>
    %386 = arith.addf %385, %384 : vector<4x32xf32>
    %387 = arith.divf %385, %386 : vector<4x32xf32>
    %388 = vector.extract_strided_slice %374 {offsets = [0, 64], sizes = [4, 32], strides = [1, 1]} : vector<4x128xf32> to vector<4x32xf32>
    %389 = math.tanh %388 : vector<4x32xf32>
    %390 = vector.extract_strided_slice %374 {offsets = [0, 96], sizes = [4, 32], strides = [1, 1]} : vector<4x128xf32> to vector<4x32xf32>
    %391 = arith.negf %390 : vector<4x32xf32>
    %392 = math.exp %391 : vector<4x32xf32>
    %cst_177 = arith.constant 1.000000e+00 : f32
    %393 = vector.broadcast %cst_177 : f32 to vector<4x32xf32>
    %394 = arith.addf %393, %392 : vector<4x32xf32>
    %395 = arith.divf %393, %394 : vector<4x32xf32>
    %396 = arith.mulf %387, %375 : vector<4x32xf32>
    %397 = arith.mulf %381, %389 : vector<4x32xf32>
    %398 = arith.addf %396, %397 : vector<4x32xf32>
    %399 = math.tanh %398 : vector<4x32xf32>
    %400 = arith.mulf %395, %399 : vector<4x32xf32>
    %c0_178 = arith.constant 0 : index
    %c0_179 = arith.constant 0 : index
    %401 = vector.load %arg9[%c0_178, %c0_179] : memref<4x32xf32, #tpu.memory_space<vmem>>, vector<4x32xf32>
    tpu.vector_store %arg9[%c0_178, %c0_179], %400 {strides = array<i32>} : memref<4x32xf32, #tpu.memory_space<vmem>>, vector<4x32xf32>,
    %c0_180 = arith.constant 0 : index
    %c0_181 = arith.constant 0 : index
    %402 = vector.load %arg10[%c0_180, %c0_181] : memref<4x32xf32, #tpu.memory_space<vmem>>, vector<4x32xf32>
    tpu.vector_store %arg10[%c0_180, %c0_181], %398 {strides = array<i32>} : memref<4x32xf32, #tpu.memory_space<vmem>>, vector<4x32xf32>,
    %403 = arith.truncf %400 : vector<4x32xf32> to vector<4x32xbf16>
    %404 = arith.index_cast %367 : i32 to index
    %c0_182 = arith.constant 0 : index
    %c0_183 = arith.constant 0 : index
    %405 = vector.load %arg6[%404, %c0_182, %c0_183] : memref<8x4x32xbf16, #tpu.memory_space<vmem>>, vector<1x4x32xbf16>
    %406 = vector.shape_cast %405 : vector<1x4x32xbf16> to vector<4x32xbf16>
    %407 = vector.shape_cast %403 : vector<4x32xbf16> to vector<1x4x32xbf16>
    tpu.vector_store %arg6[%404, %c0_182, %c0_183], %407 {strides = array<i32>} : memref<8x4x32xbf16, #tpu.memory_space<vmem>>, vector<1x4x32xbf16>,
    %c5_i32 = arith.constant 5 : i32
    %408 = arith.index_cast %c5_i32 : i32 to index
    %c0_184 = arith.constant 0 : index
    %c0_185 = arith.constant 0 : index
    %409 = vector.load %arg1[%408, %c0_184, %c0_185] : memref<8x4x128xf32, #tpu.memory_space<vmem>>, vector<1x4x128xf32>
    %410 = vector.shape_cast %409 : vector<1x4x128xf32> to vector<4x128xf32>
    %c0_186 = arith.constant 0 : index
    %c0_187 = arith.constant 0 : index
    %411 = vector.load %arg7[%c0_186, %c0_187] : memref<4x32xf32, #tpu.memory_space<vmem>>, vector<4x32xf32>
    %c0_188 = arith.constant 0 : index
    %c0_189 = arith.constant 0 : index
    %412 = vector.load %arg3[%c0_188, %c0_189] : memref<32x128xf32, #tpu.memory_space<vmem>>, vector<32x128xf32>
    %cst_190 = arith.constant dense<0.000000e+00> : vector<4x128xf32>
    %413 = tpu.matmul %411, %412, %cst_190 {dimension_numbers = #tpu.dot_dimension_numbers<[1], [0], [0], [1], [0, 0, 1, 1], [], []>} : vector<4x32xf32>, vector<32x128xf32>, vector<4x128xf32> -> vector<4x128xf32>
    %414 = arith.addf %410, %413 : vector<4x128xf32>
    %c0_191 = arith.constant 0 : index
    %c0_192 = arith.constant 0 : index
    %415 = vector.load %arg8[%c0_191, %c0_192] : memref<4x32xf32, #tpu.memory_space<vmem>>, vector<4x32xf32>
    %416 = vector.extract_strided_slice %414 {offsets = [0, 0], sizes = [4, 32], strides = [1, 1]} : vector<4x128xf32> to vector<4x32xf32>
    %417 = arith.negf %416 : vector<4x32xf32>
    %418 = math.exp %417 : vector<4x32xf32>
    %cst_193 = arith.constant 1.000000e+00 : f32
    %419 = vector.broadcast %cst_193 : f32 to vector<4x32xf32>
    %420 = arith.addf %419, %418 : vector<4x32xf32>
    %421 = arith.divf %419, %420 : vector<4x32xf32>
    %422 = vector.extract_strided_slice %414 {offsets = [0, 32], sizes = [4, 32], strides = [1, 1]} : vector<4x128xf32> to vector<4x32xf32>
    %423 = arith.negf %422 : vector<4x32xf32>
    %424 = math.exp %423 : vector<4x32xf32>
    %cst_194 = arith.constant 1.000000e+00 : f32
    %425 = vector.broadcast %cst_194 : f32 to vector<4x32xf32>
    %426 = arith.addf %425, %424 : vector<4x32xf32>
    %427 = arith.divf %425, %426 : vector<4x32xf32>
    %428 = vector.extract_strided_slice %414 {offsets = [0, 64], sizes = [4, 32], strides = [1, 1]} : vector<4x128xf32> to vector<4x32xf32>
    %429 = math.tanh %428 : vector<4x32xf32>
    %430 = vector.extract_strided_slice %414 {offsets = [0, 96], sizes = [4, 32], strides = [1, 1]} : vector<4x128xf32> to vector<4x32xf32>
    %431 = arith.negf %430 : vector<4x32xf32>
    %432 = math.exp %431 : vector<4x32xf32>
    %cst_195 = arith.constant 1.000000e+00 : f32
    %433 = vector.broadcast %cst_195 : f32 to vector<4x32xf32>
    %434 = arith.addf %433, %432 : vector<4x32xf32>
    %435 = arith.divf %433, %434 : vector<4x32xf32>
    %436 = arith.mulf %427, %415 : vector<4x32xf32>
    %437 = arith.mulf %421, %429 : vector<4x32xf32>
    %438 = arith.addf %436, %437 : vector<4x32xf32>
    %439 = math.tanh %438 : vector<4x32xf32>
    %440 = arith.mulf %435, %439 : vector<4x32xf32>
    %c0_196 = arith.constant 0 : index
    %c0_197 = arith.constant 0 : index
    %441 = vector.load %arg7[%c0_196, %c0_197] : memref<4x32xf32, #tpu.memory_space<vmem>>, vector<4x32xf32>
    tpu.vector_store %arg7[%c0_196, %c0_197], %440 {strides = array<i32>} : memref<4x32xf32, #tpu.memory_space<vmem>>, vector<4x32xf32>,
    %c0_198 = arith.constant 0 : index
    %c0_199 = arith.constant 0 : index
    %442 = vector.load %arg8[%c0_198, %c0_199] : memref<4x32xf32, #tpu.memory_space<vmem>>, vector<4x32xf32>
    tpu.vector_store %arg8[%c0_198, %c0_199], %438 {strides = array<i32>} : memref<4x32xf32, #tpu.memory_space<vmem>>, vector<4x32xf32>,
    %443 = arith.truncf %440 : vector<4x32xf32> to vector<4x32xbf16>
    %444 = arith.index_cast %c5_i32 : i32 to index
    %c0_200 = arith.constant 0 : index
    %c0_201 = arith.constant 0 : index
    %445 = vector.load %arg5[%444, %c0_200, %c0_201] : memref<8x4x32xbf16, #tpu.memory_space<vmem>>, vector<1x4x32xbf16>
    %446 = vector.shape_cast %445 : vector<1x4x32xbf16> to vector<4x32xbf16>
    %447 = vector.shape_cast %443 : vector<4x32xbf16> to vector<1x4x32xbf16>
    tpu.vector_store %arg5[%444, %c0_200, %c0_201], %447 {strides = array<i32>} : memref<8x4x32xbf16, #tpu.memory_space<vmem>>, vector<1x4x32xbf16>,
    %c7_i32_202 = arith.constant 7 : i32
    %448 = arith.subi %c7_i32_202, %c5_i32 : i32
    %449 = arith.index_cast %448 : i32 to index
    %c0_203 = arith.constant 0 : index
    %c0_204 = arith.constant 0 : index
    %450 = vector.load %arg2[%449, %c0_203, %c0_204] : memref<8x4x128xf32, #tpu.memory_space<vmem>>, vector<1x4x128xf32>
    %451 = vector.shape_cast %450 : vector<1x4x128xf32> to vector<4x128xf32>
    %c0_205 = arith.constant 0 : index
    %c0_206 = arith.constant 0 : index
    %452 = vector.load %arg9[%c0_205, %c0_206] : memref<4x32xf32, #tpu.memory_space<vmem>>, vector<4x32xf32>
    %c0_207 = arith.constant 0 : index
    %c0_208 = arith.constant 0 : index
    %453 = vector.load %arg4[%c0_207, %c0_208] : memref<32x128xf32, #tpu.memory_space<vmem>>, vector<32x128xf32>
    %cst_209 = arith.constant dense<0.000000e+00> : vector<4x128xf32>
    %454 = tpu.matmul %452, %453, %cst_209 {dimension_numbers = #tpu.dot_dimension_numbers<[1], [0], [0], [1], [0, 0, 1, 1], [], []>} : vector<4x32xf32>, vector<32x128xf32>, vector<4x128xf32> -> vector<4x128xf32>
    %455 = arith.addf %451, %454 : vector<4x128xf32>
    %c0_210 = arith.constant 0 : index
    %c0_211 = arith.constant 0 : index
    %456 = vector.load %arg10[%c0_210, %c0_211] : memref<4x32xf32, #tpu.memory_space<vmem>>, vector<4x32xf32>
    %457 = vector.extract_strided_slice %455 {offsets = [0, 0], sizes = [4, 32], strides = [1, 1]} : vector<4x128xf32> to vector<4x32xf32>
    %458 = arith.negf %457 : vector<4x32xf32>
    %459 = math.exp %458 : vector<4x32xf32>
    %cst_212 = arith.constant 1.000000e+00 : f32
    %460 = vector.broadcast %cst_212 : f32 to vector<4x32xf32>
    %461 = arith.addf %460, %459 : vector<4x32xf32>
    %462 = arith.divf %460, %461 : vector<4x32xf32>
    %463 = vector.extract_strided_slice %455 {offsets = [0, 32], sizes = [4, 32], strides = [1, 1]} : vector<4x128xf32> to vector<4x32xf32>
    %464 = arith.negf %463 : vector<4x32xf32>
    %465 = math.exp %464 : vector<4x32xf32>
    %cst_213 = arith.constant 1.000000e+00 : f32
    %466 = vector.broadcast %cst_213 : f32 to vector<4x32xf32>
    %467 = arith.addf %466, %465 : vector<4x32xf32>
    %468 = arith.divf %466, %467 : vector<4x32xf32>
    %469 = vector.extract_strided_slice %455 {offsets = [0, 64], sizes = [4, 32], strides = [1, 1]} : vector<4x128xf32> to vector<4x32xf32>
    %470 = math.tanh %469 : vector<4x32xf32>
    %471 = vector.extract_strided_slice %455 {offsets = [0, 96], sizes = [4, 32], strides = [1, 1]} : vector<4x128xf32> to vector<4x32xf32>
    %472 = arith.negf %471 : vector<4x32xf32>
    %473 = math.exp %472 : vector<4x32xf32>
    %cst_214 = arith.constant 1.000000e+00 : f32
    %474 = vector.broadcast %cst_214 : f32 to vector<4x32xf32>
    %475 = arith.addf %474, %473 : vector<4x32xf32>
    %476 = arith.divf %474, %475 : vector<4x32xf32>
    %477 = arith.mulf %468, %456 : vector<4x32xf32>
    %478 = arith.mulf %462, %470 : vector<4x32xf32>
    %479 = arith.addf %477, %478 : vector<4x32xf32>
    %480 = math.tanh %479 : vector<4x32xf32>
    %481 = arith.mulf %476, %480 : vector<4x32xf32>
    %c0_215 = arith.constant 0 : index
    %c0_216 = arith.constant 0 : index
    %482 = vector.load %arg9[%c0_215, %c0_216] : memref<4x32xf32, #tpu.memory_space<vmem>>, vector<4x32xf32>
    tpu.vector_store %arg9[%c0_215, %c0_216], %481 {strides = array<i32>} : memref<4x32xf32, #tpu.memory_space<vmem>>, vector<4x32xf32>,
    %c0_217 = arith.constant 0 : index
    %c0_218 = arith.constant 0 : index
    %483 = vector.load %arg10[%c0_217, %c0_218] : memref<4x32xf32, #tpu.memory_space<vmem>>, vector<4x32xf32>
    tpu.vector_store %arg10[%c0_217, %c0_218], %479 {strides = array<i32>} : memref<4x32xf32, #tpu.memory_space<vmem>>, vector<4x32xf32>,
    %484 = arith.truncf %481 : vector<4x32xf32> to vector<4x32xbf16>
    %485 = arith.index_cast %448 : i32 to index
    %c0_219 = arith.constant 0 : index
    %c0_220 = arith.constant 0 : index
    %486 = vector.load %arg6[%485, %c0_219, %c0_220] : memref<8x4x32xbf16, #tpu.memory_space<vmem>>, vector<1x4x32xbf16>
    %487 = vector.shape_cast %486 : vector<1x4x32xbf16> to vector<4x32xbf16>
    %488 = vector.shape_cast %484 : vector<4x32xbf16> to vector<1x4x32xbf16>
    tpu.vector_store %arg6[%485, %c0_219, %c0_220], %488 {strides = array<i32>} : memref<8x4x32xbf16, #tpu.memory_space<vmem>>, vector<1x4x32xbf16>,
    %c6_i32 = arith.constant 6 : i32
    %489 = arith.index_cast %c6_i32 : i32 to index
    %c0_221 = arith.constant 0 : index
    %c0_222 = arith.constant 0 : index
    %490 = vector.load %arg1[%489, %c0_221, %c0_222] : memref<8x4x128xf32, #tpu.memory_space<vmem>>, vector<1x4x128xf32>
    %491 = vector.shape_cast %490 : vector<1x4x128xf32> to vector<4x128xf32>
    %c0_223 = arith.constant 0 : index
    %c0_224 = arith.constant 0 : index
    %492 = vector.load %arg7[%c0_223, %c0_224] : memref<4x32xf32, #tpu.memory_space<vmem>>, vector<4x32xf32>
    %c0_225 = arith.constant 0 : index
    %c0_226 = arith.constant 0 : index
    %493 = vector.load %arg3[%c0_225, %c0_226] : memref<32x128xf32, #tpu.memory_space<vmem>>, vector<32x128xf32>
    %cst_227 = arith.constant dense<0.000000e+00> : vector<4x128xf32>
    %494 = tpu.matmul %492, %493, %cst_227 {dimension_numbers = #tpu.dot_dimension_numbers<[1], [0], [0], [1], [0, 0, 1, 1], [], []>} : vector<4x32xf32>, vector<32x128xf32>, vector<4x128xf32> -> vector<4x128xf32>
    %495 = arith.addf %491, %494 : vector<4x128xf32>
    %c0_228 = arith.constant 0 : index
    %c0_229 = arith.constant 0 : index
    %496 = vector.load %arg8[%c0_228, %c0_229] : memref<4x32xf32, #tpu.memory_space<vmem>>, vector<4x32xf32>
    %497 = vector.extract_strided_slice %495 {offsets = [0, 0], sizes = [4, 32], strides = [1, 1]} : vector<4x128xf32> to vector<4x32xf32>
    %498 = arith.negf %497 : vector<4x32xf32>
    %499 = math.exp %498 : vector<4x32xf32>
    %cst_230 = arith.constant 1.000000e+00 : f32
    %500 = vector.broadcast %cst_230 : f32 to vector<4x32xf32>
    %501 = arith.addf %500, %499 : vector<4x32xf32>
    %502 = arith.divf %500, %501 : vector<4x32xf32>
    %503 = vector.extract_strided_slice %495 {offsets = [0, 32], sizes = [4, 32], strides = [1, 1]} : vector<4x128xf32> to vector<4x32xf32>
    %504 = arith.negf %503 : vector<4x32xf32>
    %505 = math.exp %504 : vector<4x32xf32>
    %cst_231 = arith.constant 1.000000e+00 : f32
    %506 = vector.broadcast %cst_231 : f32 to vector<4x32xf32>
    %507 = arith.addf %506, %505 : vector<4x32xf32>
    %508 = arith.divf %506, %507 : vector<4x32xf32>
    %509 = vector.extract_strided_slice %495 {offsets = [0, 64], sizes = [4, 32], strides = [1, 1]} : vector<4x128xf32> to vector<4x32xf32>
    %510 = math.tanh %509 : vector<4x32xf32>
    %511 = vector.extract_strided_slice %495 {offsets = [0, 96], sizes = [4, 32], strides = [1, 1]} : vector<4x128xf32> to vector<4x32xf32>
    %512 = arith.negf %511 : vector<4x32xf32>
    %513 = math.exp %512 : vector<4x32xf32>
    %cst_232 = arith.constant 1.000000e+00 : f32
    %514 = vector.broadcast %cst_232 : f32 to vector<4x32xf32>
    %515 = arith.addf %514, %513 : vector<4x32xf32>
    %516 = arith.divf %514, %515 : vector<4x32xf32>
    %517 = arith.mulf %508, %496 : vector<4x32xf32>
    %518 = arith.mulf %502, %510 : vector<4x32xf32>
    %519 = arith.addf %517, %518 : vector<4x32xf32>
    %520 = math.tanh %519 : vector<4x32xf32>
    %521 = arith.mulf %516, %520 : vector<4x32xf32>
    %c0_233 = arith.constant 0 : index
    %c0_234 = arith.constant 0 : index
    %522 = vector.load %arg7[%c0_233, %c0_234] : memref<4x32xf32, #tpu.memory_space<vmem>>, vector<4x32xf32>
    tpu.vector_store %arg7[%c0_233, %c0_234], %521 {strides = array<i32>} : memref<4x32xf32, #tpu.memory_space<vmem>>, vector<4x32xf32>,
    %c0_235 = arith.constant 0 : index
    %c0_236 = arith.constant 0 : index
    %523 = vector.load %arg8[%c0_235, %c0_236] : memref<4x32xf32, #tpu.memory_space<vmem>>, vector<4x32xf32>
    tpu.vector_store %arg8[%c0_235, %c0_236], %519 {strides = array<i32>} : memref<4x32xf32, #tpu.memory_space<vmem>>, vector<4x32xf32>,
    %524 = arith.truncf %521 : vector<4x32xf32> to vector<4x32xbf16>
    %525 = arith.index_cast %c6_i32 : i32 to index
    %c0_237 = arith.constant 0 : index
    %c0_238 = arith.constant 0 : index
    %526 = vector.load %arg5[%525, %c0_237, %c0_238] : memref<8x4x32xbf16, #tpu.memory_space<vmem>>, vector<1x4x32xbf16>
    %527 = vector.shape_cast %526 : vector<1x4x32xbf16> to vector<4x32xbf16>
    %528 = vector.shape_cast %524 : vector<4x32xbf16> to vector<1x4x32xbf16>
    tpu.vector_store %arg5[%525, %c0_237, %c0_238], %528 {strides = array<i32>} : memref<8x4x32xbf16, #tpu.memory_space<vmem>>, vector<1x4x32xbf16>,
    %c7_i32_239 = arith.constant 7 : i32
    %529 = arith.subi %c7_i32_239, %c6_i32 : i32
    %530 = arith.index_cast %529 : i32 to index
    %c0_240 = arith.constant 0 : index
    %c0_241 = arith.constant 0 : index
    %531 = vector.load %arg2[%530, %c0_240, %c0_241] : memref<8x4x128xf32, #tpu.memory_space<vmem>>, vector<1x4x128xf32>
    %532 = vector.shape_cast %531 : vector<1x4x128xf32> to vector<4x128xf32>
    %c0_242 = arith.constant 0 : index
    %c0_243 = arith.constant 0 : index
    %533 = vector.load %arg9[%c0_242, %c0_243] : memref<4x32xf32, #tpu.memory_space<vmem>>, vector<4x32xf32>
    %c0_244 = arith.constant 0 : index
    %c0_245 = arith.constant 0 : index
    %534 = vector.load %arg4[%c0_244, %c0_245] : memref<32x128xf32, #tpu.memory_space<vmem>>, vector<32x128xf32>
    %cst_246 = arith.constant dense<0.000000e+00> : vector<4x128xf32>
    %535 = tpu.matmul %533, %534, %cst_246 {dimension_numbers = #tpu.dot_dimension_numbers<[1], [0], [0], [1], [0, 0, 1, 1], [], []>} : vector<4x32xf32>, vector<32x128xf32>, vector<4x128xf32> -> vector<4x128xf32>
    %536 = arith.addf %532, %535 : vector<4x128xf32>
    %c0_247 = arith.constant 0 : index
    %c0_248 = arith.constant 0 : index
    %537 = vector.load %arg10[%c0_247, %c0_248] : memref<4x32xf32, #tpu.memory_space<vmem>>, vector<4x32xf32>
    %538 = vector.extract_strided_slice %536 {offsets = [0, 0], sizes = [4, 32], strides = [1, 1]} : vector<4x128xf32> to vector<4x32xf32>
    %539 = arith.negf %538 : vector<4x32xf32>
    %540 = math.exp %539 : vector<4x32xf32>
    %cst_249 = arith.constant 1.000000e+00 : f32
    %541 = vector.broadcast %cst_249 : f32 to vector<4x32xf32>
    %542 = arith.addf %541, %540 : vector<4x32xf32>
    %543 = arith.divf %541, %542 : vector<4x32xf32>
    %544 = vector.extract_strided_slice %536 {offsets = [0, 32], sizes = [4, 32], strides = [1, 1]} : vector<4x128xf32> to vector<4x32xf32>
    %545 = arith.negf %544 : vector<4x32xf32>
    %546 = math.exp %545 : vector<4x32xf32>
    %cst_250 = arith.constant 1.000000e+00 : f32
    %547 = vector.broadcast %cst_250 : f32 to vector<4x32xf32>
    %548 = arith.addf %547, %546 : vector<4x32xf32>
    %549 = arith.divf %547, %548 : vector<4x32xf32>
    %550 = vector.extract_strided_slice %536 {offsets = [0, 64], sizes = [4, 32], strides = [1, 1]} : vector<4x128xf32> to vector<4x32xf32>
    %551 = math.tanh %550 : vector<4x32xf32>
    %552 = vector.extract_strided_slice %536 {offsets = [0, 96], sizes = [4, 32], strides = [1, 1]} : vector<4x128xf32> to vector<4x32xf32>
    %553 = arith.negf %552 : vector<4x32xf32>
    %554 = math.exp %553 : vector<4x32xf32>
    %cst_251 = arith.constant 1.000000e+00 : f32
    %555 = vector.broadcast %cst_251 : f32 to vector<4x32xf32>
    %556 = arith.addf %555, %554 : vector<4x32xf32>
    %557 = arith.divf %555, %556 : vector<4x32xf32>
    %558 = arith.mulf %549, %537 : vector<4x32xf32>
    %559 = arith.mulf %543, %551 : vector<4x32xf32>
    %560 = arith.addf %558, %559 : vector<4x32xf32>
    %561 = math.tanh %560 : vector<4x32xf32>
    %562 = arith.mulf %557, %561 : vector<4x32xf32>
    %c0_252 = arith.constant 0 : index
    %c0_253 = arith.constant 0 : index
    %563 = vector.load %arg9[%c0_252, %c0_253] : memref<4x32xf32, #tpu.memory_space<vmem>>, vector<4x32xf32>
    tpu.vector_store %arg9[%c0_252, %c0_253], %562 {strides = array<i32>} : memref<4x32xf32, #tpu.memory_space<vmem>>, vector<4x32xf32>,
    %c0_254 = arith.constant 0 : index
    %c0_255 = arith.constant 0 : index
    %564 = vector.load %arg10[%c0_254, %c0_255] : memref<4x32xf32, #tpu.memory_space<vmem>>, vector<4x32xf32>
    tpu.vector_store %arg10[%c0_254, %c0_255], %560 {strides = array<i32>} : memref<4x32xf32, #tpu.memory_space<vmem>>, vector<4x32xf32>,
    %565 = arith.truncf %562 : vector<4x32xf32> to vector<4x32xbf16>
    %566 = arith.index_cast %529 : i32 to index
    %c0_256 = arith.constant 0 : index
    %c0_257 = arith.constant 0 : index
    %567 = vector.load %arg6[%566, %c0_256, %c0_257] : memref<8x4x32xbf16, #tpu.memory_space<vmem>>, vector<1x4x32xbf16>
    %568 = vector.shape_cast %567 : vector<1x4x32xbf16> to vector<4x32xbf16>
    %569 = vector.shape_cast %565 : vector<4x32xbf16> to vector<1x4x32xbf16>
    tpu.vector_store %arg6[%566, %c0_256, %c0_257], %569 {strides = array<i32>} : memref<8x4x32xbf16, #tpu.memory_space<vmem>>, vector<1x4x32xbf16>,
    %c7_i32_258 = arith.constant 7 : i32
    %570 = arith.index_cast %c7_i32_258 : i32 to index
    %c0_259 = arith.constant 0 : index
    %c0_260 = arith.constant 0 : index
    %571 = vector.load %arg1[%570, %c0_259, %c0_260] : memref<8x4x128xf32, #tpu.memory_space<vmem>>, vector<1x4x128xf32>
    %572 = vector.shape_cast %571 : vector<1x4x128xf32> to vector<4x128xf32>
    %c0_261 = arith.constant 0 : index
    %c0_262 = arith.constant 0 : index
    %573 = vector.load %arg7[%c0_261, %c0_262] : memref<4x32xf32, #tpu.memory_space<vmem>>, vector<4x32xf32>
    %c0_263 = arith.constant 0 : index
    %c0_264 = arith.constant 0 : index
    %574 = vector.load %arg3[%c0_263, %c0_264] : memref<32x128xf32, #tpu.memory_space<vmem>>, vector<32x128xf32>
    %cst_265 = arith.constant dense<0.000000e+00> : vector<4x128xf32>
    %575 = tpu.matmul %573, %574, %cst_265 {dimension_numbers = #tpu.dot_dimension_numbers<[1], [0], [0], [1], [0, 0, 1, 1], [], []>} : vector<4x32xf32>, vector<32x128xf32>, vector<4x128xf32> -> vector<4x128xf32>
    %576 = arith.addf %572, %575 : vector<4x128xf32>
    %c0_266 = arith.constant 0 : index
    %c0_267 = arith.constant 0 : index
    %577 = vector.load %arg8[%c0_266, %c0_267] : memref<4x32xf32, #tpu.memory_space<vmem>>, vector<4x32xf32>
    %578 = vector.extract_strided_slice %576 {offsets = [0, 0], sizes = [4, 32], strides = [1, 1]} : vector<4x128xf32> to vector<4x32xf32>
    %579 = arith.negf %578 : vector<4x32xf32>
    %580 = math.exp %579 : vector<4x32xf32>
    %cst_268 = arith.constant 1.000000e+00 : f32
    %581 = vector.broadcast %cst_268 : f32 to vector<4x32xf32>
    %582 = arith.addf %581, %580 : vector<4x32xf32>
    %583 = arith.divf %581, %582 : vector<4x32xf32>
    %584 = vector.extract_strided_slice %576 {offsets = [0, 32], sizes = [4, 32], strides = [1, 1]} : vector<4x128xf32> to vector<4x32xf32>
    %585 = arith.negf %584 : vector<4x32xf32>
    %586 = math.exp %585 : vector<4x32xf32>
    %cst_269 = arith.constant 1.000000e+00 : f32
    %587 = vector.broadcast %cst_269 : f32 to vector<4x32xf32>
    %588 = arith.addf %587, %586 : vector<4x32xf32>
    %589 = arith.divf %587, %588 : vector<4x32xf32>
    %590 = vector.extract_strided_slice %576 {offsets = [0, 64], sizes = [4, 32], strides = [1, 1]} : vector<4x128xf32> to vector<4x32xf32>
    %591 = math.tanh %590 : vector<4x32xf32>
    %592 = vector.extract_strided_slice %576 {offsets = [0, 96], sizes = [4, 32], strides = [1, 1]} : vector<4x128xf32> to vector<4x32xf32>
    %593 = arith.negf %592 : vector<4x32xf32>
    %594 = math.exp %593 : vector<4x32xf32>
    %cst_270 = arith.constant 1.000000e+00 : f32
    %595 = vector.broadcast %cst_270 : f32 to vector<4x32xf32>
    %596 = arith.addf %595, %594 : vector<4x32xf32>
    %597 = arith.divf %595, %596 : vector<4x32xf32>
    %598 = arith.mulf %589, %577 : vector<4x32xf32>
    %599 = arith.mulf %583, %591 : vector<4x32xf32>
    %600 = arith.addf %598, %599 : vector<4x32xf32>
    %601 = math.tanh %600 : vector<4x32xf32>
    %602 = arith.mulf %597, %601 : vector<4x32xf32>
    %c0_271 = arith.constant 0 : index
    %c0_272 = arith.constant 0 : index
    %603 = vector.load %arg7[%c0_271, %c0_272] : memref<4x32xf32, #tpu.memory_space<vmem>>, vector<4x32xf32>
    tpu.vector_store %arg7[%c0_271, %c0_272], %602 {strides = array<i32>} : memref<4x32xf32, #tpu.memory_space<vmem>>, vector<4x32xf32>,
    %c0_273 = arith.constant 0 : index
    %c0_274 = arith.constant 0 : index
    %604 = vector.load %arg8[%c0_273, %c0_274] : memref<4x32xf32, #tpu.memory_space<vmem>>, vector<4x32xf32>
    tpu.vector_store %arg8[%c0_273, %c0_274], %600 {strides = array<i32>} : memref<4x32xf32, #tpu.memory_space<vmem>>, vector<4x32xf32>,
    %605 = arith.truncf %602 : vector<4x32xf32> to vector<4x32xbf16>
    %606 = arith.index_cast %c7_i32_258 : i32 to index
    %c0_275 = arith.constant 0 : index
    %c0_276 = arith.constant 0 : index
    %607 = vector.load %arg5[%606, %c0_275, %c0_276] : memref<8x4x32xbf16, #tpu.memory_space<vmem>>, vector<1x4x32xbf16>
    %608 = vector.shape_cast %607 : vector<1x4x32xbf16> to vector<4x32xbf16>
    %609 = vector.shape_cast %605 : vector<4x32xbf16> to vector<1x4x32xbf16>
    tpu.vector_store %arg5[%606, %c0_275, %c0_276], %609 {strides = array<i32>} : memref<8x4x32xbf16, #tpu.memory_space<vmem>>, vector<1x4x32xbf16>,
    %c7_i32_277 = arith.constant 7 : i32
    %610 = arith.subi %c7_i32_277, %c7_i32_258 : i32
    %611 = arith.index_cast %610 : i32 to index
    %c0_278 = arith.constant 0 : index
    %c0_279 = arith.constant 0 : index
    %612 = vector.load %arg2[%611, %c0_278, %c0_279] : memref<8x4x128xf32, #tpu.memory_space<vmem>>, vector<1x4x128xf32>
    %613 = vector.shape_cast %612 : vector<1x4x128xf32> to vector<4x128xf32>
    %c0_280 = arith.constant 0 : index
    %c0_281 = arith.constant 0 : index
    %614 = vector.load %arg9[%c0_280, %c0_281] : memref<4x32xf32, #tpu.memory_space<vmem>>, vector<4x32xf32>
    %c0_282 = arith.constant 0 : index
    %c0_283 = arith.constant 0 : index
    %615 = vector.load %arg4[%c0_282, %c0_283] : memref<32x128xf32, #tpu.memory_space<vmem>>, vector<32x128xf32>
    %cst_284 = arith.constant dense<0.000000e+00> : vector<4x128xf32>
    %616 = tpu.matmul %614, %615, %cst_284 {dimension_numbers = #tpu.dot_dimension_numbers<[1], [0], [0], [1], [0, 0, 1, 1], [], []>} : vector<4x32xf32>, vector<32x128xf32>, vector<4x128xf32> -> vector<4x128xf32>
    %617 = arith.addf %613, %616 : vector<4x128xf32>
    %c0_285 = arith.constant 0 : index
    %c0_286 = arith.constant 0 : index
    %618 = vector.load %arg10[%c0_285, %c0_286] : memref<4x32xf32, #tpu.memory_space<vmem>>, vector<4x32xf32>
    %619 = vector.extract_strided_slice %617 {offsets = [0, 0], sizes = [4, 32], strides = [1, 1]} : vector<4x128xf32> to vector<4x32xf32>
    %620 = arith.negf %619 : vector<4x32xf32>
    %621 = math.exp %620 : vector<4x32xf32>
    %cst_287 = arith.constant 1.000000e+00 : f32
    %622 = vector.broadcast %cst_287 : f32 to vector<4x32xf32>
    %623 = arith.addf %622, %621 : vector<4x32xf32>
    %624 = arith.divf %622, %623 : vector<4x32xf32>
    %625 = vector.extract_strided_slice %617 {offsets = [0, 32], sizes = [4, 32], strides = [1, 1]} : vector<4x128xf32> to vector<4x32xf32>
    %626 = arith.negf %625 : vector<4x32xf32>
    %627 = math.exp %626 : vector<4x32xf32>
    %cst_288 = arith.constant 1.000000e+00 : f32
    %628 = vector.broadcast %cst_288 : f32 to vector<4x32xf32>
    %629 = arith.addf %628, %627 : vector<4x32xf32>
    %630 = arith.divf %628, %629 : vector<4x32xf32>
    %631 = vector.extract_strided_slice %617 {offsets = [0, 64], sizes = [4, 32], strides = [1, 1]} : vector<4x128xf32> to vector<4x32xf32>
    %632 = math.tanh %631 : vector<4x32xf32>
    %633 = vector.extract_strided_slice %617 {offsets = [0, 96], sizes = [4, 32], strides = [1, 1]} : vector<4x128xf32> to vector<4x32xf32>
    %634 = arith.negf %633 : vector<4x32xf32>
    %635 = math.exp %634 : vector<4x32xf32>
    %cst_289 = arith.constant 1.000000e+00 : f32
    %636 = vector.broadcast %cst_289 : f32 to vector<4x32xf32>
    %637 = arith.addf %636, %635 : vector<4x32xf32>
    %638 = arith.divf %636, %637 : vector<4x32xf32>
    %639 = arith.mulf %630, %618 : vector<4x32xf32>
    %640 = arith.mulf %624, %632 : vector<4x32xf32>
    %641 = arith.addf %639, %640 : vector<4x32xf32>
    %642 = math.tanh %641 : vector<4x32xf32>
    %643 = arith.mulf %638, %642 : vector<4x32xf32>
    %c0_290 = arith.constant 0 : index
    %c0_291 = arith.constant 0 : index
    %644 = vector.load %arg9[%c0_290, %c0_291] : memref<4x32xf32, #tpu.memory_space<vmem>>, vector<4x32xf32>
    tpu.vector_store %arg9[%c0_290, %c0_291], %643 {strides = array<i32>} : memref<4x32xf32, #tpu.memory_space<vmem>>, vector<4x32xf32>,
    %c0_292 = arith.constant 0 : index
    %c0_293 = arith.constant 0 : index
    %645 = vector.load %arg10[%c0_292, %c0_293] : memref<4x32xf32, #tpu.memory_space<vmem>>, vector<4x32xf32>
    tpu.vector_store %arg10[%c0_292, %c0_293], %641 {strides = array<i32>} : memref<4x32xf32, #tpu.memory_space<vmem>>, vector<4x32xf32>,
    %646 = arith.truncf %643 : vector<4x32xf32> to vector<4x32xbf16>
    %647 = arith.index_cast %610 : i32 to index
    %c0_294 = arith.constant 0 : index
    %c0_295 = arith.constant 0 : index
    %648 = vector.load %arg6[%647, %c0_294, %c0_295] : memref<8x4x32xbf16, #tpu.memory_space<vmem>>, vector<1x4x32xbf16>
    %649 = vector.shape_cast %648 : vector<1x4x32xbf16> to vector<4x32xbf16>
    %650 = vector.shape_cast %646 : vector<4x32xbf16> to vector<1x4x32xbf16>
    tpu.vector_store %arg6[%647, %c0_294, %c0_295], %650 {strides = array<i32>} : memref<8x4x32xbf16, #tpu.memory_space<vmem>>, vector<1x4x32xbf16>,
    %c8_i32 = arith.constant 8 : i32
    return
  }
  func.func @transform_0(%arg0: i32) -> (i32, i32, i32) {
    %c0_i32 = arith.constant 0 : i32
    %c0_i32_0 = arith.constant 0 : i32
    %c0_i32_1 = arith.constant 0 : i32
    return %arg0, %c0_i32, %c0_i32_0 : i32, i32, i32
  }
  func.func @transform_1(%arg0: i32) -> (i32, i32, i32) {
    %c0_i32 = arith.constant 0 : i32
    %0 = arith.subi %c0_i32, %arg0 : i32
    %c0_i32_0 = arith.constant 0 : i32
    %c0_i32_1 = arith.constant 0 : i32
    %c0_i32_2 = arith.constant 0 : i32
    return %0, %c0_i32_0, %c0_i32_1 : i32, i32, i32
  }
  func.func @transform_2(%arg0: i32) -> (i32, i32) {
    %c0_i32 = arith.constant 0 : i32
    %c0_i32_0 = arith.constant 0 : i32
    %c0_i32_1 = arith.constant 0 : i32
    return %c0_i32, %c0_i32_0 : i32, i32
  }
  func.func @transform_3(%arg0: i32) -> (i32, i32) {
    %c0_i32 = arith.constant 0 : i32
    %c0_i32_0 = arith.constant 0 : i32
    %c0_i32_1 = arith.constant 0 : i32
    return %c0_i32, %c0_i32_0 : i32, i32
  }
  func.func @transform_4(%arg0: i32) -> (i32, i32, i32) {
    %c0_i32 = arith.constant 0 : i32
    %c0_i32_0 = arith.constant 0 : i32
    %c0_i32_1 = arith.constant 0 : i32
    return %arg0, %c0_i32, %c0_i32_0 : i32, i32, i32
  }
  func.func @transform_5(%arg0: i32) -> (i32, i32, i32) {
    %c0_i32 = arith.constant 0 : i32
    %0 = arith.subi %c0_i32, %arg0 : i32
    %c0_i32_0 = arith.constant 0 : i32
    %c0_i32_1 = arith.constant 0 : i32
    %c0_i32_2 = arith.constant 0 : i32
    return %0, %c0_i32_0, %c0_i32_1 : i32, i32, i32
  }
}

module attributes {stable_mosaic.version = 11 : i64} {
  func.func @_last_layer_kernel(%arg0: i32, %arg1: memref<8x4x128xf32, #tpu.memory_space<vmem>>, %arg2: memref<4x128xf32, #tpu.memory_space<vmem>>, %arg3: memref<32x128xf32, #tpu.memory_space<vmem>>, %arg4: memref<32x8xf32, #tpu.memory_space<vmem>>, %arg5: memref<32x8xf32, #tpu.memory_space<vmem>>, %arg6: memref<1x8xf32, #tpu.memory_space<vmem>>, %arg7: memref<4x8xf32, #tpu.memory_space<vmem>>, %arg8: memref<4x32xf32, #tpu.memory_space<vmem>>, %arg9: memref<4x32xf32, #tpu.memory_space<vmem>>) attributes {dimension_semantics = [#tpu.dimension_semantics<arbitrary>], iteration_bounds = array<i64: 1>, scalar_prefetch = 0 : i64, scratch_operands = 2 : i64, tpu.core_type = #tpu.core_type<tc>, window_params = [{transform_indices = @transform_0, window_bounds = array<i64: 8, 4, 128>}, {pipeline_mode = #tpu.pipeline_mode<synchronous>, transform_indices = @transform_1, window_bounds = array<i64: 4, 128>}, {pipeline_mode = #tpu.pipeline_mode<synchronous>, transform_indices = @transform_2, window_bounds = array<i64: 32, 128>}, {pipeline_mode = #tpu.pipeline_mode<synchronous>, transform_indices = @transform_3, window_bounds = array<i64: 32, 8>}, {pipeline_mode = #tpu.pipeline_mode<synchronous>, transform_indices = @transform_4, window_bounds = array<i64: 32, 8>}, {pipeline_mode = #tpu.pipeline_mode<synchronous>, transform_indices = @transform_5, window_bounds = array<i64: 1, 8>}, {pipeline_mode = #tpu.pipeline_mode<synchronous>, transform_indices = @transform_6, window_bounds = array<i64: 4, 8>}]} {
    %c0_i32 = arith.constant 0 : i32
    %0 = arith.cmpi eq, %arg0, %c0_i32 : i32
    %1 = arith.extui %0 : i1 to i32
    %c0_i32_0 = arith.constant 0 : i32
    %2 = arith.cmpi ne, %1, %c0_i32_0 : i32
    scf.if %2 {
      %cst_130 = arith.constant 0.000000e+00 : f32
      %286 = vector.broadcast %cst_130 : f32 to vector<4x32xf32>
      %c0_131 = arith.constant 0 : index
      %c0_132 = arith.constant 0 : index
      %287 = vector.load %arg8[%c0_131, %c0_132] : memref<4x32xf32, #tpu.memory_space<vmem>>, vector<4x32xf32>
      tpu.vector_store %arg8[%c0_131, %c0_132], %286 {strides = array<i32>} : memref<4x32xf32, #tpu.memory_space<vmem>>, vector<4x32xf32>,
      %cst_133 = arith.constant 0.000000e+00 : f32
      %288 = vector.broadcast %cst_133 : f32 to vector<4x32xf32>
      %c0_134 = arith.constant 0 : index
      %c0_135 = arith.constant 0 : index
      %289 = vector.load %arg9[%c0_134, %c0_135] : memref<4x32xf32, #tpu.memory_space<vmem>>, vector<4x32xf32>
      tpu.vector_store %arg9[%c0_134, %c0_135], %288 {strides = array<i32>} : memref<4x32xf32, #tpu.memory_space<vmem>>, vector<4x32xf32>,
    } else {
    }
    %c0_i32_1 = arith.constant 0 : i32
    %3 = arith.index_cast %c0_i32_1 : i32 to index
    %c0 = arith.constant 0 : index
    %c0_2 = arith.constant 0 : index
    %4 = vector.load %arg1[%3, %c0, %c0_2] : memref<8x4x128xf32, #tpu.memory_space<vmem>>, vector<1x4x128xf32>
    %5 = vector.shape_cast %4 : vector<1x4x128xf32> to vector<4x128xf32>
    %c0_3 = arith.constant 0 : index
    %c0_4 = arith.constant 0 : index
    %6 = vector.load %arg8[%c0_3, %c0_4] : memref<4x32xf32, #tpu.memory_space<vmem>>, vector<4x32xf32>
    %c0_5 = arith.constant 0 : index
    %c0_6 = arith.constant 0 : index
    %7 = vector.load %arg3[%c0_5, %c0_6] : memref<32x128xf32, #tpu.memory_space<vmem>>, vector<32x128xf32>
    %cst = arith.constant dense<0.000000e+00> : vector<4x128xf32>
    %8 = tpu.matmul %6, %7, %cst {dimension_numbers = #tpu.dot_dimension_numbers<[1], [0], [0], [1], [0, 0, 1, 1], [], []>} : vector<4x32xf32>, vector<32x128xf32>, vector<4x128xf32> -> vector<4x128xf32>
    %9 = arith.addf %5, %8 : vector<4x128xf32>
    %c0_7 = arith.constant 0 : index
    %c0_8 = arith.constant 0 : index
    %10 = vector.load %arg9[%c0_7, %c0_8] : memref<4x32xf32, #tpu.memory_space<vmem>>, vector<4x32xf32>
    %11 = vector.extract_strided_slice %9 {offsets = [0, 0], sizes = [4, 32], strides = [1, 1]} : vector<4x128xf32> to vector<4x32xf32>
    %12 = arith.negf %11 : vector<4x32xf32>
    %13 = math.exp %12 : vector<4x32xf32>
    %cst_9 = arith.constant 1.000000e+00 : f32
    %14 = vector.broadcast %cst_9 : f32 to vector<4x32xf32>
    %15 = arith.addf %14, %13 : vector<4x32xf32>
    %16 = arith.divf %14, %15 : vector<4x32xf32>
    %17 = vector.extract_strided_slice %9 {offsets = [0, 32], sizes = [4, 32], strides = [1, 1]} : vector<4x128xf32> to vector<4x32xf32>
    %18 = arith.negf %17 : vector<4x32xf32>
    %19 = math.exp %18 : vector<4x32xf32>
    %cst_10 = arith.constant 1.000000e+00 : f32
    %20 = vector.broadcast %cst_10 : f32 to vector<4x32xf32>
    %21 = arith.addf %20, %19 : vector<4x32xf32>
    %22 = arith.divf %20, %21 : vector<4x32xf32>
    %23 = vector.extract_strided_slice %9 {offsets = [0, 64], sizes = [4, 32], strides = [1, 1]} : vector<4x128xf32> to vector<4x32xf32>
    %24 = math.tanh %23 : vector<4x32xf32>
    %25 = vector.extract_strided_slice %9 {offsets = [0, 96], sizes = [4, 32], strides = [1, 1]} : vector<4x128xf32> to vector<4x32xf32>
    %26 = arith.negf %25 : vector<4x32xf32>
    %27 = math.exp %26 : vector<4x32xf32>
    %cst_11 = arith.constant 1.000000e+00 : f32
    %28 = vector.broadcast %cst_11 : f32 to vector<4x32xf32>
    %29 = arith.addf %28, %27 : vector<4x32xf32>
    %30 = arith.divf %28, %29 : vector<4x32xf32>
    %31 = arith.mulf %22, %10 : vector<4x32xf32>
    %32 = arith.mulf %16, %24 : vector<4x32xf32>
    %33 = arith.addf %31, %32 : vector<4x32xf32>
    %34 = math.tanh %33 : vector<4x32xf32>
    %35 = arith.mulf %30, %34 : vector<4x32xf32>
    %c0_12 = arith.constant 0 : index
    %c0_13 = arith.constant 0 : index
    %36 = vector.load %arg8[%c0_12, %c0_13] : memref<4x32xf32, #tpu.memory_space<vmem>>, vector<4x32xf32>
    tpu.vector_store %arg8[%c0_12, %c0_13], %35 {strides = array<i32>} : memref<4x32xf32, #tpu.memory_space<vmem>>, vector<4x32xf32>,
    %c0_14 = arith.constant 0 : index
    %c0_15 = arith.constant 0 : index
    %37 = vector.load %arg9[%c0_14, %c0_15] : memref<4x32xf32, #tpu.memory_space<vmem>>, vector<4x32xf32>
    tpu.vector_store %arg9[%c0_14, %c0_15], %33 {strides = array<i32>} : memref<4x32xf32, #tpu.memory_space<vmem>>, vector<4x32xf32>,
    %c1_i32 = arith.constant 1 : i32
    %38 = arith.index_cast %c1_i32 : i32 to index
    %c0_16 = arith.constant 0 : index
    %c0_17 = arith.constant 0 : index
    %39 = vector.load %arg1[%38, %c0_16, %c0_17] : memref<8x4x128xf32, #tpu.memory_space<vmem>>, vector<1x4x128xf32>
    %40 = vector.shape_cast %39 : vector<1x4x128xf32> to vector<4x128xf32>
    %c0_18 = arith.constant 0 : index
    %c0_19 = arith.constant 0 : index
    %41 = vector.load %arg8[%c0_18, %c0_19] : memref<4x32xf32, #tpu.memory_space<vmem>>, vector<4x32xf32>
    %c0_20 = arith.constant 0 : index
    %c0_21 = arith.constant 0 : index
    %42 = vector.load %arg3[%c0_20, %c0_21] : memref<32x128xf32, #tpu.memory_space<vmem>>, vector<32x128xf32>
    %cst_22 = arith.constant dense<0.000000e+00> : vector<4x128xf32>
    %43 = tpu.matmul %41, %42, %cst_22 {dimension_numbers = #tpu.dot_dimension_numbers<[1], [0], [0], [1], [0, 0, 1, 1], [], []>} : vector<4x32xf32>, vector<32x128xf32>, vector<4x128xf32> -> vector<4x128xf32>
    %44 = arith.addf %40, %43 : vector<4x128xf32>
    %c0_23 = arith.constant 0 : index
    %c0_24 = arith.constant 0 : index
    %45 = vector.load %arg9[%c0_23, %c0_24] : memref<4x32xf32, #tpu.memory_space<vmem>>, vector<4x32xf32>
    %46 = vector.extract_strided_slice %44 {offsets = [0, 0], sizes = [4, 32], strides = [1, 1]} : vector<4x128xf32> to vector<4x32xf32>
    %47 = arith.negf %46 : vector<4x32xf32>
    %48 = math.exp %47 : vector<4x32xf32>
    %cst_25 = arith.constant 1.000000e+00 : f32
    %49 = vector.broadcast %cst_25 : f32 to vector<4x32xf32>
    %50 = arith.addf %49, %48 : vector<4x32xf32>
    %51 = arith.divf %49, %50 : vector<4x32xf32>
    %52 = vector.extract_strided_slice %44 {offsets = [0, 32], sizes = [4, 32], strides = [1, 1]} : vector<4x128xf32> to vector<4x32xf32>
    %53 = arith.negf %52 : vector<4x32xf32>
    %54 = math.exp %53 : vector<4x32xf32>
    %cst_26 = arith.constant 1.000000e+00 : f32
    %55 = vector.broadcast %cst_26 : f32 to vector<4x32xf32>
    %56 = arith.addf %55, %54 : vector<4x32xf32>
    %57 = arith.divf %55, %56 : vector<4x32xf32>
    %58 = vector.extract_strided_slice %44 {offsets = [0, 64], sizes = [4, 32], strides = [1, 1]} : vector<4x128xf32> to vector<4x32xf32>
    %59 = math.tanh %58 : vector<4x32xf32>
    %60 = vector.extract_strided_slice %44 {offsets = [0, 96], sizes = [4, 32], strides = [1, 1]} : vector<4x128xf32> to vector<4x32xf32>
    %61 = arith.negf %60 : vector<4x32xf32>
    %62 = math.exp %61 : vector<4x32xf32>
    %cst_27 = arith.constant 1.000000e+00 : f32
    %63 = vector.broadcast %cst_27 : f32 to vector<4x32xf32>
    %64 = arith.addf %63, %62 : vector<4x32xf32>
    %65 = arith.divf %63, %64 : vector<4x32xf32>
    %66 = arith.mulf %57, %45 : vector<4x32xf32>
    %67 = arith.mulf %51, %59 : vector<4x32xf32>
    %68 = arith.addf %66, %67 : vector<4x32xf32>
    %69 = math.tanh %68 : vector<4x32xf32>
    %70 = arith.mulf %65, %69 : vector<4x32xf32>
    %c0_28 = arith.constant 0 : index
    %c0_29 = arith.constant 0 : index
    %71 = vector.load %arg8[%c0_28, %c0_29] : memref<4x32xf32, #tpu.memory_space<vmem>>, vector<4x32xf32>
    tpu.vector_store %arg8[%c0_28, %c0_29], %70 {strides = array<i32>} : memref<4x32xf32, #tpu.memory_space<vmem>>, vector<4x32xf32>,
    %c0_30 = arith.constant 0 : index
    %c0_31 = arith.constant 0 : index
    %72 = vector.load %arg9[%c0_30, %c0_31] : memref<4x32xf32, #tpu.memory_space<vmem>>, vector<4x32xf32>
    tpu.vector_store %arg9[%c0_30, %c0_31], %68 {strides = array<i32>} : memref<4x32xf32, #tpu.memory_space<vmem>>, vector<4x32xf32>,
    %c2_i32 = arith.constant 2 : i32
    %73 = arith.index_cast %c2_i32 : i32 to index
    %c0_32 = arith.constant 0 : index
    %c0_33 = arith.constant 0 : index
    %74 = vector.load %arg1[%73, %c0_32, %c0_33] : memref<8x4x128xf32, #tpu.memory_space<vmem>>, vector<1x4x128xf32>
    %75 = vector.shape_cast %74 : vector<1x4x128xf32> to vector<4x128xf32>
    %c0_34 = arith.constant 0 : index
    %c0_35 = arith.constant 0 : index
    %76 = vector.load %arg8[%c0_34, %c0_35] : memref<4x32xf32, #tpu.memory_space<vmem>>, vector<4x32xf32>
    %c0_36 = arith.constant 0 : index
    %c0_37 = arith.constant 0 : index
    %77 = vector.load %arg3[%c0_36, %c0_37] : memref<32x128xf32, #tpu.memory_space<vmem>>, vector<32x128xf32>
    %cst_38 = arith.constant dense<0.000000e+00> : vector<4x128xf32>
    %78 = tpu.matmul %76, %77, %cst_38 {dimension_numbers = #tpu.dot_dimension_numbers<[1], [0], [0], [1], [0, 0, 1, 1], [], []>} : vector<4x32xf32>, vector<32x128xf32>, vector<4x128xf32> -> vector<4x128xf32>
    %79 = arith.addf %75, %78 : vector<4x128xf32>
    %c0_39 = arith.constant 0 : index
    %c0_40 = arith.constant 0 : index
    %80 = vector.load %arg9[%c0_39, %c0_40] : memref<4x32xf32, #tpu.memory_space<vmem>>, vector<4x32xf32>
    %81 = vector.extract_strided_slice %79 {offsets = [0, 0], sizes = [4, 32], strides = [1, 1]} : vector<4x128xf32> to vector<4x32xf32>
    %82 = arith.negf %81 : vector<4x32xf32>
    %83 = math.exp %82 : vector<4x32xf32>
    %cst_41 = arith.constant 1.000000e+00 : f32
    %84 = vector.broadcast %cst_41 : f32 to vector<4x32xf32>
    %85 = arith.addf %84, %83 : vector<4x32xf32>
    %86 = arith.divf %84, %85 : vector<4x32xf32>
    %87 = vector.extract_strided_slice %79 {offsets = [0, 32], sizes = [4, 32], strides = [1, 1]} : vector<4x128xf32> to vector<4x32xf32>
    %88 = arith.negf %87 : vector<4x32xf32>
    %89 = math.exp %88 : vector<4x32xf32>
    %cst_42 = arith.constant 1.000000e+00 : f32
    %90 = vector.broadcast %cst_42 : f32 to vector<4x32xf32>
    %91 = arith.addf %90, %89 : vector<4x32xf32>
    %92 = arith.divf %90, %91 : vector<4x32xf32>
    %93 = vector.extract_strided_slice %79 {offsets = [0, 64], sizes = [4, 32], strides = [1, 1]} : vector<4x128xf32> to vector<4x32xf32>
    %94 = math.tanh %93 : vector<4x32xf32>
    %95 = vector.extract_strided_slice %79 {offsets = [0, 96], sizes = [4, 32], strides = [1, 1]} : vector<4x128xf32> to vector<4x32xf32>
    %96 = arith.negf %95 : vector<4x32xf32>
    %97 = math.exp %96 : vector<4x32xf32>
    %cst_43 = arith.constant 1.000000e+00 : f32
    %98 = vector.broadcast %cst_43 : f32 to vector<4x32xf32>
    %99 = arith.addf %98, %97 : vector<4x32xf32>
    %100 = arith.divf %98, %99 : vector<4x32xf32>
    %101 = arith.mulf %92, %80 : vector<4x32xf32>
    %102 = arith.mulf %86, %94 : vector<4x32xf32>
    %103 = arith.addf %101, %102 : vector<4x32xf32>
    %104 = math.tanh %103 : vector<4x32xf32>
    %105 = arith.mulf %100, %104 : vector<4x32xf32>
    %c0_44 = arith.constant 0 : index
    %c0_45 = arith.constant 0 : index
    %106 = vector.load %arg8[%c0_44, %c0_45] : memref<4x32xf32, #tpu.memory_space<vmem>>, vector<4x32xf32>
    tpu.vector_store %arg8[%c0_44, %c0_45], %105 {strides = array<i32>} : memref<4x32xf32, #tpu.memory_space<vmem>>, vector<4x32xf32>,
    %c0_46 = arith.constant 0 : index
    %c0_47 = arith.constant 0 : index
    %107 = vector.load %arg9[%c0_46, %c0_47] : memref<4x32xf32, #tpu.memory_space<vmem>>, vector<4x32xf32>
    tpu.vector_store %arg9[%c0_46, %c0_47], %103 {strides = array<i32>} : memref<4x32xf32, #tpu.memory_space<vmem>>, vector<4x32xf32>,
    %c3_i32 = arith.constant 3 : i32
    %108 = arith.index_cast %c3_i32 : i32 to index
    %c0_48 = arith.constant 0 : index
    %c0_49 = arith.constant 0 : index
    %109 = vector.load %arg1[%108, %c0_48, %c0_49] : memref<8x4x128xf32, #tpu.memory_space<vmem>>, vector<1x4x128xf32>
    %110 = vector.shape_cast %109 : vector<1x4x128xf32> to vector<4x128xf32>
    %c0_50 = arith.constant 0 : index
    %c0_51 = arith.constant 0 : index
    %111 = vector.load %arg8[%c0_50, %c0_51] : memref<4x32xf32, #tpu.memory_space<vmem>>, vector<4x32xf32>
    %c0_52 = arith.constant 0 : index
    %c0_53 = arith.constant 0 : index
    %112 = vector.load %arg3[%c0_52, %c0_53] : memref<32x128xf32, #tpu.memory_space<vmem>>, vector<32x128xf32>
    %cst_54 = arith.constant dense<0.000000e+00> : vector<4x128xf32>
    %113 = tpu.matmul %111, %112, %cst_54 {dimension_numbers = #tpu.dot_dimension_numbers<[1], [0], [0], [1], [0, 0, 1, 1], [], []>} : vector<4x32xf32>, vector<32x128xf32>, vector<4x128xf32> -> vector<4x128xf32>
    %114 = arith.addf %110, %113 : vector<4x128xf32>
    %c0_55 = arith.constant 0 : index
    %c0_56 = arith.constant 0 : index
    %115 = vector.load %arg9[%c0_55, %c0_56] : memref<4x32xf32, #tpu.memory_space<vmem>>, vector<4x32xf32>
    %116 = vector.extract_strided_slice %114 {offsets = [0, 0], sizes = [4, 32], strides = [1, 1]} : vector<4x128xf32> to vector<4x32xf32>
    %117 = arith.negf %116 : vector<4x32xf32>
    %118 = math.exp %117 : vector<4x32xf32>
    %cst_57 = arith.constant 1.000000e+00 : f32
    %119 = vector.broadcast %cst_57 : f32 to vector<4x32xf32>
    %120 = arith.addf %119, %118 : vector<4x32xf32>
    %121 = arith.divf %119, %120 : vector<4x32xf32>
    %122 = vector.extract_strided_slice %114 {offsets = [0, 32], sizes = [4, 32], strides = [1, 1]} : vector<4x128xf32> to vector<4x32xf32>
    %123 = arith.negf %122 : vector<4x32xf32>
    %124 = math.exp %123 : vector<4x32xf32>
    %cst_58 = arith.constant 1.000000e+00 : f32
    %125 = vector.broadcast %cst_58 : f32 to vector<4x32xf32>
    %126 = arith.addf %125, %124 : vector<4x32xf32>
    %127 = arith.divf %125, %126 : vector<4x32xf32>
    %128 = vector.extract_strided_slice %114 {offsets = [0, 64], sizes = [4, 32], strides = [1, 1]} : vector<4x128xf32> to vector<4x32xf32>
    %129 = math.tanh %128 : vector<4x32xf32>
    %130 = vector.extract_strided_slice %114 {offsets = [0, 96], sizes = [4, 32], strides = [1, 1]} : vector<4x128xf32> to vector<4x32xf32>
    %131 = arith.negf %130 : vector<4x32xf32>
    %132 = math.exp %131 : vector<4x32xf32>
    %cst_59 = arith.constant 1.000000e+00 : f32
    %133 = vector.broadcast %cst_59 : f32 to vector<4x32xf32>
    %134 = arith.addf %133, %132 : vector<4x32xf32>
    %135 = arith.divf %133, %134 : vector<4x32xf32>
    %136 = arith.mulf %127, %115 : vector<4x32xf32>
    %137 = arith.mulf %121, %129 : vector<4x32xf32>
    %138 = arith.addf %136, %137 : vector<4x32xf32>
    %139 = math.tanh %138 : vector<4x32xf32>
    %140 = arith.mulf %135, %139 : vector<4x32xf32>
    %c0_60 = arith.constant 0 : index
    %c0_61 = arith.constant 0 : index
    %141 = vector.load %arg8[%c0_60, %c0_61] : memref<4x32xf32, #tpu.memory_space<vmem>>, vector<4x32xf32>
    tpu.vector_store %arg8[%c0_60, %c0_61], %140 {strides = array<i32>} : memref<4x32xf32, #tpu.memory_space<vmem>>, vector<4x32xf32>,
    %c0_62 = arith.constant 0 : index
    %c0_63 = arith.constant 0 : index
    %142 = vector.load %arg9[%c0_62, %c0_63] : memref<4x32xf32, #tpu.memory_space<vmem>>, vector<4x32xf32>
    tpu.vector_store %arg9[%c0_62, %c0_63], %138 {strides = array<i32>} : memref<4x32xf32, #tpu.memory_space<vmem>>, vector<4x32xf32>,
    %c4_i32 = arith.constant 4 : i32
    %143 = arith.index_cast %c4_i32 : i32 to index
    %c0_64 = arith.constant 0 : index
    %c0_65 = arith.constant 0 : index
    %144 = vector.load %arg1[%143, %c0_64, %c0_65] : memref<8x4x128xf32, #tpu.memory_space<vmem>>, vector<1x4x128xf32>
    %145 = vector.shape_cast %144 : vector<1x4x128xf32> to vector<4x128xf32>
    %c0_66 = arith.constant 0 : index
    %c0_67 = arith.constant 0 : index
    %146 = vector.load %arg8[%c0_66, %c0_67] : memref<4x32xf32, #tpu.memory_space<vmem>>, vector<4x32xf32>
    %c0_68 = arith.constant 0 : index
    %c0_69 = arith.constant 0 : index
    %147 = vector.load %arg3[%c0_68, %c0_69] : memref<32x128xf32, #tpu.memory_space<vmem>>, vector<32x128xf32>
    %cst_70 = arith.constant dense<0.000000e+00> : vector<4x128xf32>
    %148 = tpu.matmul %146, %147, %cst_70 {dimension_numbers = #tpu.dot_dimension_numbers<[1], [0], [0], [1], [0, 0, 1, 1], [], []>} : vector<4x32xf32>, vector<32x128xf32>, vector<4x128xf32> -> vector<4x128xf32>
    %149 = arith.addf %145, %148 : vector<4x128xf32>
    %c0_71 = arith.constant 0 : index
    %c0_72 = arith.constant 0 : index
    %150 = vector.load %arg9[%c0_71, %c0_72] : memref<4x32xf32, #tpu.memory_space<vmem>>, vector<4x32xf32>
    %151 = vector.extract_strided_slice %149 {offsets = [0, 0], sizes = [4, 32], strides = [1, 1]} : vector<4x128xf32> to vector<4x32xf32>
    %152 = arith.negf %151 : vector<4x32xf32>
    %153 = math.exp %152 : vector<4x32xf32>
    %cst_73 = arith.constant 1.000000e+00 : f32
    %154 = vector.broadcast %cst_73 : f32 to vector<4x32xf32>
    %155 = arith.addf %154, %153 : vector<4x32xf32>
    %156 = arith.divf %154, %155 : vector<4x32xf32>
    %157 = vector.extract_strided_slice %149 {offsets = [0, 32], sizes = [4, 32], strides = [1, 1]} : vector<4x128xf32> to vector<4x32xf32>
    %158 = arith.negf %157 : vector<4x32xf32>
    %159 = math.exp %158 : vector<4x32xf32>
    %cst_74 = arith.constant 1.000000e+00 : f32
    %160 = vector.broadcast %cst_74 : f32 to vector<4x32xf32>
    %161 = arith.addf %160, %159 : vector<4x32xf32>
    %162 = arith.divf %160, %161 : vector<4x32xf32>
    %163 = vector.extract_strided_slice %149 {offsets = [0, 64], sizes = [4, 32], strides = [1, 1]} : vector<4x128xf32> to vector<4x32xf32>
    %164 = math.tanh %163 : vector<4x32xf32>
    %165 = vector.extract_strided_slice %149 {offsets = [0, 96], sizes = [4, 32], strides = [1, 1]} : vector<4x128xf32> to vector<4x32xf32>
    %166 = arith.negf %165 : vector<4x32xf32>
    %167 = math.exp %166 : vector<4x32xf32>
    %cst_75 = arith.constant 1.000000e+00 : f32
    %168 = vector.broadcast %cst_75 : f32 to vector<4x32xf32>
    %169 = arith.addf %168, %167 : vector<4x32xf32>
    %170 = arith.divf %168, %169 : vector<4x32xf32>
    %171 = arith.mulf %162, %150 : vector<4x32xf32>
    %172 = arith.mulf %156, %164 : vector<4x32xf32>
    %173 = arith.addf %171, %172 : vector<4x32xf32>
    %174 = math.tanh %173 : vector<4x32xf32>
    %175 = arith.mulf %170, %174 : vector<4x32xf32>
    %c0_76 = arith.constant 0 : index
    %c0_77 = arith.constant 0 : index
    %176 = vector.load %arg8[%c0_76, %c0_77] : memref<4x32xf32, #tpu.memory_space<vmem>>, vector<4x32xf32>
    tpu.vector_store %arg8[%c0_76, %c0_77], %175 {strides = array<i32>} : memref<4x32xf32, #tpu.memory_space<vmem>>, vector<4x32xf32>,
    %c0_78 = arith.constant 0 : index
    %c0_79 = arith.constant 0 : index
    %177 = vector.load %arg9[%c0_78, %c0_79] : memref<4x32xf32, #tpu.memory_space<vmem>>, vector<4x32xf32>
    tpu.vector_store %arg9[%c0_78, %c0_79], %173 {strides = array<i32>} : memref<4x32xf32, #tpu.memory_space<vmem>>, vector<4x32xf32>,
    %c5_i32 = arith.constant 5 : i32
    %178 = arith.index_cast %c5_i32 : i32 to index
    %c0_80 = arith.constant 0 : index
    %c0_81 = arith.constant 0 : index
    %179 = vector.load %arg1[%178, %c0_80, %c0_81] : memref<8x4x128xf32, #tpu.memory_space<vmem>>, vector<1x4x128xf32>
    %180 = vector.shape_cast %179 : vector<1x4x128xf32> to vector<4x128xf32>
    %c0_82 = arith.constant 0 : index
    %c0_83 = arith.constant 0 : index
    %181 = vector.load %arg8[%c0_82, %c0_83] : memref<4x32xf32, #tpu.memory_space<vmem>>, vector<4x32xf32>
    %c0_84 = arith.constant 0 : index
    %c0_85 = arith.constant 0 : index
    %182 = vector.load %arg3[%c0_84, %c0_85] : memref<32x128xf32, #tpu.memory_space<vmem>>, vector<32x128xf32>
    %cst_86 = arith.constant dense<0.000000e+00> : vector<4x128xf32>
    %183 = tpu.matmul %181, %182, %cst_86 {dimension_numbers = #tpu.dot_dimension_numbers<[1], [0], [0], [1], [0, 0, 1, 1], [], []>} : vector<4x32xf32>, vector<32x128xf32>, vector<4x128xf32> -> vector<4x128xf32>
    %184 = arith.addf %180, %183 : vector<4x128xf32>
    %c0_87 = arith.constant 0 : index
    %c0_88 = arith.constant 0 : index
    %185 = vector.load %arg9[%c0_87, %c0_88] : memref<4x32xf32, #tpu.memory_space<vmem>>, vector<4x32xf32>
    %186 = vector.extract_strided_slice %184 {offsets = [0, 0], sizes = [4, 32], strides = [1, 1]} : vector<4x128xf32> to vector<4x32xf32>
    %187 = arith.negf %186 : vector<4x32xf32>
    %188 = math.exp %187 : vector<4x32xf32>
    %cst_89 = arith.constant 1.000000e+00 : f32
    %189 = vector.broadcast %cst_89 : f32 to vector<4x32xf32>
    %190 = arith.addf %189, %188 : vector<4x32xf32>
    %191 = arith.divf %189, %190 : vector<4x32xf32>
    %192 = vector.extract_strided_slice %184 {offsets = [0, 32], sizes = [4, 32], strides = [1, 1]} : vector<4x128xf32> to vector<4x32xf32>
    %193 = arith.negf %192 : vector<4x32xf32>
    %194 = math.exp %193 : vector<4x32xf32>
    %cst_90 = arith.constant 1.000000e+00 : f32
    %195 = vector.broadcast %cst_90 : f32 to vector<4x32xf32>
    %196 = arith.addf %195, %194 : vector<4x32xf32>
    %197 = arith.divf %195, %196 : vector<4x32xf32>
    %198 = vector.extract_strided_slice %184 {offsets = [0, 64], sizes = [4, 32], strides = [1, 1]} : vector<4x128xf32> to vector<4x32xf32>
    %199 = math.tanh %198 : vector<4x32xf32>
    %200 = vector.extract_strided_slice %184 {offsets = [0, 96], sizes = [4, 32], strides = [1, 1]} : vector<4x128xf32> to vector<4x32xf32>
    %201 = arith.negf %200 : vector<4x32xf32>
    %202 = math.exp %201 : vector<4x32xf32>
    %cst_91 = arith.constant 1.000000e+00 : f32
    %203 = vector.broadcast %cst_91 : f32 to vector<4x32xf32>
    %204 = arith.addf %203, %202 : vector<4x32xf32>
    %205 = arith.divf %203, %204 : vector<4x32xf32>
    %206 = arith.mulf %197, %185 : vector<4x32xf32>
    %207 = arith.mulf %191, %199 : vector<4x32xf32>
    %208 = arith.addf %206, %207 : vector<4x32xf32>
    %209 = math.tanh %208 : vector<4x32xf32>
    %210 = arith.mulf %205, %209 : vector<4x32xf32>
    %c0_92 = arith.constant 0 : index
    %c0_93 = arith.constant 0 : index
    %211 = vector.load %arg8[%c0_92, %c0_93] : memref<4x32xf32, #tpu.memory_space<vmem>>, vector<4x32xf32>
    tpu.vector_store %arg8[%c0_92, %c0_93], %210 {strides = array<i32>} : memref<4x32xf32, #tpu.memory_space<vmem>>, vector<4x32xf32>,
    %c0_94 = arith.constant 0 : index
    %c0_95 = arith.constant 0 : index
    %212 = vector.load %arg9[%c0_94, %c0_95] : memref<4x32xf32, #tpu.memory_space<vmem>>, vector<4x32xf32>
    tpu.vector_store %arg9[%c0_94, %c0_95], %208 {strides = array<i32>} : memref<4x32xf32, #tpu.memory_space<vmem>>, vector<4x32xf32>,
    %c6_i32 = arith.constant 6 : i32
    %213 = arith.index_cast %c6_i32 : i32 to index
    %c0_96 = arith.constant 0 : index
    %c0_97 = arith.constant 0 : index
    %214 = vector.load %arg1[%213, %c0_96, %c0_97] : memref<8x4x128xf32, #tpu.memory_space<vmem>>, vector<1x4x128xf32>
    %215 = vector.shape_cast %214 : vector<1x4x128xf32> to vector<4x128xf32>
    %c0_98 = arith.constant 0 : index
    %c0_99 = arith.constant 0 : index
    %216 = vector.load %arg8[%c0_98, %c0_99] : memref<4x32xf32, #tpu.memory_space<vmem>>, vector<4x32xf32>
    %c0_100 = arith.constant 0 : index
    %c0_101 = arith.constant 0 : index
    %217 = vector.load %arg3[%c0_100, %c0_101] : memref<32x128xf32, #tpu.memory_space<vmem>>, vector<32x128xf32>
    %cst_102 = arith.constant dense<0.000000e+00> : vector<4x128xf32>
    %218 = tpu.matmul %216, %217, %cst_102 {dimension_numbers = #tpu.dot_dimension_numbers<[1], [0], [0], [1], [0, 0, 1, 1], [], []>} : vector<4x32xf32>, vector<32x128xf32>, vector<4x128xf32> -> vector<4x128xf32>
    %219 = arith.addf %215, %218 : vector<4x128xf32>
    %c0_103 = arith.constant 0 : index
    %c0_104 = arith.constant 0 : index
    %220 = vector.load %arg9[%c0_103, %c0_104] : memref<4x32xf32, #tpu.memory_space<vmem>>, vector<4x32xf32>
    %221 = vector.extract_strided_slice %219 {offsets = [0, 0], sizes = [4, 32], strides = [1, 1]} : vector<4x128xf32> to vector<4x32xf32>
    %222 = arith.negf %221 : vector<4x32xf32>
    %223 = math.exp %222 : vector<4x32xf32>
    %cst_105 = arith.constant 1.000000e+00 : f32
    %224 = vector.broadcast %cst_105 : f32 to vector<4x32xf32>
    %225 = arith.addf %224, %223 : vector<4x32xf32>
    %226 = arith.divf %224, %225 : vector<4x32xf32>
    %227 = vector.extract_strided_slice %219 {offsets = [0, 32], sizes = [4, 32], strides = [1, 1]} : vector<4x128xf32> to vector<4x32xf32>
    %228 = arith.negf %227 : vector<4x32xf32>
    %229 = math.exp %228 : vector<4x32xf32>
    %cst_106 = arith.constant 1.000000e+00 : f32
    %230 = vector.broadcast %cst_106 : f32 to vector<4x32xf32>
    %231 = arith.addf %230, %229 : vector<4x32xf32>
    %232 = arith.divf %230, %231 : vector<4x32xf32>
    %233 = vector.extract_strided_slice %219 {offsets = [0, 64], sizes = [4, 32], strides = [1, 1]} : vector<4x128xf32> to vector<4x32xf32>
    %234 = math.tanh %233 : vector<4x32xf32>
    %235 = vector.extract_strided_slice %219 {offsets = [0, 96], sizes = [4, 32], strides = [1, 1]} : vector<4x128xf32> to vector<4x32xf32>
    %236 = arith.negf %235 : vector<4x32xf32>
    %237 = math.exp %236 : vector<4x32xf32>
    %cst_107 = arith.constant 1.000000e+00 : f32
    %238 = vector.broadcast %cst_107 : f32 to vector<4x32xf32>
    %239 = arith.addf %238, %237 : vector<4x32xf32>
    %240 = arith.divf %238, %239 : vector<4x32xf32>
    %241 = arith.mulf %232, %220 : vector<4x32xf32>
    %242 = arith.mulf %226, %234 : vector<4x32xf32>
    %243 = arith.addf %241, %242 : vector<4x32xf32>
    %244 = math.tanh %243 : vector<4x32xf32>
    %245 = arith.mulf %240, %244 : vector<4x32xf32>
    %c0_108 = arith.constant 0 : index
    %c0_109 = arith.constant 0 : index
    %246 = vector.load %arg8[%c0_108, %c0_109] : memref<4x32xf32, #tpu.memory_space<vmem>>, vector<4x32xf32>
    tpu.vector_store %arg8[%c0_108, %c0_109], %245 {strides = array<i32>} : memref<4x32xf32, #tpu.memory_space<vmem>>, vector<4x32xf32>,
    %c0_110 = arith.constant 0 : index
    %c0_111 = arith.constant 0 : index
    %247 = vector.load %arg9[%c0_110, %c0_111] : memref<4x32xf32, #tpu.memory_space<vmem>>, vector<4x32xf32>
    tpu.vector_store %arg9[%c0_110, %c0_111], %243 {strides = array<i32>} : memref<4x32xf32, #tpu.memory_space<vmem>>, vector<4x32xf32>,
    %c7_i32 = arith.constant 7 : i32
    %248 = arith.index_cast %c7_i32 : i32 to index
    %c0_112 = arith.constant 0 : index
    %c0_113 = arith.constant 0 : index
    %249 = vector.load %arg1[%248, %c0_112, %c0_113] : memref<8x4x128xf32, #tpu.memory_space<vmem>>, vector<1x4x128xf32>
    %250 = vector.shape_cast %249 : vector<1x4x128xf32> to vector<4x128xf32>
    %c0_114 = arith.constant 0 : index
    %c0_115 = arith.constant 0 : index
    %251 = vector.load %arg8[%c0_114, %c0_115] : memref<4x32xf32, #tpu.memory_space<vmem>>, vector<4x32xf32>
    %c0_116 = arith.constant 0 : index
    %c0_117 = arith.constant 0 : index
    %252 = vector.load %arg3[%c0_116, %c0_117] : memref<32x128xf32, #tpu.memory_space<vmem>>, vector<32x128xf32>
    %cst_118 = arith.constant dense<0.000000e+00> : vector<4x128xf32>
    %253 = tpu.matmul %251, %252, %cst_118 {dimension_numbers = #tpu.dot_dimension_numbers<[1], [0], [0], [1], [0, 0, 1, 1], [], []>} : vector<4x32xf32>, vector<32x128xf32>, vector<4x128xf32> -> vector<4x128xf32>
    %254 = arith.addf %250, %253 : vector<4x128xf32>
    %c0_119 = arith.constant 0 : index
    %c0_120 = arith.constant 0 : index
    %255 = vector.load %arg9[%c0_119, %c0_120] : memref<4x32xf32, #tpu.memory_space<vmem>>, vector<4x32xf32>
    %256 = vector.extract_strided_slice %254 {offsets = [0, 0], sizes = [4, 32], strides = [1, 1]} : vector<4x128xf32> to vector<4x32xf32>
    %257 = arith.negf %256 : vector<4x32xf32>
    %258 = math.exp %257 : vector<4x32xf32>
    %cst_121 = arith.constant 1.000000e+00 : f32
    %259 = vector.broadcast %cst_121 : f32 to vector<4x32xf32>
    %260 = arith.addf %259, %258 : vector<4x32xf32>
    %261 = arith.divf %259, %260 : vector<4x32xf32>
    %262 = vector.extract_strided_slice %254 {offsets = [0, 32], sizes = [4, 32], strides = [1, 1]} : vector<4x128xf32> to vector<4x32xf32>
    %263 = arith.negf %262 : vector<4x32xf32>
    %264 = math.exp %263 : vector<4x32xf32>
    %cst_122 = arith.constant 1.000000e+00 : f32
    %265 = vector.broadcast %cst_122 : f32 to vector<4x32xf32>
    %266 = arith.addf %265, %264 : vector<4x32xf32>
    %267 = arith.divf %265, %266 : vector<4x32xf32>
    %268 = vector.extract_strided_slice %254 {offsets = [0, 64], sizes = [4, 32], strides = [1, 1]} : vector<4x128xf32> to vector<4x32xf32>
    %269 = math.tanh %268 : vector<4x32xf32>
    %270 = vector.extract_strided_slice %254 {offsets = [0, 96], sizes = [4, 32], strides = [1, 1]} : vector<4x128xf32> to vector<4x32xf32>
    %271 = arith.negf %270 : vector<4x32xf32>
    %272 = math.exp %271 : vector<4x32xf32>
    %cst_123 = arith.constant 1.000000e+00 : f32
    %273 = vector.broadcast %cst_123 : f32 to vector<4x32xf32>
    %274 = arith.addf %273, %272 : vector<4x32xf32>
    %275 = arith.divf %273, %274 : vector<4x32xf32>
    %276 = arith.mulf %267, %255 : vector<4x32xf32>
    %277 = arith.mulf %261, %269 : vector<4x32xf32>
    %278 = arith.addf %276, %277 : vector<4x32xf32>
    %279 = math.tanh %278 : vector<4x32xf32>
    %280 = arith.mulf %275, %279 : vector<4x32xf32>
    %c0_124 = arith.constant 0 : index
    %c0_125 = arith.constant 0 : index
    %281 = vector.load %arg8[%c0_124, %c0_125] : memref<4x32xf32, #tpu.memory_space<vmem>>, vector<4x32xf32>
    tpu.vector_store %arg8[%c0_124, %c0_125], %280 {strides = array<i32>} : memref<4x32xf32, #tpu.memory_space<vmem>>, vector<4x32xf32>,
    %c0_126 = arith.constant 0 : index
    %c0_127 = arith.constant 0 : index
    %282 = vector.load %arg9[%c0_126, %c0_127] : memref<4x32xf32, #tpu.memory_space<vmem>>, vector<4x32xf32>
    tpu.vector_store %arg9[%c0_126, %c0_127], %278 {strides = array<i32>} : memref<4x32xf32, #tpu.memory_space<vmem>>, vector<4x32xf32>,
    %c8_i32 = arith.constant 8 : i32
    %c0_i32_128 = arith.constant 0 : i32
    %283 = arith.cmpi eq, %arg0, %c0_i32_128 : i32
    %284 = arith.extui %283 : i1 to i32
    %c0_i32_129 = arith.constant 0 : i32
    %285 = arith.cmpi ne, %284, %c0_i32_129 : i32
    scf.if %285 {
      %c0_130 = arith.constant 0 : index
      %c0_131 = arith.constant 0 : index
      %286 = vector.load %arg2[%c0_130, %c0_131] : memref<4x128xf32, #tpu.memory_space<vmem>>, vector<4x128xf32>
      %cst_132 = arith.constant 0.000000e+00 : f32
      %287 = vector.broadcast %cst_132 : f32 to vector<4x32xf32>
      %288 = vector.extract_strided_slice %286 {offsets = [0, 0], sizes = [4, 32], strides = [1, 1]} : vector<4x128xf32> to vector<4x32xf32>
      %289 = arith.negf %288 : vector<4x32xf32>
      %290 = math.exp %289 : vector<4x32xf32>
      %cst_133 = arith.constant 1.000000e+00 : f32
      %291 = vector.broadcast %cst_133 : f32 to vector<4x32xf32>
      %292 = arith.addf %291, %290 : vector<4x32xf32>
      %293 = arith.divf %291, %292 : vector<4x32xf32>
      %294 = vector.extract_strided_slice %286 {offsets = [0, 32], sizes = [4, 32], strides = [1, 1]} : vector<4x128xf32> to vector<4x32xf32>
      %295 = arith.negf %294 : vector<4x32xf32>
      %296 = math.exp %295 : vector<4x32xf32>
      %cst_134 = arith.constant 1.000000e+00 : f32
      %297 = vector.broadcast %cst_134 : f32 to vector<4x32xf32>
      %298 = arith.addf %297, %296 : vector<4x32xf32>
      %299 = arith.divf %297, %298 : vector<4x32xf32>
      %300 = vector.extract_strided_slice %286 {offsets = [0, 64], sizes = [4, 32], strides = [1, 1]} : vector<4x128xf32> to vector<4x32xf32>
      %301 = math.tanh %300 : vector<4x32xf32>
      %302 = vector.extract_strided_slice %286 {offsets = [0, 96], sizes = [4, 32], strides = [1, 1]} : vector<4x128xf32> to vector<4x32xf32>
      %303 = arith.negf %302 : vector<4x32xf32>
      %304 = math.exp %303 : vector<4x32xf32>
      %cst_135 = arith.constant 1.000000e+00 : f32
      %305 = vector.broadcast %cst_135 : f32 to vector<4x32xf32>
      %306 = arith.addf %305, %304 : vector<4x32xf32>
      %307 = arith.divf %305, %306 : vector<4x32xf32>
      %308 = arith.mulf %299, %287 : vector<4x32xf32>
      %309 = arith.mulf %293, %301 : vector<4x32xf32>
      %310 = arith.addf %308, %309 : vector<4x32xf32>
      %311 = math.tanh %310 : vector<4x32xf32>
      %312 = arith.mulf %307, %311 : vector<4x32xf32>
      %c0_136 = arith.constant 0 : index
      %c0_137 = arith.constant 0 : index
      %313 = vector.load %arg8[%c0_136, %c0_137] : memref<4x32xf32, #tpu.memory_space<vmem>>, vector<4x32xf32>
      %c0_138 = arith.constant 0 : index
      %c0_139 = arith.constant 0 : index
      %314 = vector.load %arg4[%c0_138, %c0_139] : memref<32x8xf32, #tpu.memory_space<vmem>>, vector<32x8xf32>
      %cst_140 = arith.constant dense<0.000000e+00> : vector<4x8xf32>
      %315 = tpu.matmul %313, %314, %cst_140 {dimension_numbers = #tpu.dot_dimension_numbers<[1], [0], [0], [1], [0, 0, 1, 1], [], []>} : vector<4x32xf32>, vector<32x8xf32>, vector<4x8xf32> -> vector<4x8xf32>
      %c0_141 = arith.constant 0 : index
      %c0_142 = arith.constant 0 : index
      %316 = vector.load %arg5[%c0_141, %c0_142] : memref<32x8xf32, #tpu.memory_space<vmem>>, vector<32x8xf32>
      %cst_143 = arith.constant dense<0.000000e+00> : vector<4x8xf32>
      %317 = tpu.matmul %312, %316, %cst_143 {dimension_numbers = #tpu.dot_dimension_numbers<[1], [0], [0], [1], [0, 0, 1, 1], [], []>} : vector<4x32xf32>, vector<32x8xf32>, vector<4x8xf32> -> vector<4x8xf32>
      %318 = arith.addf %315, %317 : vector<4x8xf32>
      %c0_144 = arith.constant 0 : index
      %c0_145 = arith.constant 0 : index
      %319 = vector.load %arg6[%c0_144, %c0_145] : memref<1x8xf32, #tpu.memory_space<vmem>>, vector<1x8xf32>
      %320 = vector.broadcast %319 : vector<1x8xf32> to vector<4x8xf32>
      %321 = arith.addf %318, %320 : vector<4x8xf32>
      %c0_146 = arith.constant 0 : index
      %c0_147 = arith.constant 0 : index
      %322 = vector.load %arg7[%c0_146, %c0_147] : memref<4x8xf32, #tpu.memory_space<vmem>>, vector<4x8xf32>
      tpu.vector_store %arg7[%c0_146, %c0_147], %321 {strides = array<i32>} : memref<4x8xf32, #tpu.memory_space<vmem>>, vector<4x8xf32>,
    } else {
    }
    return
  }
  func.func @transform_0(%arg0: i32) -> (i32, i32, i32) {
    %c0_i32 = arith.constant 0 : i32
    %c0_i32_0 = arith.constant 0 : i32
    %c0_i32_1 = arith.constant 0 : i32
    return %arg0, %c0_i32, %c0_i32_0 : i32, i32, i32
  }
  func.func @transform_1(%arg0: i32) -> (i32, i32) {
    %c0_i32 = arith.constant 0 : i32
    %c0_i32_0 = arith.constant 0 : i32
    %c0_i32_1 = arith.constant 0 : i32
    return %c0_i32, %c0_i32_0 : i32, i32
  }
  func.func @transform_2(%arg0: i32) -> (i32, i32) {
    %c0_i32 = arith.constant 0 : i32
    %c0_i32_0 = arith.constant 0 : i32
    %c0_i32_1 = arith.constant 0 : i32
    return %c0_i32, %c0_i32_0 : i32, i32
  }
  func.func @transform_3(%arg0: i32) -> (i32, i32) {
    %c0_i32 = arith.constant 0 : i32
    %c0_i32_0 = arith.constant 0 : i32
    %c0_i32_1 = arith.constant 0 : i32
    return %c0_i32, %c0_i32_0 : i32, i32
  }
  func.func @transform_4(%arg0: i32) -> (i32, i32) {
    %c0_i32 = arith.constant 0 : i32
    %c0_i32_0 = arith.constant 0 : i32
    %c0_i32_1 = arith.constant 0 : i32
    return %c0_i32, %c0_i32_0 : i32, i32
  }
  func.func @transform_5(%arg0: i32) -> (i32, i32) {
    %c0_i32 = arith.constant 0 : i32
    %c0_i32_0 = arith.constant 0 : i32
    %c0_i32_1 = arith.constant 0 : i32
    return %c0_i32, %c0_i32_0 : i32, i32
  }
  func.func @transform_6(%arg0: i32) -> (i32, i32) {
    %c0_i32 = arith.constant 0 : i32
    %c0_i32_0 = arith.constant 0 : i32
    %c0_i32_1 = arith.constant 0 : i32
    return %c0_i32, %c0_i32_0 : i32, i32
  }
}

</mosaic_0001>

<bundles_post_ra>
// kernel: lstm_forward.8
= control target key start
LH: loop header
LB: loop body
LE: loop exit
PB: predicated region body
PF: predicated region fallthrough
CT: control target
= control target key end

     0   :  { %v193_v0 = vmov 0.0   ;;  %vm194_vm0 = vmmov 0   ;;  %vm39_vm1 = vcmask 261120   ;;  %s249_s2 = inlined_call_operand.vmem [shape: bf16[32,128], index: 2, kind: input, shape index: {}]   ;;  %s250_s3 = inlined_call_operand.vmem [shape: bf16[32,128], index: 3, kind: input, shape index: {}]   ;;  %s251_s0 = inlined_call_operand.vmem [shape: bf16[4,32], index: 0, kind: input, shape index: {}]   ;;  %s252_s1 = inlined_call_operand.vmem [shape: bf16[4,32], index: 1, kind: input, shape index: {}]   ;;  %s253_s4 = inlined_call_operand.vmem [shape: f32[1,128], index: 4, kind: input, shape index: {}]   ;;  %s254_s5 = inlined_call_operand.vmem [shape: f32[4,128], index: 5, kind: output, shape index: {}]  }
   0x1   :  { %169 = vmatprep.subr.bf16.mxu1 %v193_v0  ;;  %177 = vmatprep.subr.bf16.mxu0 %v193_v0  ;;  %v189_v1 = vld [vmem:[%s249_s2] sm:$0xff]   ;;  %v191_v3 = vld [vmem:[%s249_s2 + $0x8] sm:$0xff]  }
   0x2   :  { %v190_v2 = vld [vmem:[%s250_s3] sm:$0xff]   ;;  %173 = vmatprep.mubr.msk.bf16.mxu1 %vm194_vm0, %v193_v0  ;;  %181 = vmatprep.mubr.msk.bf16.mxu0 %vm194_vm0, %v193_v0  ;;  %v192_v4 = vld [vmem:[%s250_s3 + $0x8] sm:$0xff]  }
   0x3   :  { %170 = vmatpush3.bf16.msra.mxu1 %v189_v1  ;;  %178 = vmatpush3.bf16.msra.mxu0 %v190_v2  ;;  %v22_v5 = vld [vmem:[%s251_s0] sm:$0x3] }
   0x4   :  { %171 = vmatprep.subr.bf16.mxu1 %v193_v0  ;;  %179 = vmatprep.subr.bf16.mxu0 %v193_v0  ;;  %v90_v6 = vld [vmem:[%s252_s1] sm:$0x3] }
   0x5   :  { %v159_v7 = vld [vmem:[%s253_s4] ss:$0 sm:$0xff] }
   0x7   :  { %172 = vmatpush3.bf16.msra.mxu1 %v191_v3  ;;  %180 = vmatpush3.bf16.msra.mxu0 %v192_v4 }
   0xa   :  { %174 = vmatmul.mubr.msk.bf16.vlgmr.msra.gmra.mrb[0].mxu1 %vm39_vm1, %v22_v5  ;;  %182 = vmatmul.mubr.msk.bf16.vlgmr.msra.gmra.mrb[0].mxu0 %vm39_vm1, %v90_v6 }
  0xdd   :  { %v77_v8 = vpop.f32.mrb[0].mxu1  ;;  %v144_v10 = vpop.f32.mrb[0].mxu0 }
  0xde   :  { %v89_v9 = vadd.f32 %v159_v7, %v77_v8  ;;  %v175_v11 = vpop.f32.mrb[1].mxu1  ;;  %v183_v12 = vpop.f32.mrb[1].mxu0 }
  0xdf   :  { %v80_v13 = vpop.f32.mrb[2].mxu1  ;;  %v147_v15 = vpop.f32.mrb[2].mxu0 }
  0xe0   :  { %v150_v14 = vadd.f32 %v144_v10, %v89_v9  ;;  %v176_v16 = vpop.f32.mrb[3].mxu1  ;;  %v184_v17 = vpop.f32.mrb[3].mxu0 }
  0xe2   :  { %151 = vst [vmem:[%s254_s5] sm:$0xf] %v150_v14 }

// kernel: lstm_forward.7
= control target key start
LH: loop header
LB: loop body
LE: loop exit
PB: predicated region body
PF: predicated region fallthrough
CT: control target
= control target key end

     0   :  { %vm52_vm0 = vcmask 261120   ;;  %s337_s2 = inlined_call_operand.vmem [shape: bf16[32,128], index: 2, kind: input, shape index: {}]   ;;  %s338_s3 = inlined_call_operand.vmem [shape: bf16[32,128], index: 3, kind: input, shape index: {}]   ;;  %s339_s0 = inlined_call_operand.vmem [shape: bf16[32,32], index: 0, kind: input, shape index: {}]   ;;  %s340_s1 = inlined_call_operand.vmem [shape: bf16[32,32], index: 1, kind: input, shape index: {}]   ;;  %s341_s4 = inlined_call_operand.vmem [shape: f32[1,128], index: 4, kind: input, shape index: {}]   ;;  %s342_s5 = inlined_call_operand.vmem [shape: f32[32,128], index: 5, kind: output, shape index: {}]  }
   0x1   :  { %v260_v0 = vld [vmem:[%s337_s2] sm:$0xff]   ;;  %v262_v2 = vld [vmem:[%s337_s2 + $0x8] sm:$0xff]  }
   0x2   :  { %v261_v1 = vld [vmem:[%s338_s3] sm:$0xff]   ;;  %236 = vmatprep.subr.bf16.mxu1 %v260_v0  ;;  %v263_v3 = vld [vmem:[%s338_s3 + $0x8] sm:$0xff]  }
   0x3   :  { %244 = vmatprep.subr.bf16.mxu0 %v261_v1  ;;  %237 = vmatpush3.bf16.msra.mxu1 %v260_v0  ;;  %v264_v4 = vld [vmem:[%s339_s0] sm:$0xff]   ;;  %v266_v6 = vld [vmem:[%s339_s0 + $0x8] sm:$0xff]  }
   0x4   :  { %245 = vmatpush3.bf16.msra.mxu0 %v261_v1  ;;  %238 = vmatprep.subr.bf16.mxu1 %v262_v2  ;;  %v265_v5 = vld [vmem:[%s340_s1] sm:$0xff]   ;;  %v267_v7 = vld [vmem:[%s340_s1 + $0x8] sm:$0xff]  }
   0x5   :  { %246 = vmatprep.subr.bf16.mxu0 %v263_v3  ;;  %240 = vmatprep.mubr.msk.bf16.mxu1 %vm52_vm0, %v264_v4  ;;  %v221_v8 = vld [vmem:[%s341_s4] ss:$0 sm:$0xff] }
   0x6   :  { %248 = vmatprep.mubr.msk.bf16.mxu0 %vm52_vm0, %v265_v5 }
   0x7   :  { %239 = vmatpush3.bf16.msra.mxu1 %v262_v2 }
   0x8   :  { %247 = vmatpush3.bf16.msra.mxu0 %v263_v3 }
   0xa   :  { %241 = vmatmul.mubr.msk.bf16.vlgmr.msra.gmra.mrb[0].mxu1 %vm52_vm0, %v266_v6 }
   0xb   :  { %249 = vmatmul.mubr.msk.bf16.vlgmr.msra.gmra.mrb[0].mxu0 %vm52_vm0, %v267_v7 }
  0xdd   :  { %v242_v9 = vpop.f32.mrb[0].mxu1 }
  0xde   :  { %v116_v10 = vadd.f32 %v242_v9, %v221_v8  ;;  %v250_v11 = vpop.f32.mrb[0].mxu0  ;;  %v93_v12 = vpop.f32.mrb[1].mxu1 }
  0xdf   :  { %v114_v13 = vadd.f32 %v221_v8, %v93_v12  ;;  %v188_v14 = vpop.f32.mrb[1].mxu0  ;;  %v243_v15 = vpop.f32.mrb[2].mxu1 }
  0xe0   :  { %v205_v16 = vadd.f32 %v250_v11, %v116_v10  ;;  %v117_v17 = vadd.f32 %v243_v15, %v221_v8  ;;  %v251_v18 = vpop.f32.mrb[2].mxu0  ;;  %v96_v19 = vpop.f32.mrb[3].mxu1 }
  0xe1   :  { %v203_v20 = vadd.f32 %v188_v14, %v114_v13  ;;  %v115_v21 = vadd.f32 %v221_v8, %v96_v19  ;;  %v191_v22 = vpop.f32.mrb[3].mxu0 }
  0xe2   :  { %209 = vst [vmem:[%s342_s5 + $0x10] sm:$0xff] %v205_v16  ;;  %v206_v23 = vadd.f32 %v251_v18, %v117_v17 }
  0xe3   :  { %207 = vst [vmem:[%s342_s5] sm:$0xff] %v203_v20  ;;  %v204_v24 = vadd.f32 %v191_v22, %v115_v21 }
  0xe4   :  { %210 = vst [vmem:[%s342_s5 + $0x18] sm:$0xff] %v206_v23 }
  0xe5   :  { %208 = vst [vmem:[%s342_s5 + $0x8] sm:$0xff] %v204_v24 }

// kernel: lstm_forward.5
= control target key start
LH: loop header
LB: loop body
LE: loop exit
PB: predicated region body
PF: predicated region fallthrough
CT: control target
= control target key end

     0   :  { %vm46_vm0 = vcmask 130048   ;;  %s335_s1 = inlined_call_operand.vmem [shape: bf16[16,128], index: 1, kind: input, shape index: {}]   ;;  %s336_s2 = inlined_call_operand.vmem [shape: bf16[16,128], index: 2, kind: input, shape index: {}]   ;;  %s337_s0 = inlined_call_operand.vmem [shape: bf16[32,16], index: 0, kind: input, shape index: {}]   ;;  %s338_s3 = inlined_call_operand.vmem [shape: f32[1,128], index: 3, kind: input, shape index: {}]   ;;  %s339_s4 = inlined_call_operand.vmem [shape: f32[1,128], index: 4, kind: input, shape index: {}]   ;;  %s340_s5 = inlined_call_operand.vmem [shape: f32[32,128], index: 5, kind: output, shape index: {0}]   ;;  %s341_s6 = inlined_call_operand.vmem [shape: f32[32,128], index: 6, kind: output, shape index: {1}]  }
   0x1   :  { %v246_v0 = vld [vmem:[%s335_s1] sm:$0xff]   ;;  %v250_v4 = vld [vmem:[%s337_s0 + $0x8] sm:$0xff]  }
   0x2   :  { %v247_v1 = vld [vmem:[%s336_s2] sm:$0xff]   ;;  %234 = vmatprep.subr.bf16.mxu0 %v246_v0  ;;  %v251_v5 = vld [vmem:[%s337_s0 + $0x8] sm:$0xff]  }
   0x3   :  { %v248_v2 = vld [vmem:[%s337_s0] sm:$0xff]   ;;  %240 = vmatprep.subr.bf16.mxu1 %v247_v1  ;;  %235 = vmatpush3.bf16.msra.mxu0 %v246_v0 }
   0x4   :  { %v249_v3 = vld [vmem:[%s337_s0] sm:$0xff]   ;;  %241 = vmatpush3.bf16.msra.mxu1 %v247_v1  ;;  %236 = vmatprep.mubr.msk.bf16.mxu0 %vm46_vm0, %v248_v2 }
   0x5   :  { %242 = vmatprep.mubr.msk.bf16.mxu1 %vm46_vm0, %v249_v3  ;;  %v221_v6 = vld [vmem:[%s338_s3] ss:$0 sm:$0xff] }
   0x6   :  { %237 = vmatmul.mubr.msk.bf16.vlgmr.msra.gmra.mrb[0].mxu0 %vm46_vm0, %v250_v4  ;;  %v227_v7 = vld [vmem:[%s339_s4] ss:$0 sm:$0xff] }
   0x7   :  { %243 = vmatmul.mubr.msk.bf16.vlgmr.msra.gmra.mrb[0].mxu1 %vm46_vm0, %v251_v5 }
  0xd9   :  { %v238_v8 = vpop.f32.mrb[0].mxu0 }
  0xda   :  { %v110_v9 = vadd.f32 %v238_v8, %v221_v6  ;;  %v244_v10 = vpop.f32.mrb[0].mxu1  ;;  %v87_v11 = vpop.f32.mrb[1].mxu0 }
  0xdb   :  { %v202_v12 = vadd.f32 %v244_v10, %v227_v7  ;;  %v108_v13 = vadd.f32 %v221_v6, %v87_v11  ;;  %v179_v14 = vpop.f32.mrb[1].mxu1  ;;  %v239_v15 = vpop.f32.mrb[2].mxu0 }
  0xdc   :  { %114 = vst [vmem:[%s340_s5 + $0x10] sm:$0xff] %v110_v9  ;;  %v200_v16 = vadd.f32 %v227_v7, %v179_v14  ;;  %v111_v17 = vadd.f32 %v239_v15, %v221_v6  ;;  %v245_v18 = vpop.f32.mrb[2].mxu1  ;;  %v90_v19 = vpop.f32.mrb[3].mxu0 }
  0xdd   :  { %206 = vst [vmem:[%s341_s6 + $0x10] sm:$0xff] %v202_v12  ;;  %112 = vst [vmem:[%s340_s5] sm:$0xff] %v108_v13  ;;  %v203_v20 = vadd.f32 %v245_v18, %v227_v7  ;;  %v109_v21 = vadd.f32 %v221_v6, %v90_v19  ;;  %v182_v22 = vpop.f32.mrb[3].mxu1 }
  0xde   :  { %204 = vst [vmem:[%s341_s6] sm:$0xff] %v200_v16  ;;  %115 = vst [vmem:[%s340_s5 + $0x18] sm:$0xff] %v111_v17  ;;  %v201_v23 = vadd.f32 %v227_v7, %v182_v22 }
  0xdf   :  { %207 = vst [vmem:[%s341_s6 + $0x18] sm:$0xff] %v203_v20  ;;  %113 = vst [vmem:[%s340_s5 + $0x8] sm:$0xff] %v109_v21 }
  0xe0   :  { %205 = vst [vmem:[%s341_s6 + $0x8] sm:$0xff] %v201_v23 }

// kernel: lstm_forward.9
= control target key start
LH: loop header
LB: loop body
LE: loop exit
PB: predicated region body
PF: predicated region fallthrough
CT: control target
= control target key end

     0   :  { %v1551_v3 = vmov 0.0|0.0   ;;  %vm1552_vm0 = vmmov 0   ;;  %v1553_v6 = vmov 0.0   ;;  %vm28_vm1 = vcmask 257024   ;;  %s1813_s0 = inlined_call_operand.vmem [shape: f32[8,4,128], index: 0, kind: input, shape index: {}]   ;;  %s1814_s1 = inlined_call_operand.vmem [shape: f32[4,128], index: 1, kind: input, shape index: {}]   ;;  %s1815_s2 = inlined_call_operand.vmem [shape: f32[32,128], index: 2, kind: input, shape index: {}]   ;;  %s1816_s3 = inlined_call_operand.vmem [shape: f32[32,8], index: 3, kind: input, shape index: {}]   ;;  %s1817_s4 = inlined_call_operand.vmem [shape: f32[32,8], index: 4, kind: input, shape index: {}]   ;;  %s1818_s5 = inlined_call_operand.vmem [shape: f32[1,8], index: 5, kind: input, shape index: {}]   ;;  %s1819_s6 = inlined_call_operand.hbm [shape: f32[4,8], index: 6, kind: output, shape index: {}]  }
   0x1   :  { %v33_v0 = vld [vmem:[%s1815_s2] sm:$0xff]  ;;  %v34_v1 = vld [vmem:[%s1815_s2 + $0x8] sm:$0xff]  ;;  %v35_v2 = vld [vmem:[%s1815_s2 + $0x10] sm:$0xff]  ;;  %1388 = vmatprep.subr.bf16.mxu0 %v1551_v3  ;;  %1286 = vmatprep.mubr.msk.f32.mxu0 %vm1552_vm0, %v1553_v6  ;;  %29 = vst.msk [vmem:[#allocation2] sm:$0xf] %vm28_vm1, %v1553_v6 }
   0x2   :  { %v1603_v4 = vpack.c.bf16 %v34_v1, %v33_v0  ;;  %v36_v5 = vld [vmem:[%s1815_s2 + $0x18] sm:$0xff]  ;;  %30 = vst.msk [vmem:[#allocation3] sm:$0xf] %vm28_vm1, %v1553_v6  ;;  %1394 = vmatprep.subr.bf16.mxu1 %v1551_v3  ;;  %1297 = vmatprep.mubr.msk.f32.mxu1 %vm1552_vm0, %v1553_v6 }
   0x3   :  { %11 = vsyncpa [#allocation5], 0  ;;  %v1618_v7 = vpack.c.bf16 %v36_v5, %v35_v2  ;;  %vm37_vm2 = vcmask 261120   ;;  %v31_v9 = vld [vmem:[%s1813_s0] sm:$0xf]  ;;  %s1554_s30 = smov 64  }
   0x4   :  { %1390 = vmatpush3.bf16.msra.mxu0 %v1603_v4  ;;  %1396 = vmatpush3.bf16.msra.mxu1 %v1603_v4  ;;  %s1555_s7 = smov 32   ;;  %s1556_s8 = smov 96   ;;  %v1203_v32 = vld [vmem:[%s1813_s0 + $0x4] sm:$0xf]  ;;  %v1206_v54 = vld [vmem:[%s1813_s0 + $0x8] sm:$0xf] }
   0x5   :  { %1391 = vmatprep.subr.bf16.mxu0 %v1551_v3  ;;  %1397 = vmatprep.subr.bf16.mxu1 %v1551_v3  ;;  %vm1185_vm3 = vcmask 60416  }
   0x8   :  { %1393 = vmatpush3.bf16.msra.mxu0 %v1618_v7  ;;  %1399 = vmatpush3.bf16.msra.mxu1 %v1618_v7  ;;  %v32_v8 = vld [vmem:[#allocation2] sm:$0xf] }
   0x9   :  { %1400 = vmatprep.subr.bf16.mxu0 %v1551_v3  ;;  %1406 = vmatprep.subr.bf16.mxu1 %v1551_v3  ;;  %v112_v14 = vld [vmem:[#allocation3] sm:$0xf] }
   0xb   :  { %1287 = vmatmul.mubr.msk.f32.vlgmr.msra.gmra.mrb[0].mxu0 %vm37_vm2, %v32_v8 }
   0xc   :  { %1402 = vmatpush3.bf16.msra.mxu0 %v1603_v4  ;;  %1308 = vmatprep.mubr.msk.f32.mxu0 %vm1552_vm0, %v1553_v6 }
   0xd   :  { %1403 = vmatprep.subr.bf16.mxu0 %v1551_v3 }
  0x10   :  { %1405 = vmatpush3.bf16.msra.mxu0 %v1618_v7 }
  0x11   :  { %1412 = vmatprep.subr.bf16.mxu0 %v1551_v3 }
  0xde   :  { %v107_v10 = vpop.f32.mrb[0].mxu0 }
  0xdf   :  { %v111_v11 = vadd.f32 %v107_v10, %v31_v9  ;;  %v1288_v12 = vpop.f32.mrb[1].mxu0 }
  0xe1   :  { %1455 = vtanh.f32 %v111_v11  ;;  %v1202_v15 = vmul.f32 -1.442695, %v111_v11 }
  0xe3   :  { %1457 = vpow2.f32 %v1202_v15 }
  0xeb   :  { %v1456_v13 = vpop.eup %1455 }
  0xec   :  { %126 = vrot.lane.b32.xlu0 %v1456_v13, %s1554_s30 }
  0xed   :  { %v1458_v16 = vpop.eup %1457 }
  0xee   :  { %v116_v17 = vadd.f32 1.0, %v1458_v16  ;;  %v1209_v16 = vld [vmem:[%s1813_s0 + $0xc] sm:$0xf] }
  0xf0   :  { %121 = vrot.lane.b32.xlu0 %v112_v14, %s1555_s7  ;;  %1459 = vrcp.f32 %v116_v17 }
  0xfa   :  { %v1460_v18 = vpop.eup %1459 }
 0x15e   :  { %v127_v19 = vpop.permute.xlu0 %126 }
 0x15f   :  { %v129_v20 = vmul.f32 %v1460_v18, %v127_v19 }
 0x161   :  { %131 = vrot.lane.b32.xlu1 %v129_v20, %s1555_s7 }
 0x162   :  { %v122_v21 = vpop.permute.xlu0 %121 }
 0x163   :  { %v124_v22 = vmul.f32 %v1460_v18, %v122_v21 }
 0x1d3   :  { %v132_v23 = vpop.permute.xlu1 %131 }
 0x1d4   :  { %v134_v24 = vadd.f32 %v132_v23, %v124_v22 }
 0x1d6   :  { %1461 = vtanh.f32 %v134_v24 }
 0x1e0   :  { %v1462_v25 = vpop.eup %1461 }
 0x1e1   :  { %137 = vrot.lane.b32.xlu1 %v1462_v25, %s1554_s30 }
 0x1e5   :  { %148 = vrot.lane.b32.xlu1 %v134_v24, %s1556_s8 }
 0x253   :  { %v138_v26 = vpop.permute.xlu1 %137 }
 0x254   :  { %v140_v27 = vmul.f32 %v1460_v18, %v138_v26 }
 0x256   :  { %142 = vrot.lane.b32.xlu0 %v140_v27, %s1555_s7 }
 0x257   :  { %v149_v28 = vpop.permute.xlu1 %148 }
 0x258   :  { %151 = vst.msk [vmem:[#allocation3] sm:$0xf] %vm28_vm1, %v149_v28 }
 0x25f   :  { %v233_v29 = vld [vmem:[#allocation3] sm:$0xf] }
 0x260   :  { %242 = vrot.lane.b32.xlu1 %v233_v29, %s1555_s7 }
 0x2c8   :  { %v143_v30 = vpop.permute.xlu0 %142 }
 0x2c9   :  { %146 = vst.msk [vmem:[#allocation2] sm:$0xf] %vm28_vm1, %v143_v30 }
 0x2d0   :  { %v154_v31 = vld [vmem:[#allocation2] sm:$0xf] }
 0x2d1   :  { %1298 = vmatmul.mubr.msk.f32.vlgmr.msra.gmra.mrb[0].mxu1 %vm37_vm2, %v154_v31 }
 0x2d2   :  { %1408 = vmatpush3.bf16.msra.mxu1 %v1603_v4  ;;  %1319 = vmatprep.mubr.msk.f32.mxu1 %vm1552_vm0, %v1553_v6  ;;  %v243_v43 = vpop.permute.xlu1 %242 }
 0x2d3   :  { %1409 = vmatprep.subr.bf16.mxu1 %v1551_v3 }
 0x2d6   :  { %1411 = vmatpush3.bf16.msra.mxu1 %v1618_v7 }
 0x2d7   :  { %1418 = vmatprep.subr.bf16.mxu1 %v1551_v3 }
 0x3a4   :  { %v228_v33 = vpop.f32.mrb[0].mxu1 }
 0x3a5   :  { %v232_v34 = vadd.f32 %v1203_v32, %v228_v33  ;;  %v1299_v35 = vpop.f32.mrb[1].mxu1 }
 0x3a7   :  { %1463 = vtanh.f32 %v232_v34  ;;  %v1205_v37 = vmul.f32 -1.442695, %v232_v34 }
 0x3a9   :  { %1465 = vpow2.f32 %v1205_v37 }
 0x3b1   :  { %v1464_v36 = vpop.eup %1463 }
 0x3b2   :  { %247 = vrot.lane.b32.xlu0 %v1464_v36, %s1554_s30 }
 0x3b3   :  { %v1466_v38 = vpop.eup %1465 }
 0x3b4   :  { %v237_v39 = vadd.f32 1.0, %v1466_v38  ;;  %v1212_v38 = vld [vmem:[%s1813_s0 + $0x10] sm:$0xf] }
 0x3b6   :  { %1467 = vrcp.f32 %v237_v39 }
 0x3c0   :  { %v1468_v40 = vpop.eup %1467 }
 0x3c1   :  { %v245_v44 = vmul.f32 %v1468_v40, %v243_v43 }
 0x424   :  { %v248_v41 = vpop.permute.xlu0 %247 }
 0x425   :  { %v250_v42 = vmul.f32 %v1468_v40, %v248_v41 }
 0x427   :  { %252 = vrot.lane.b32.xlu0 %v250_v42, %s1555_s7 }
 0x499   :  { %v253_v45 = vpop.permute.xlu0 %252 }
 0x49a   :  { %v255_v46 = vadd.f32 %v253_v45, %v245_v44 }
 0x49c   :  { %1469 = vtanh.f32 %v255_v46 }
 0x4a6   :  { %v1470_v47 = vpop.eup %1469 }
 0x4a7   :  { %258 = vrot.lane.b32.xlu1 %v1470_v47, %s1554_s30 }
 0x4ab   :  { %268 = vrot.lane.b32.xlu1 %v255_v46, %s1556_s8 }
 0x519   :  { %v259_v48 = vpop.permute.xlu1 %258 }
 0x51a   :  { %v261_v49 = vmul.f32 %v1468_v40, %v259_v48 }
 0x51c   :  { %263 = vrot.lane.b32.xlu0 %v261_v49, %s1555_s7 }
 0x51d   :  { %v269_v50 = vpop.permute.xlu1 %268 }
 0x51e   :  { %271 = vst.msk [vmem:[#allocation3] sm:$0xf] %vm28_vm1, %v269_v50 }
 0x525   :  { %v353_v51 = vld [vmem:[#allocation3] sm:$0xf] }
 0x526   :  { %362 = vrot.lane.b32.xlu1 %v353_v51, %s1555_s7 }
 0x58e   :  { %v264_v52 = vpop.permute.xlu0 %263 }
 0x58f   :  { %266 = vst.msk [vmem:[#allocation2] sm:$0xf] %vm28_vm1, %v264_v52 }
 0x596   :  { %v274_v53 = vld [vmem:[#allocation2] sm:$0xf] }
 0x597   :  { %1309 = vmatmul.mubr.msk.f32.vlgmr.msra.gmra.mrb[2].mxu0 %vm37_vm2, %v274_v53 }
 0x598   :  { %1414 = vmatpush3.bf16.msra.mxu0 %v1603_v4  ;;  %1330 = vmatprep.mubr.msk.f32.mxu0 %vm1552_vm0, %v1553_v6  ;;  %v363_v1 = vpop.permute.xlu1 %362 }
 0x599   :  { %1415 = vmatprep.subr.bf16.mxu0 %v1551_v3 }
 0x59c   :  { %1417 = vmatpush3.bf16.msra.mxu0 %v1618_v7 }
 0x59d   :  { %1424 = vmatprep.subr.bf16.mxu0 %v1551_v3 }
 0x66a   :  { %v348_v55 = vpop.f32.mrb[2].mxu0 }
 0x66b   :  { %v352_v56 = vadd.f32 %v1206_v54, %v348_v55  ;;  %v1310_v57 = vpop.f32.mrb[3].mxu0 }
 0x66d   :  { %1471 = vtanh.f32 %v352_v56  ;;  %v1208_v59 = vmul.f32 -1.442695, %v352_v56 }
 0x66f   :  { %1473 = vpow2.f32 %v1208_v59 }
 0x677   :  { %v1472_v58 = vpop.eup %1471 }
 0x678   :  { %367 = vrot.lane.b32.xlu0 %v1472_v58, %s1554_s30 }
 0x679   :  { %v1474_v60 = vpop.eup %1473 }
 0x67a   :  { %v357_v61 = vadd.f32 1.0, %v1474_v60  ;;  %v1215_v60 = vld [vmem:[%s1813_s0 + $0x14] sm:$0xf] }
 0x67c   :  { %1475 = vrcp.f32 %v357_v61 }
 0x686   :  { %v1476_v62 = vpop.eup %1475 }
 0x687   :  { %v365_v2 = vmul.f32 %v1476_v62, %v363_v1 }
 0x6ea   :  { %v368_v63 = vpop.permute.xlu0 %367 }
 0x6eb   :  { %v370_v0 = vmul.f32 %v1476_v62, %v368_v63 }
 0x6ed   :  { %372 = vrot.lane.b32.xlu0 %v370_v0, %s1555_s7 }
 0x75f   :  { %v373_v5 = vpop.permute.xlu0 %372 }
 0x760   :  { %v375_v8 = vadd.f32 %v373_v5, %v365_v2 }
 0x762   :  { %1477 = vtanh.f32 %v375_v8 }
 0x76c   :  { %v1478_v9 = vpop.eup %1477 }
 0x76d   :  { %378 = vrot.lane.b32.xlu1 %v1478_v9, %s1554_s30 }
 0x771   :  { %388 = vrot.lane.b32.xlu1 %v375_v8, %s1556_s8 }
 0x7df   :  { %v379_v10 = vpop.permute.xlu1 %378 }
 0x7e0   :  { %v381_v11 = vmul.f32 %v1476_v62, %v379_v10 }
 0x7e2   :  { %383 = vrot.lane.b32.xlu0 %v381_v11, %s1555_s7 }
 0x7e3   :  { %v389_v12 = vpop.permute.xlu1 %388 }
 0x7e4   :  { %391 = vst.msk [vmem:[#allocation3] sm:$0xf] %vm28_vm1, %v389_v12 }
 0x7eb   :  { %v473_v13 = vld [vmem:[#allocation3] sm:$0xf] }
 0x7ec   :  { %482 = vrot.lane.b32.xlu1 %v473_v13, %s1555_s7 }
 0x854   :  { %v384_v14 = vpop.permute.xlu0 %383 }
 0x855   :  { %386 = vst.msk [vmem:[#allocation2] sm:$0xf] %vm28_vm1, %v384_v14 }
 0x85c   :  { %v394_v15 = vld [vmem:[#allocation2] sm:$0xf] }
 0x85d   :  { %1320 = vmatmul.mubr.msk.f32.vlgmr.msra.gmra.mrb[2].mxu1 %vm37_vm2, %v394_v15 }
 0x85e   :  { %1420 = vmatpush3.bf16.msra.mxu1 %v1603_v4  ;;  %1341 = vmatprep.mubr.msk.f32.mxu1 %vm1552_vm0, %v1553_v6  ;;  %v483_v27 = vpop.permute.xlu1 %482 }
 0x85f   :  { %1421 = vmatprep.subr.bf16.mxu1 %v1551_v3 }
 0x862   :  { %1423 = vmatpush3.bf16.msra.mxu1 %v1618_v7 }
 0x863   :  { %1430 = vmatprep.subr.bf16.mxu1 %v1551_v3 }
 0x930   :  { %v468_v17 = vpop.f32.mrb[2].mxu1 }
 0x931   :  { %v472_v18 = vadd.f32 %v1209_v16, %v468_v17  ;;  %v1321_v19 = vpop.f32.mrb[3].mxu1 }
 0x933   :  { %1479 = vtanh.f32 %v472_v18  ;;  %v1211_v21 = vmul.f32 -1.442695, %v472_v18 }
 0x935   :  { %1481 = vpow2.f32 %v1211_v21 }
 0x93d   :  { %v1480_v20 = vpop.eup %1479 }
 0x93e   :  { %487 = vrot.lane.b32.xlu0 %v1480_v20, %s1554_s30  ;;  %v1218_v20 = vld [vmem:[%s1813_s0 + $0x18] sm:$0xf] }
 0x93f   :  { %v1482_v22 = vpop.eup %1481 }
 0x940   :  { %v477_v23 = vadd.f32 1.0, %v1482_v22 }
 0x942   :  { %1483 = vrcp.f32 %v477_v23 }
 0x94c   :  { %v1484_v24 = vpop.eup %1483 }
 0x94d   :  { %v485_v28 = vmul.f32 %v1484_v24, %v483_v27 }
 0x9b0   :  { %v488_v25 = vpop.permute.xlu0 %487 }
 0x9b1   :  { %v490_v26 = vmul.f32 %v1484_v24, %v488_v25 }
 0x9b3   :  { %492 = vrot.lane.b32.xlu0 %v490_v26, %s1555_s7 }
 0xa25   :  { %v493_v29 = vpop.permute.xlu0 %492 }
 0xa26   :  { %v495_v30 = vadd.f32 %v493_v29, %v485_v28 }
 0xa28   :  { %1485 = vtanh.f32 %v495_v30 }
 0xa32   :  { %v1486_v31 = vpop.eup %1485 }
 0xa33   :  { %498 = vrot.lane.b32.xlu1 %v1486_v31, %s1554_s30 }
 0xa37   :  { %508 = vrot.lane.b32.xlu1 %v495_v30, %s1556_s8 }
 0xaa5   :  { %v499_v32 = vpop.permute.xlu1 %498 }
 0xaa6   :  { %v501_v33 = vmul.f32 %v1484_v24, %v499_v32 }
 0xaa8   :  { %503 = vrot.lane.b32.xlu0 %v501_v33, %s1555_s7 }
 0xaa9   :  { %v509_v34 = vpop.permute.xlu1 %508 }
 0xaaa   :  { %511 = vst.msk [vmem:[#allocation3] sm:$0xf] %vm28_vm1, %v509_v34 }
 0xab1   :  { %v593_v35 = vld [vmem:[#allocation3] sm:$0xf] }
 0xab2   :  { %602 = vrot.lane.b32.xlu1 %v593_v35, %s1555_s7 }
 0xb1a   :  { %v504_v36 = vpop.permute.xlu0 %503 }
 0xb1b   :  { %506 = vst.msk [vmem:[#allocation2] sm:$0xf] %vm28_vm1, %v504_v36 }
 0xb22   :  { %v514_v37 = vld [vmem:[#allocation2] sm:$0xf] }
 0xb23   :  { %1331 = vmatmul.mubr.msk.f32.vlgmr.msra.gmra.mrb[4].mxu0 %vm37_vm2, %v514_v37 }
 0xb24   :  { %1426 = vmatpush3.bf16.msra.mxu0 %v1603_v4  ;;  %1352 = vmatprep.mubr.msk.f32.mxu0 %vm1552_vm0, %v1553_v6  ;;  %v603_v49 = vpop.permute.xlu1 %602 }
 0xb25   :  { %1427 = vmatprep.subr.bf16.mxu0 %v1551_v3 }
 0xb28   :  { %1429 = vmatpush3.bf16.msra.mxu0 %v1618_v7 }
 0xb29   :  { %1436 = vmatprep.subr.bf16.mxu0 %v1551_v3 }
 0xbf6   :  { %v588_v39 = vpop.f32.mrb[4].mxu0 }
 0xbf7   :  { %v592_v40 = vadd.f32 %v1212_v38, %v588_v39  ;;  %v1332_v41 = vpop.f32.mrb[5].mxu0 }
 0xbf8   :  { %v995_v41 = vld [vmem:[%s1814_s1] sm:$0xf] }
 0xbf9   :  { %1487 = vtanh.f32 %v592_v40  ;;  %v1214_v43 = vmul.f32 -1.442695, %v592_v40 }
 0xbfb   :  { %1489 = vpow2.f32 %v1214_v43  ;;  %v1224_v43 = vmul.f32 -1.442695, %v995_v41 }
 0xc03   :  { %v1488_v42 = vpop.eup %1487 }
 0xc04   :  { %607 = vrot.lane.b32.xlu0 %v1488_v42, %s1554_s30 }
 0xc05   :  { %v1490_v44 = vpop.eup %1489 }
 0xc06   :  { %v597_v45 = vadd.f32 1.0, %v1490_v44 }
 0xc08   :  { %1491 = vrcp.f32 %v597_v45  ;;  %v1221_v45 = vld [vmem:[%s1813_s0 + $0x1c] sm:$0xf] }
 0xc12   :  { %v1492_v46 = vpop.eup %1491 }
 0xc13   :  { %v605_v50 = vmul.f32 %v1492_v46, %v603_v49 }
 0xc76   :  { %v608_v47 = vpop.permute.xlu0 %607 }
 0xc77   :  { %v610_v48 = vmul.f32 %v1492_v46, %v608_v47 }
 0xc79   :  { %612 = vrot.lane.b32.xlu0 %v610_v48, %s1555_s7 }
 0xceb   :  { %v613_v51 = vpop.permute.xlu0 %612 }
 0xcec   :  { %v615_v52 = vadd.f32 %v613_v51, %v605_v50 }
 0xcee   :  { %1493 = vtanh.f32 %v615_v52 }
 0xcf8   :  { %v1494_v53 = vpop.eup %1493 }
 0xcf9   :  { %618 = vrot.lane.b32.xlu1 %v1494_v53, %s1554_s30 }
 0xcfd   :  { %628 = vrot.lane.b32.xlu1 %v615_v52, %s1556_s8 }
 0xd6b   :  { %v619_v54 = vpop.permute.xlu1 %618 }
 0xd6c   :  { %v621_v55 = vmul.f32 %v1492_v46, %v619_v54 }
 0xd6e   :  { %623 = vrot.lane.b32.xlu0 %v621_v55, %s1555_s7 }
 0xd6f   :  { %v629_v56 = vpop.permute.xlu1 %628 }
 0xd70   :  { %631 = vst.msk [vmem:[#allocation3] sm:$0xf] %vm28_vm1, %v629_v56 }
 0xd77   :  { %v713_v57 = vld [vmem:[#allocation3] sm:$0xf] }
 0xd78   :  { %722 = vrot.lane.b32.xlu1 %v713_v57, %s1555_s7 }
 0xde0   :  { %v624_v58 = vpop.permute.xlu0 %623 }
 0xde1   :  { %626 = vst.msk [vmem:[#allocation2] sm:$0xf] %vm28_vm1, %v624_v58 }
 0xde8   :  { %v634_v59 = vld [vmem:[#allocation2] sm:$0xf] }
 0xde9   :  { %1342 = vmatmul.mubr.msk.f32.vlgmr.msra.gmra.mrb[4].mxu1 %vm37_vm2, %v634_v59 }
 0xdea   :  { %1432 = vmatpush3.bf16.msra.mxu1 %v1603_v4  ;;  %1363 = vmatprep.mubr.msk.f32.mxu1 %vm1552_vm0, %v1553_v6  ;;  %v723_v9 = vpop.permute.xlu1 %722 }
 0xdeb   :  { %1433 = vmatprep.subr.bf16.mxu1 %v1551_v3 }
 0xdee   :  { %1435 = vmatpush3.bf16.msra.mxu1 %v1618_v7 }
 0xdef   :  { %1442 = vmatprep.subr.bf16.mxu1 %v1551_v3 }
 0xebc   :  { %v708_v61 = vpop.f32.mrb[4].mxu1 }
 0xebd   :  { %v712_v62 = vadd.f32 %v1215_v60, %v708_v61  ;;  %v1343_v63 = vpop.f32.mrb[5].mxu1 }
 0xebf   :  { %1495 = vtanh.f32 %v712_v62  ;;  %v1217_v4 = vmul.f32 -1.442695, %v712_v62 }
 0xec1   :  { %1497 = vpow2.f32 %v1217_v4 }
 0xec9   :  { %v1496_v0 = vpop.eup %1495 }
 0xeca   :  { %727 = vrot.lane.b32.xlu0 %v1496_v0, %s1554_s30 }
 0xecb   :  { %v1498_v1 = vpop.eup %1497 }
 0xecc   :  { %v717_v2 = vadd.f32 1.0, %v1498_v1 }
 0xece   :  { %1499 = vrcp.f32 %v717_v2 }
 0xed8   :  { %v1500_v5 = vpop.eup %1499 }
 0xed9   :  { %v725_v10 = vmul.f32 %v1500_v5, %v723_v9  ;;  %v1025_v9 = vld [vmem:[%s1817_s4] sm:$0xff] }
 0xf3c   :  { %v728_v7 = vpop.permute.xlu0 %727 }
 0xf3d   :  { %v730_v8 = vmul.f32 %v1500_v5, %v728_v7 }
 0xf3f   :  { %732 = vrot.lane.b32.xlu0 %v730_v8, %s1555_s7 }
 0xfb1   :  { %v733_v11 = vpop.permute.xlu0 %732 }
 0xfb2   :  { %v735_v12 = vadd.f32 %v733_v11, %v725_v10  ;;  %v1026_v10 = vld [vmem:[%s1817_s4 + $0x8] sm:$0xff] }
 0xfb3   :  { %v1437_v11 = vpack.c.bf16 %v1026_v10, %v1025_v9 }
 0xfb4   :  { %1501 = vtanh.f32 %v735_v12 }
 0xfbe   :  { %v1502_v13 = vpop.eup %1501 }
 0xfbf   :  { %738 = vrot.lane.b32.xlu1 %v1502_v13, %s1554_s30  ;;  %v1022_v13 = vld [vmem:[%s1816_s3 + $0x8] sm:$0xff] }
 0xfc3   :  { %748 = vrot.lane.b32.xlu1 %v735_v12, %s1556_s8  ;;  %v1021_v12 = vld [vmem:[%s1816_s3] sm:$0xff] }
0x1031   :  { %v739_v14 = vpop.permute.xlu1 %738 }
0x1032   :  { %v741_v15 = vmul.f32 %v1500_v5, %v739_v14  ;;  %v1443_v14 = vpack.c.bf16 %v1022_v13, %v1021_v12 }
0x1034   :  { %743 = vrot.lane.b32.xlu0 %v741_v15, %s1555_s7  ;;  %v1027_v15 = vld [vmem:[%s1817_s4 + $0x10] sm:$0xff] }
0x1035   :  { %v749_v16 = vpop.permute.xlu1 %748 }
0x1036   :  { %751 = vst.msk [vmem:[#allocation3] sm:$0xf] %vm28_vm1, %v749_v16  ;;  %v1028_v16 = vld [vmem:[%s1817_s4 + $0x18] sm:$0xff] }
0x103d   :  { %v833_v17 = vld [vmem:[#allocation3] sm:$0xf] }
0x103e   :  { %842 = vrot.lane.b32.xlu1 %v833_v17, %s1555_s7  ;;  %v1440_v17 = vpack.c.bf16 %v1028_v16, %v1027_v15 }
0x10a6   :  { %v744_v18 = vpop.permute.xlu0 %743 }
0x10a7   :  { %746 = vst.msk [vmem:[#allocation2] sm:$0xf] %vm28_vm1, %v744_v18  ;;  %v1023_v18 = vld [vmem:[%s1816_s3 + $0x10] sm:$0xff] }
0x10ae   :  { %v754_v19 = vld [vmem:[#allocation2] sm:$0xf] }
0x10af   :  { %1353 = vmatmul.mubr.msk.f32.vlgmr.msra.gmra.mrb[6].mxu0 %vm37_vm2, %v754_v19  ;;  %v1024_v19 = vld [vmem:[%s1816_s3 + $0x18] sm:$0xff] }
0x10b0   :  { %1374 = vmatprep.mubr.msk.f32.mxu0 %vm1552_vm0, %v1553_v6  ;;  %v843_v31 = vpop.permute.xlu1 %842  ;;  %1438 = vmatpush3.bf16.msra.mxu0 %v1437_v11 }
0x10b1   :  { %1439 = vmatprep.subr.bf16.mxu0 %v1551_v3 }
0x10b4   :  { %1441 = vmatpush3.bf16.msra.mxu0 %v1440_v17 }
0x1182   :  { %v828_v21 = vpop.f32.mrb[6].mxu0 }
0x1183   :  { %v832_v22 = vadd.f32 %v1218_v20, %v828_v21  ;;  %v1354_v23 = vpop.f32.mrb[7].mxu0  ;;  %v1446_v20 = vpack.c.bf16 %v1024_v19, %v1023_v18 }
0x1185   :  { %1503 = vtanh.f32 %v832_v22  ;;  %v1220_v25 = vmul.f32 -1.442695, %v832_v22 }
0x1187   :  { %1505 = vpow2.f32 %v1220_v25 }
0x118f   :  { %v1504_v24 = vpop.eup %1503 }
0x1190   :  { %847 = vrot.lane.b32.xlu0 %v1504_v24, %s1554_s30 }
0x1191   :  { %v1506_v26 = vpop.eup %1505 }
0x1192   :  { %v837_v27 = vadd.f32 1.0, %v1506_v26 }
0x1194   :  { %1507 = vrcp.f32 %v837_v27 }
0x119e   :  { %v1508_v28 = vpop.eup %1507 }
0x119f   :  { %v845_v32 = vmul.f32 %v1508_v28, %v843_v31 }
0x1202   :  { %v848_v29 = vpop.permute.xlu0 %847 }
0x1203   :  { %v850_v30 = vmul.f32 %v1508_v28, %v848_v29  ;;  %v1227_v29 = vld [vmem:[%s1818_s5] ss:$0 sm:$0xff] }
0x1205   :  { %852 = vrot.lane.b32.xlu0 %v850_v30, %s1555_s7 }
0x1277   :  { %v853_v33 = vpop.permute.xlu0 %852 }
0x1278   :  { %v855_v34 = vadd.f32 %v853_v33, %v845_v32 }
0x127a   :  { %1509 = vtanh.f32 %v855_v34 }
0x127b   :  { %1511 = vtanh.f32 %v995_v41 }
0x127c   :  { %1513 = vpow2.f32 %v1224_v43 }
0x1284   :  { %v1510_v35 = vpop.eup %1509 }
0x1285   :  { %858 = vrot.lane.b32.xlu1 %v1510_v35, %s1554_s30  ;;  %v1512_v42 = vpop.eup %1511 }
0x1286   :  { %v1514_v44 = vpop.eup %1513 }
0x1287   :  { %v999_v49 = vadd.f32 1.0, %v1514_v44 }
0x1289   :  { %868 = vrot.lane.b32.xlu1 %v855_v34, %s1556_s8 }
0x128d   :  { %1005 = vrot.lane.b32.xlu1 %v1512_v42, %s1554_s30 }
0x12f7   :  { %v859_v36 = vpop.permute.xlu1 %858 }
0x12f8   :  { %v861_v37 = vmul.f32 %v1508_v28, %v859_v36 }
0x12fa   :  { %863 = vrot.lane.b32.xlu0 %v861_v37, %s1555_s7 }
0x12fb   :  { %v869_v38 = vpop.permute.xlu1 %868 }
0x12fc   :  { %871 = vst.msk [vmem:[#allocation3] sm:$0xf] %vm28_vm1, %v869_v38 }
0x12ff   :  { %v1006_v51 = vpop.permute.xlu1 %1005 }
0x1303   :  { %v953_v52 = vld [vmem:[#allocation3] sm:$0xf] }
0x136c   :  { %v864_v39 = vpop.permute.xlu0 %863 }
0x136d   :  { %866 = vst.msk [vmem:[#allocation2] sm:$0xf] %vm28_vm1, %v864_v39 }
0x1374   :  { %v874_v40 = vld [vmem:[#allocation2] sm:$0xf] }
0x1375   :  { %1364 = vmatmul.mubr.msk.f32.vlgmr.msra.gmra.mrb[6].mxu1 %vm37_vm2, %v874_v40 }
0x1376   :  { %1385 = vmatprep.mubr.msk.f32.mxu1 %vm1552_vm0, %v1553_v6  ;;  %1444 = vmatpush3.bf16.msra.mxu1 %v1443_v14 }
0x1377   :  { %1445 = vmatprep.subr.bf16.mxu1 %v1551_v3 }
0x137a   :  { %1447 = vmatpush3.bf16.msra.mxu1 %v1446_v20 }
0x1448   :  { %v948_v46 = vpop.f32.mrb[6].mxu1 }
0x1449   :  { %v952_v47 = vadd.f32 %v1221_v45, %v948_v46  ;;  %v1365_v48 = vpop.f32.mrb[7].mxu1 }
0x144b   :  { %1515 = vtanh.f32 %v952_v47  ;;  %v1223_v54 = vmul.f32 -1.442695, %v952_v47 }
0x144c   :  { %1517 = vrcp.f32 %v999_v49 }
0x144d   :  { %1519 = vpow2.f32 %v1223_v54 }
0x1455   :  { %v1516_v6 = vpop.eup %1515 }
0x1456   :  { %967 = vrot.lane.b32.xlu0 %v1516_v6, %s1554_s30  ;;  %v1518_v50 = vpop.eup %1517 }
0x1457   :  { %v1008_v53 = vmul.f32 %v1518_v50, %v1006_v51  ;;  %v1520_v55 = vpop.eup %1519  ;;  %v1003_v61 = vmul.f32 0.0, %v1518_v50 }
0x1458   :  { %v957_v56 = vadd.f32 1.0, %v1520_v55 }
0x145a   :  { %962 = vrot.lane.b32.xlu0 %v953_v52, %s1555_s7  ;;  %1521 = vrcp.f32 %v957_v56 }
0x145e   :  { %1010 = vrot.lane.b32.xlu0 %v1008_v53, %s1555_s7 }
0x1464   :  { %v1522_v57 = vpop.eup %1521 }
0x14c8   :  { %v968_v58 = vpop.permute.xlu0 %967 }
0x14c9   :  { %v970_v59 = vmul.f32 %v1522_v57, %v968_v58 }
0x14cb   :  { %972 = vrot.lane.b32.xlu1 %v970_v59, %s1555_s7 }
0x14cc   :  { %v963_v60 = vpop.permute.xlu0 %962 }
0x14cd   :  { %v965_v4 = vmul.f32 %v1522_v57, %v963_v60 }
0x14d0   :  { %v1011_v62 = vpop.permute.xlu0 %1010 }
0x14d1   :  { %v1013_v63 = vadd.f32 %v1011_v62, %v1003_v61 }
0x14d3   :  { %1523 = vtanh.f32 %v1013_v63 }
0x14dd   :  { %v1524_v0 = vpop.eup %1523 }
0x14de   :  { %1016 = vrot.lane.b32.xlu0 %v1524_v0, %s1554_s30 }
0x153d   :  { %v973_v1 = vpop.permute.xlu1 %972 }
0x153e   :  { %v975_v2 = vadd.f32 %v973_v1, %v965_v4 }
0x1540   :  { %1525 = vtanh.f32 %v975_v2 }
0x154a   :  { %v1526_v5 = vpop.eup %1525 }
0x154b   :  { %978 = vrot.lane.b32.xlu1 %v1526_v5, %s1554_s30 }
0x1550   :  { %v1017_v7 = vpop.permute.xlu0 %1016 }
0x1551   :  { %v1019_v8 = vmul.f32 %v1518_v50, %v1017_v7 }
0x1553   :  { %1030 = vrot.lane.b32.xlu0 %v1019_v8, %s1555_s7 }
0x15bd   :  { %v979_v21 = vpop.permute.xlu1 %978 }
0x15be   :  { %v981_v22 = vmul.f32 %v1522_v57, %v979_v21 }
0x15c0   :  { %983 = vrot.lane.b32.xlu1 %v981_v22, %s1555_s7  ;;  %s1557_s7 = smov [#allocation4]  }
0x15c4   :  { %988 = vrot.lane.b32.xlu1 %v975_v2, %s1556_s8  ;;  %s1193_s8 = sshll.u32 %s1557_s7, 4  ;;  %s1194_s8 = int_to_ptr.vmem [resolvable:$true] %s1193_s8 }
0x15c5   :  { %v1031_v23 = vpop.permute.xlu0 %1030  ;;  %s1527_s16 = scalar_lea.vmem %s1194_s8, 64  ;;  %p1532_p1 = scmp.lt.s32.totalorder %s1194_s8, %s1194_s8 }
0x15c6   :  { %1375 = vmatmul.mubr.msk.f32.vlgmr.msra.gmra.mrb[8].mxu0 %vm37_vm2, %v1031_v23  ;;  %p1528_p0 = scmp.ne.s32.totalorder %s1194_s8, %s1527_s16  ;;  %p1533_p2 = scmp.lt.s32.totalorder %s1527_s16, %s1527_s16 }
0x15c8   :  { %p1534_p3 = por %p1533_p2, %p1532_p1 }
0x15ca   :  { %p1535_p4 = pnand %p1534_p3, %p1528_p0 }
0x1632   :  { %v984_v3 = vpop.permute.xlu1 %983 }
0x1633   :  { %986 = vst.msk [vmem:[#allocation2] sm:$0xf] %vm28_vm1, %v984_v3 }
0x1636   :  { %v989_v24 = vpop.permute.xlu1 %988 }
0x1637   :  { %991 = vst.msk [vmem:[#allocation3] sm:$0xf] %vm28_vm1, %v989_v24 }
0x163a   :  { %v1020_v25 = vld [vmem:[#allocation2] sm:$0xf] }
0x163b   :  { %1386 = vmatmul.mubr.msk.f32.vlgmr.msra.gmra.mrb[8].mxu1 %vm37_vm2, %v1020_v25 }
0x1699   :  { %v1100_v26 = vpop.f32.mrb[8].mxu0 }
0x169a   :  { %v1376_v27 = vpop.f32.mrb[9].mxu0 }
0x170e   :  { %v1173_v28 = vpop.f32.mrb[8].mxu1 }
0x170f   :  { %v1174_v30 = vadd.f32 %v1173_v28, %v1100_v26  ;;  %v1387_v31 = vpop.f32.mrb[9].mxu1 }
0x1711   :  { %v1184_v32 = vadd.f32 %v1227_v29, %v1174_v30 }
0x1713   :  { %1186 = vst.msk [vmem:[#allocation4] sm:$0xf] %vm1185_vm3, %v1184_v32 }
0x1714   :  { %1538 = shalt.err (!%p1535_p4)
}
0x1715   :  { %s1539_s19 = scalar_lea.hbm %s1819_s6, 64 }
0x1716   :  { %p1540_p5 = scmp.ne.s32.totalorder %s1819_s6, %s1539_s19  ;;  %p1543_p6 = scmp.lt.u32.totalorder %s1539_s19, %s1819_s6 }
0x1718   :  { %p1545_p7 = pnand %p1543_p6, %p1540_p5 }
0x171a   :  { %1548 = shalt.err (!%p1545_p7)
}
0x171b   :  { %1196 = dma.vmem_to_hbm [thread:$0]  %s1194_s8, 64, %s1819_s6, [#allocation5]  }
0x171c   :  { %1549 = dma.done.wait [#allocation5], 64  }
0x171d   :  { %1550 = vsyncadd [#allocation5], 4294967232 }
0x171e   :  { %1200 = vsyncpa [#allocation5], 1 }

// kernel: lstm_forward.6
= control target key start
LH: loop header
LB: loop body
LE: loop exit
PB: predicated region body
PF: predicated region fallthrough
CT: control target
= control target key end

     0   :  { %vm59_vm0 = vcmask 257024   ;;  %v2790_v0 = vmov 0.0|0.0   ;;  %v2791_v4 = vmov 0.0   ;;  %vm2792_vm1 = vmmov 0   ;;  %s2793_s9 = smov 32   ;;  %s2794_s14 = smov 64   ;;  %s3353_s2 = inlined_call_operand.vmem [shape: f32[32,128], index: 2, kind: input, shape index: {}]   ;;  %s3354_s3 = inlined_call_operand.vmem [shape: f32[32,128], index: 3, kind: input, shape index: {}]   ;;  %s3355_s0 = inlined_call_operand.vmem [shape: f32[8,4,128], index: 0, kind: input, shape index: {}]   ;;  %s3356_s1 = inlined_call_operand.vmem [shape: f32[8,4,128], index: 1, kind: input, shape index: {}]   ;;  %s3357_s4 = inlined_call_operand.vmem [shape: bf16[8,4,32], index: 4, kind: output, shape index: {0}]   ;;  %s3358_s5 = inlined_call_operand.vmem [shape: bf16[8,4,32], index: 5, kind: output, shape index: {1}]  }
   0x1   :  { %2559 = vmatprep.subr.bf16.mxu0 %v2790_v0  ;;  %v66_v1 = vld [vmem:[%s3353_s2] sm:$0xff]  ;;  %v67_v2 = vld [vmem:[%s3353_s2 + $0x8] sm:$0xff]  ;;  %2565 = vmatprep.subr.bf16.mxu1 %v2790_v0  ;;  %60 = vst.msk [vmem:[#allocation2] sm:$0xf] %vm59_vm0, %v2791_v4  ;;  %61 = vst.msk [vmem:[#allocation3] sm:$0xf] %vm59_vm0, %v2791_v4 }
   0x2   :  { %v202_v3 = vld [vmem:[%s3354_s3] sm:$0xff]  ;;  %62 = vst.msk [vmem:[#allocation4] sm:$0xf] %vm59_vm0, %v2791_v4  ;;  %63 = vst.msk [vmem:[#allocation5] sm:$0xf] %vm59_vm0, %v2791_v4  ;;  %v2846_v5 = vpack.c.bf16 %v67_v2, %v66_v1  ;;  %v203_v6 = vld [vmem:[%s3354_s3 + $0x8] sm:$0xff]  ;;  %2391 = vmatprep.mubr.msk.f32.mxu0 %vm2792_vm1, %v2791_v4  ;;  %2402 = vmatprep.mubr.msk.f32.mxu1 %vm2792_vm1, %v2791_v4 }
   0x3   :  { %v68_v7 = vld [vmem:[%s3353_s2 + $0x10] sm:$0xff]  ;;  %v69_v8 = vld [vmem:[%s3353_s2 + $0x18] sm:$0xff]  ;;  %v2861_v9 = vpack.c.bf16 %v203_v6, %v202_v3  ;;  %vm70_vm2 = vcmask 261120   ;;  %v64_v18 = vld [vmem:[%s3355_s0] sm:$0xf]  ;;  %s2795_s15 = smov 96  }
   0x4   :  { %v204_v10 = vld [vmem:[%s3354_s3 + $0x10] sm:$0xff]  ;;  %v205_v11 = vld [vmem:[%s3354_s3 + $0x18] sm:$0xff]  ;;  %2561 = vmatpush3.bf16.msra.mxu0 %v2846_v5  ;;  %v2870_v12 = vpack.c.bf16 %v69_v8, %v68_v7  ;;  %v2249_v60 = vld [vmem:[%s3355_s0 + $0x4] sm:$0xf]  ;;  %vm197_vm3 = vcmask 254976  }
   0x5   :  { %2562 = vmatprep.subr.bf16.mxu0 %v2790_v0  ;;  %2567 = vmatpush3.bf16.msra.mxu1 %v2861_v9  ;;  %v2874_v13 = vpack.c.bf16 %v205_v11, %v204_v10  ;;  %v2245_v19 = vld [vmem:[%s3356_s1 + $0x1c] sm:$0xf]  ;;  %v2253_v1 = vld [vmem:[%s3356_s1 + $0x18] sm:$0xf] }
   0x6   :  { %2568 = vmatprep.subr.bf16.mxu1 %v2790_v0 }
   0x8   :  { %2564 = vmatpush3.bf16.msra.mxu0 %v2870_v12  ;;  %v65_v14 = vld [vmem:[#allocation2] sm:$0xf]  ;;  %v145_v15 = vld [vmem:[#allocation3] sm:$0xf] }
   0x9   :  { %2570 = vmatpush3.bf16.msra.mxu1 %v2874_v13  ;;  %v201_v16 = vld [vmem:[#allocation4] sm:$0xf]  ;;  %154 = vrot.lane.b32.xlu1 %v145_v15, %s2793_s9  ;;  %v280_v17 = vld [vmem:[#allocation5] sm:$0xf] }
   0xa   :  { %2571 = vmatprep.subr.bf16.mxu0 %v2790_v0  ;;  %2577 = vmatprep.subr.bf16.mxu1 %v2790_v0 }
   0xb   :  { %2392 = vmatmul.mubr.msk.f32.vlgmr.msra.gmra.mrb[0].mxu0 %vm70_vm2, %v65_v14 }
   0xc   :  { %2403 = vmatmul.mubr.msk.f32.vlgmr.msra.gmra.mrb[0].mxu1 %vm70_vm2, %v201_v16  ;;  %2573 = vmatpush3.bf16.msra.mxu0 %v2846_v5 }
   0xd   :  { %289 = vrot.lane.b32.xlu1 %v280_v17, %s2793_s9  ;;  %2574 = vmatprep.subr.bf16.mxu0 %v2790_v0 }
   0xe   :  { %2579 = vmatpush3.bf16.msra.mxu1 %v2861_v9  ;;  %2413 = vmatprep.mubr.msk.f32.mxu0 %vm2792_vm1, %v2791_v4 }
   0xf   :  { %2580 = vmatprep.subr.bf16.mxu1 %v2790_v0  ;;  %2424 = vmatprep.mubr.msk.f32.mxu1 %vm2792_vm1, %v2791_v4 }
  0x10   :  { %2576 = vmatpush3.bf16.msra.mxu0 %v2870_v12 }
  0x11   :  { %2583 = vmatprep.subr.bf16.mxu0 %v2790_v0 }
  0x12   :  { %2582 = vmatpush3.bf16.msra.mxu1 %v2874_v13 }
  0x13   :  { %2589 = vmatprep.subr.bf16.mxu1 %v2790_v0 }
  0x7b   :  { %v155_v40 = vpop.permute.xlu1 %154 }
  0x7f   :  { %v290_v42 = vpop.permute.xlu1 %289 }
  0xde   :  { %v140_v20 = vpop.f32.mrb[0].mxu0 }
  0xdf   :  { %v144_v21 = vadd.f32 %v140_v20, %v64_v18  ;;  %v2393_v22 = vpop.f32.mrb[1].mxu0  ;;  %v275_v23 = vpop.f32.mrb[0].mxu1 }
  0xe0   :  { %v279_v24 = vadd.f32 %v2245_v19, %v275_v23  ;;  %v2404_v25 = vpop.f32.mrb[1].mxu1 }
  0xe1   :  { %2662 = vtanh.f32 %v144_v21  ;;  %v2244_v28 = vmul.f32 -1.442695, %v144_v21 }
  0xe2   :  { %2664 = vtanh.f32 %v279_v24  ;;  %v2247_v29 = vmul.f32 -1.442695, %v279_v24 }
  0xe3   :  { %2666 = vpow2.f32 %v2244_v28 }
  0xe4   :  { %2668 = vpow2.f32 %v2247_v29 }
  0xeb   :  { %v2663_v26 = vpop.eup %2662 }
  0xec   :  { %159 = vrot.lane.b32.xlu0 %v2663_v26, %s2794_s14  ;;  %v2665_v27 = vpop.eup %2664 }
  0xed   :  { %v2667_v30 = vpop.eup %2666 }
  0xee   :  { %v149_v31 = vadd.f32 1.0, %v2667_v30  ;;  %v2669_v32 = vpop.eup %2668 }
  0xef   :  { %v284_v33 = vadd.f32 1.0, %v2669_v32 }
  0xf0   :  { %294 = vrot.lane.b32.xlu0 %v2665_v27, %s2794_s14  ;;  %2670 = vrcp.f32 %v149_v31 }
  0xf1   :  { %2672 = vrcp.f32 %v284_v33 }
  0xfa   :  { %v2671_v34 = vpop.eup %2670 }
  0xfb   :  { %v2673_v37 = vpop.eup %2672  ;;  %v157_v41 = vmul.f32 %v2671_v34, %v155_v40 }
  0xfc   :  { %v292_v45 = vmul.f32 %v2673_v37, %v290_v42 }
 0x15e   :  { %v160_v35 = vpop.permute.xlu0 %159 }
 0x15f   :  { %v162_v36 = vmul.f32 %v2671_v34, %v160_v35 }
 0x161   :  { %164 = vrot.lane.b32.xlu0 %v162_v36, %s2793_s9 }
 0x162   :  { %v295_v38 = vpop.permute.xlu0 %294 }
 0x163   :  { %v297_v39 = vmul.f32 %v2673_v37, %v295_v38 }
 0x165   :  { %299 = vrot.lane.b32.xlu1 %v297_v39, %s2793_s9 }
 0x1d3   :  { %v165_v43 = vpop.permute.xlu0 %164 }
 0x1d4   :  { %v167_v44 = vadd.f32 %v165_v43, %v157_v41 }
 0x1d6   :  { %2674 = vtanh.f32 %v167_v44 }
 0x1d7   :  { %v300_v46 = vpop.permute.xlu1 %299 }
 0x1d8   :  { %v302_v47 = vadd.f32 %v300_v46, %v292_v45  ;;  %v2257_v46 = vld [vmem:[%s3355_s0 + $0x8] sm:$0xf] }
 0x1da   :  { %2676 = vtanh.f32 %v302_v47 }
 0x1e0   :  { %v2675_v48 = vpop.eup %2674 }
 0x1e1   :  { %170 = vrot.lane.b32.xlu0 %v2675_v48, %s2794_s14 }
 0x1e4   :  { %v2677_v49 = vpop.eup %2676 }
 0x1e5   :  { %305 = vrot.lane.b32.xlu1 %v2677_v49, %s2794_s14 }
 0x253   :  { %v171_v50 = vpop.permute.xlu0 %170 }
 0x254   :  { %v2909_v51 = vmul.f32 %v2671_v34, %v171_v50  ;;  %v2261_v50 = vld [vmem:[%s3356_s1 + $0x14] sm:$0xf] }
 0x256   :  { %175 = vrot.lane.b32.xlu0 %v2909_v51, %s2793_s9 }
 0x257   :  { %v306_v52 = vpop.permute.xlu1 %305 }
 0x258   :  { %v2913_v53 = vmul.f32 %v2673_v37, %v306_v52 }
 0x25a   :  { %310 = vrot.lane.b32.xlu1 %v2913_v53, %s2793_s9  ;;  %181 = vrot.lane.b32.xlu0 %v167_v44, %s2795_s15 }
 0x25e   :  { %315 = vrot.lane.b32.xlu1 %v302_v47, %s2795_s15 }
 0x2c8   :  { %v176_v54 = vpop.permute.xlu0 %175 }
 0x2c9   :  { %179 = vst.msk [vmem:[#allocation2] sm:$0xf] %vm59_vm0, %v176_v54 }
 0x2cc   :  { %v311_v55 = vpop.permute.xlu1 %310  ;;  %v182_v56 = vpop.permute.xlu0 %181 }
 0x2cd   :  { %313 = vst.msk [vmem:[#allocation4] sm:$0xf] %vm59_vm0, %v311_v55  ;;  %184 = vst.msk [vmem:[#allocation3] sm:$0xf] %vm59_vm0, %v182_v56 }
 0x2d0   :  { %v316_v57 = vpop.permute.xlu1 %315  ;;  %v335_v58 = vld [vmem:[#allocation2] sm:$0xf] }
 0x2d1   :  { %318 = vst.msk [vmem:[#allocation5] sm:$0xf] %vm59_vm0, %v316_v57  ;;  %2414 = vmatmul.mubr.msk.f32.vlgmr.msra.gmra.mrb[2].mxu0 %vm70_vm2, %v335_v58 }
 0x2d2   :  { %2585 = vmatpush3.bf16.msra.mxu0 %v2846_v5  ;;  %2435 = vmatprep.mubr.msk.f32.mxu0 %vm2792_vm1, %v2791_v4 }
 0x2d3   :  { %2586 = vmatprep.subr.bf16.mxu0 %v2790_v0 }
 0x2d4   :  { %v469_v59 = vld [vmem:[#allocation4] sm:$0xf]  ;;  %v414_v10 = vld [vmem:[#allocation3] sm:$0xf] }
 0x2d5   :  { %2425 = vmatmul.mubr.msk.f32.vlgmr.msra.gmra.mrb[2].mxu1 %vm70_vm2, %v469_v59 }
 0x2d6   :  { %2588 = vmatpush3.bf16.msra.mxu0 %v2870_v12  ;;  %2591 = vmatpush3.bf16.msra.mxu1 %v2861_v9 }
 0x2d7   :  { %2592 = vmatprep.subr.bf16.mxu1 %v2790_v0  ;;  %2446 = vmatprep.mubr.msk.f32.mxu1 %vm2792_vm1, %v2791_v4 }
 0x2d8   :  { %2595 = vmatprep.subr.bf16.mxu0 %v2790_v0  ;;  %v548_v11 = vld [vmem:[#allocation5] sm:$0xf] }
 0x2da   :  { %2594 = vmatpush3.bf16.msra.mxu1 %v2874_v13 }
 0x2db   :  { %2601 = vmatprep.subr.bf16.mxu1 %v2790_v0 }
 0x3a4   :  { %v409_v61 = vpop.f32.mrb[2].mxu0 }
 0x3a5   :  { %v413_v62 = vadd.f32 %v2249_v60, %v409_v61  ;;  %v2415_v63 = vpop.f32.mrb[3].mxu0 }
 0x3a7   :  { %2678 = vtanh.f32 %v413_v62  ;;  %v2251_v14 = vmul.f32 -1.442695, %v413_v62 }
 0x3a8   :  { %v543_v2 = vpop.f32.mrb[2].mxu1 }
 0x3a9   :  { %v547_v3 = vadd.f32 %v2253_v1, %v543_v2  ;;  %v2426_v6 = vpop.f32.mrb[3].mxu1 }
 0x3ab   :  { %2680 = vtanh.f32 %v547_v3  ;;  %v2255_v15 = vmul.f32 -1.442695, %v547_v3 }
 0x3ac   :  { %2682 = vpow2.f32 %v2251_v14 }
 0x3ad   :  { %2684 = vpow2.f32 %v2255_v15 }
 0x3b1   :  { %v2679_v7 = vpop.eup %2678 }
 0x3b2   :  { %428 = vrot.lane.b32.xlu0 %v2679_v7, %s2794_s14 }
 0x3b5   :  { %v2681_v8 = vpop.eup %2680 }
 0x3b6   :  { %562 = vrot.lane.b32.xlu1 %v2681_v8, %s2794_s14  ;;  %423 = vrot.lane.b32.xlu0 %v414_v10, %s2793_s9  ;;  %v2683_v16 = vpop.eup %2682 }
 0x3b7   :  { %v418_v17 = vadd.f32 1.0, %v2683_v16  ;;  %v2685_v18 = vpop.eup %2684 }
 0x3b8   :  { %v552_v19 = vadd.f32 1.0, %v2685_v18 }
 0x3b9   :  { %2686 = vrcp.f32 %v418_v17 }
 0x3ba   :  { %557 = vrot.lane.b32.xlu1 %v548_v11, %s2793_s9  ;;  %2688 = vrcp.f32 %v552_v19 }
 0x3c3   :  { %v2687_v20 = vpop.eup %2686 }
 0x3c4   :  { %v2689_v23 = vpop.eup %2688 }
 0x424   :  { %v429_v21 = vpop.permute.xlu0 %428 }
 0x425   :  { %v431_v22 = vmul.f32 %v2687_v20, %v429_v21 }
 0x427   :  { %433 = vrot.lane.b32.xlu0 %v431_v22, %s2793_s9 }
 0x428   :  { %v563_v24 = vpop.permute.xlu1 %562  ;;  %v424_v26 = vpop.permute.xlu0 %423 }
 0x429   :  { %v565_v25 = vmul.f32 %v2689_v23, %v563_v24  ;;  %v426_v27 = vmul.f32 %v2687_v20, %v424_v26 }
 0x42b   :  { %567 = vrot.lane.b32.xlu1 %v565_v25, %s2793_s9 }
 0x42c   :  { %v558_v28 = vpop.permute.xlu1 %557 }
 0x42d   :  { %v560_v31 = vmul.f32 %v2689_v23, %v558_v28 }
 0x499   :  { %v434_v29 = vpop.permute.xlu0 %433 }
 0x49a   :  { %v436_v30 = vadd.f32 %v434_v29, %v426_v27 }
 0x49c   :  { %2690 = vtanh.f32 %v436_v30 }
 0x49d   :  { %v568_v32 = vpop.permute.xlu1 %567 }
 0x49e   :  { %v570_v33 = vadd.f32 %v568_v32, %v560_v31 }
 0x4a0   :  { %2692 = vtanh.f32 %v570_v33 }
 0x4a6   :  { %v2691_v34 = vpop.eup %2690 }
 0x4a7   :  { %439 = vrot.lane.b32.xlu0 %v2691_v34, %s2794_s14  ;;  %v2265_v34 = vld [vmem:[%s3355_s0 + $0xc] sm:$0xf] }
 0x4aa   :  { %v2693_v35 = vpop.eup %2692 }
 0x4ab   :  { %573 = vrot.lane.b32.xlu1 %v2693_v35, %s2794_s14 }
 0x519   :  { %v440_v36 = vpop.permute.xlu0 %439 }
 0x51a   :  { %v2951_v37 = vmul.f32 %v2687_v20, %v440_v36 }
 0x51c   :  { %444 = vrot.lane.b32.xlu0 %v2951_v37, %s2793_s9 }
 0x51d   :  { %v574_v38 = vpop.permute.xlu1 %573 }
 0x51e   :  { %v2955_v39 = vmul.f32 %v2689_v23, %v574_v38 }
 0x520   :  { %578 = vrot.lane.b32.xlu1 %v2955_v39, %s2793_s9  ;;  %449 = vrot.lane.b32.xlu0 %v436_v30, %s2795_s15 }
 0x524   :  { %583 = vrot.lane.b32.xlu1 %v570_v33, %s2795_s15 }
 0x58e   :  { %v445_v40 = vpop.permute.xlu0 %444 }
 0x58f   :  { %447 = vst.msk [vmem:[#allocation2] sm:$0xf] %vm59_vm0, %v445_v40  ;;  %v2269_v40 = vld [vmem:[%s3356_s1 + $0x10] sm:$0xf] }
 0x592   :  { %v579_v41 = vpop.permute.xlu1 %578  ;;  %v450_v42 = vpop.permute.xlu0 %449 }
 0x593   :  { %581 = vst.msk [vmem:[#allocation4] sm:$0xf] %vm59_vm0, %v579_v41  ;;  %452 = vst.msk [vmem:[#allocation3] sm:$0xf] %vm59_vm0, %v450_v42 }
 0x596   :  { %v584_v43 = vpop.permute.xlu1 %583  ;;  %v603_v44 = vld [vmem:[#allocation2] sm:$0xf] }
 0x597   :  { %586 = vst.msk [vmem:[#allocation5] sm:$0xf] %vm59_vm0, %v584_v43  ;;  %2436 = vmatmul.mubr.msk.f32.vlgmr.msra.gmra.mrb[4].mxu0 %vm70_vm2, %v603_v44 }
 0x598   :  { %2597 = vmatpush3.bf16.msra.mxu0 %v2846_v5  ;;  %2457 = vmatprep.mubr.msk.f32.mxu0 %vm2792_vm1, %v2791_v4 }
 0x599   :  { %2598 = vmatprep.subr.bf16.mxu0 %v2790_v0 }
 0x59a   :  { %v737_v45 = vld [vmem:[#allocation4] sm:$0xf]  ;;  %v682_v58 = vld [vmem:[#allocation3] sm:$0xf] }
 0x59b   :  { %2447 = vmatmul.mubr.msk.f32.vlgmr.msra.gmra.mrb[4].mxu1 %vm70_vm2, %v737_v45 }
 0x59c   :  { %2600 = vmatpush3.bf16.msra.mxu0 %v2870_v12  ;;  %2603 = vmatpush3.bf16.msra.mxu1 %v2861_v9 }
 0x59d   :  { %2604 = vmatprep.subr.bf16.mxu1 %v2790_v0  ;;  %2468 = vmatprep.mubr.msk.f32.mxu1 %vm2792_vm1, %v2791_v4 }
 0x59e   :  { %2607 = vmatprep.subr.bf16.mxu0 %v2790_v0  ;;  %v816_v59 = vld [vmem:[#allocation5] sm:$0xf] }
 0x5a0   :  { %2606 = vmatpush3.bf16.msra.mxu1 %v2874_v13 }
 0x5a1   :  { %2613 = vmatprep.subr.bf16.mxu1 %v2790_v0 }
 0x66a   :  { %v677_v47 = vpop.f32.mrb[4].mxu0 }
 0x66b   :  { %v681_v48 = vadd.f32 %v2257_v46, %v677_v47  ;;  %v2437_v49 = vpop.f32.mrb[5].mxu0 }
 0x66d   :  { %2694 = vtanh.f32 %v681_v48  ;;  %v2259_v60 = vmul.f32 -1.442695, %v681_v48 }
 0x66e   :  { %v811_v52 = vpop.f32.mrb[4].mxu1 }
 0x66f   :  { %v815_v54 = vadd.f32 %v2261_v50, %v811_v52  ;;  %v2448_v55 = vpop.f32.mrb[5].mxu1 }
 0x671   :  { %2696 = vtanh.f32 %v815_v54  ;;  %v2263_v61 = vmul.f32 -1.442695, %v815_v54 }
 0x672   :  { %2698 = vpow2.f32 %v2259_v60 }
 0x673   :  { %2700 = vpow2.f32 %v2263_v61 }
 0x677   :  { %v2695_v56 = vpop.eup %2694 }
 0x678   :  { %696 = vrot.lane.b32.xlu0 %v2695_v56, %s2794_s14 }
 0x67b   :  { %v2697_v57 = vpop.eup %2696 }
 0x67c   :  { %830 = vrot.lane.b32.xlu1 %v2697_v57, %s2794_s14  ;;  %691 = vrot.lane.b32.xlu0 %v682_v58, %s2793_s9  ;;  %v2699_v62 = vpop.eup %2698 }
 0x67d   :  { %v686_v63 = vadd.f32 1.0, %v2699_v62  ;;  %v2701_v1 = vpop.eup %2700 }
 0x67e   :  { %v820_v2 = vadd.f32 1.0, %v2701_v1 }
 0x67f   :  { %2702 = vrcp.f32 %v686_v63 }
 0x680   :  { %825 = vrot.lane.b32.xlu1 %v816_v59, %s2793_s9  ;;  %2704 = vrcp.f32 %v820_v2 }
 0x689   :  { %v2703_v3 = vpop.eup %2702 }
 0x68a   :  { %v2705_v8 = vpop.eup %2704 }
 0x6ea   :  { %v697_v6 = vpop.permute.xlu0 %696 }
 0x6eb   :  { %v699_v7 = vmul.f32 %v2703_v3, %v697_v6 }
 0x6ed   :  { %701 = vrot.lane.b32.xlu0 %v699_v7, %s2793_s9 }
 0x6ee   :  { %v831_v10 = vpop.permute.xlu1 %830  ;;  %v692_v14 = vpop.permute.xlu0 %691 }
 0x6ef   :  { %v833_v11 = vmul.f32 %v2705_v8, %v831_v10  ;;  %v694_v15 = vmul.f32 %v2703_v3, %v692_v14 }
 0x6f1   :  { %835 = vrot.lane.b32.xlu1 %v833_v11, %s2793_s9 }
 0x6f2   :  { %v826_v16 = vpop.permute.xlu1 %825 }
 0x6f3   :  { %v828_v19 = vmul.f32 %v2705_v8, %v826_v16 }
 0x75f   :  { %v702_v17 = vpop.permute.xlu0 %701 }
 0x760   :  { %v704_v18 = vadd.f32 %v702_v17, %v694_v15 }
 0x762   :  { %2706 = vtanh.f32 %v704_v18 }
 0x763   :  { %v836_v20 = vpop.permute.xlu1 %835 }
 0x764   :  { %v838_v21 = vadd.f32 %v836_v20, %v828_v19 }
 0x766   :  { %2708 = vtanh.f32 %v838_v21 }
 0x76c   :  { %v2707_v22 = vpop.eup %2706 }
 0x76d   :  { %707 = vrot.lane.b32.xlu0 %v2707_v22, %s2794_s14 }
 0x770   :  { %v2709_v23 = vpop.eup %2708 }
 0x771   :  { %841 = vrot.lane.b32.xlu1 %v2709_v23, %s2794_s14 }
 0x7df   :  { %v708_v24 = vpop.permute.xlu0 %707 }
 0x7e0   :  { %v2993_v25 = vmul.f32 %v2703_v3, %v708_v24 }
 0x7e2   :  { %712 = vrot.lane.b32.xlu0 %v2993_v25, %s2793_s9 }
 0x7e3   :  { %v842_v26 = vpop.permute.xlu1 %841 }
 0x7e4   :  { %v2997_v27 = vmul.f32 %v2705_v8, %v842_v26 }
 0x7e6   :  { %846 = vrot.lane.b32.xlu1 %v2997_v27, %s2793_s9  ;;  %717 = vrot.lane.b32.xlu0 %v704_v18, %s2795_s15 }
 0x7ea   :  { %851 = vrot.lane.b32.xlu1 %v838_v21, %s2795_s15 }
 0x854   :  { %v713_v28 = vpop.permute.xlu0 %712 }
 0x855   :  { %715 = vst.msk [vmem:[#allocation2] sm:$0xf] %vm59_vm0, %v713_v28 }
 0x858   :  { %v847_v29 = vpop.permute.xlu1 %846  ;;  %v718_v30 = vpop.permute.xlu0 %717 }
 0x859   :  { %849 = vst.msk [vmem:[#allocation4] sm:$0xf] %vm59_vm0, %v847_v29  ;;  %720 = vst.msk [vmem:[#allocation3] sm:$0xf] %vm59_vm0, %v718_v30 }
 0x85c   :  { %v852_v31 = vpop.permute.xlu1 %851  ;;  %v871_v32 = vld [vmem:[#allocation2] sm:$0xf] }
 0x85d   :  { %854 = vst.msk [vmem:[#allocation5] sm:$0xf] %vm59_vm0, %v852_v31  ;;  %2458 = vmatmul.mubr.msk.f32.vlgmr.msra.gmra.mrb[6].mxu0 %vm70_vm2, %v871_v32 }
 0x85e   :  { %2609 = vmatpush3.bf16.msra.mxu0 %v2846_v5  ;;  %2479 = vmatprep.mubr.msk.f32.mxu0 %vm2792_vm1, %v2791_v4 }
 0x85f   :  { %2610 = vmatprep.subr.bf16.mxu0 %v2790_v0 }
 0x860   :  { %v1005_v33 = vld [vmem:[#allocation4] sm:$0xf]  ;;  %v950_v46 = vld [vmem:[#allocation3] sm:$0xf] }
 0x861   :  { %2469 = vmatmul.mubr.msk.f32.vlgmr.msra.gmra.mrb[6].mxu1 %vm70_vm2, %v1005_v33 }
 0x862   :  { %2612 = vmatpush3.bf16.msra.mxu0 %v2870_v12  ;;  %2615 = vmatpush3.bf16.msra.mxu1 %v2861_v9 }
 0x863   :  { %2616 = vmatprep.subr.bf16.mxu1 %v2790_v0  ;;  %2490 = vmatprep.mubr.msk.f32.mxu1 %vm2792_vm1, %v2791_v4 }
 0x864   :  { %2619 = vmatprep.subr.bf16.mxu0 %v2790_v0  ;;  %v1084_v47 = vld [vmem:[#allocation5] sm:$0xf] }
 0x866   :  { %2618 = vmatpush3.bf16.msra.mxu1 %v2874_v13 }
 0x867   :  { %2625 = vmatprep.subr.bf16.mxu1 %v2790_v0 }
 0x930   :  { %v945_v35 = vpop.f32.mrb[6].mxu0 }
 0x931   :  { %v949_v36 = vadd.f32 %v2265_v34, %v945_v35  ;;  %v2459_v38 = vpop.f32.mrb[7].mxu0 }
 0x933   :  { %2710 = vtanh.f32 %v949_v36  ;;  %v2267_v48 = vmul.f32 -1.442695, %v949_v36 }
 0x934   :  { %v1079_v41 = vpop.f32.mrb[6].mxu1 }
 0x935   :  { %v1083_v42 = vadd.f32 %v2269_v40, %v1079_v41  ;;  %v2470_v43 = vpop.f32.mrb[7].mxu1 }
 0x937   :  { %2712 = vtanh.f32 %v1083_v42  ;;  %v2271_v49 = vmul.f32 -1.442695, %v1083_v42 }
 0x938   :  { %2714 = vpow2.f32 %v2267_v48 }
 0x939   :  { %2716 = vpow2.f32 %v2271_v49 }
 0x93d   :  { %v2711_v44 = vpop.eup %2710 }
 0x93e   :  { %964 = vrot.lane.b32.xlu0 %v2711_v44, %s2794_s14 }
 0x941   :  { %v2713_v45 = vpop.eup %2712 }
 0x942   :  { %1098 = vrot.lane.b32.xlu1 %v2713_v45, %s2794_s14  ;;  %959 = vrot.lane.b32.xlu0 %v950_v46, %s2793_s9  ;;  %v2715_v50 = vpop.eup %2714 }
 0x943   :  { %v954_v52 = vadd.f32 1.0, %v2715_v50  ;;  %v2717_v54 = vpop.eup %2716 }
 0x944   :  { %v1088_v55 = vadd.f32 1.0, %v2717_v54 }
 0x945   :  { %2718 = vrcp.f32 %v954_v52 }
 0x946   :  { %1093 = vrot.lane.b32.xlu1 %v1084_v47, %s2793_s9  ;;  %2720 = vrcp.f32 %v1088_v55 }
 0x94f   :  { %v2719_v56 = vpop.eup %2718 }
 0x950   :  { %v2721_v59 = vpop.eup %2720 }
 0x9b0   :  { %v965_v57 = vpop.permute.xlu0 %964 }
 0x9b1   :  { %v967_v58 = vmul.f32 %v2719_v56, %v965_v57 }
 0x9b3   :  { %969 = vrot.lane.b32.xlu0 %v967_v58, %s2793_s9 }
 0x9b4   :  { %v1099_v60 = vpop.permute.xlu1 %1098  ;;  %v960_v62 = vpop.permute.xlu0 %959 }
 0x9b5   :  { %v1101_v61 = vmul.f32 %v2721_v59, %v1099_v60  ;;  %v962_v63 = vmul.f32 %v2719_v56, %v960_v62 }
 0x9b7   :  { %1103 = vrot.lane.b32.xlu1 %v1101_v61, %s2793_s9 }
 0x9b8   :  { %v1094_v1 = vpop.permute.xlu1 %1093 }
 0x9b9   :  { %v1096_v6 = vmul.f32 %v2721_v59, %v1094_v1 }
 0xa25   :  { %v970_v2 = vpop.permute.xlu0 %969 }
 0xa26   :  { %v972_v3 = vadd.f32 %v970_v2, %v962_v63 }
 0xa28   :  { %2722 = vtanh.f32 %v972_v3 }
 0xa29   :  { %v1104_v7 = vpop.permute.xlu1 %1103 }
 0xa2a   :  { %v1106_v8 = vadd.f32 %v1104_v7, %v1096_v6 }
 0xa2c   :  { %2724 = vtanh.f32 %v1106_v8 }
 0xa32   :  { %v2723_v10 = vpop.eup %2722 }
 0xa33   :  { %975 = vrot.lane.b32.xlu0 %v2723_v10, %s2794_s14  ;;  %v2281_v10 = vld [vmem:[%s3355_s0 + $0x14] sm:$0xf] }
 0xa36   :  { %v2725_v11 = vpop.eup %2724 }
 0xa37   :  { %1109 = vrot.lane.b32.xlu1 %v2725_v11, %s2794_s14 }
 0xaa5   :  { %v976_v14 = vpop.permute.xlu0 %975 }
 0xaa6   :  { %v3035_v15 = vmul.f32 %v2719_v56, %v976_v14 }
 0xaa8   :  { %980 = vrot.lane.b32.xlu0 %v3035_v15, %s2793_s9 }
 0xaa9   :  { %v1110_v16 = vpop.permute.xlu1 %1109 }
 0xaaa   :  { %v3039_v17 = vmul.f32 %v2721_v59, %v1110_v16 }
 0xaac   :  { %1114 = vrot.lane.b32.xlu1 %v3039_v17, %s2793_s9  ;;  %985 = vrot.lane.b32.xlu0 %v972_v3, %s2795_s15 }
 0xab0   :  { %1119 = vrot.lane.b32.xlu1 %v1106_v8, %s2795_s15 }
 0xb1a   :  { %v981_v18 = vpop.permute.xlu0 %980 }
 0xb1b   :  { %983 = vst.msk [vmem:[#allocation2] sm:$0xf] %vm59_vm0, %v981_v18  ;;  %v2285_v18 = vld [vmem:[%s3356_s1 + $0x8] sm:$0xf] }
 0xb1e   :  { %v1115_v19 = vpop.permute.xlu1 %1114  ;;  %v986_v20 = vpop.permute.xlu0 %985 }
 0xb1f   :  { %1117 = vst.msk [vmem:[#allocation4] sm:$0xf] %vm59_vm0, %v1115_v19  ;;  %988 = vst.msk [vmem:[#allocation3] sm:$0xf] %vm59_vm0, %v986_v20 }
 0xb22   :  { %v1120_v21 = vpop.permute.xlu1 %1119  ;;  %v1139_v22 = vld [vmem:[#allocation2] sm:$0xf] }
 0xb23   :  { %1122 = vst.msk [vmem:[#allocation5] sm:$0xf] %vm59_vm0, %v1120_v21  ;;  %2480 = vmatmul.mubr.msk.f32.vlgmr.msra.gmra.mrb[8].mxu0 %vm70_vm2, %v1139_v22 }
 0xb24   :  { %2621 = vmatpush3.bf16.msra.mxu0 %v2846_v5  ;;  %2501 = vmatprep.mubr.msk.f32.mxu0 %vm2792_vm1, %v2791_v4  ;;  %v2273_v5 = vld [vmem:[%s3355_s0 + $0x10] sm:$0xf] }
 0xb25   :  { %2622 = vmatprep.subr.bf16.mxu0 %v2790_v0 }
 0xb26   :  { %v1273_v23 = vld [vmem:[#allocation4] sm:$0xf]  ;;  %v1218_v32 = vld [vmem:[#allocation3] sm:$0xf] }
 0xb27   :  { %2491 = vmatmul.mubr.msk.f32.vlgmr.msra.gmra.mrb[8].mxu1 %vm70_vm2, %v1273_v23 }
 0xb28   :  { %2624 = vmatpush3.bf16.msra.mxu0 %v2870_v12  ;;  %2627 = vmatpush3.bf16.msra.mxu1 %v2861_v9  ;;  %v2277_v9 = vld [vmem:[%s3356_s1 + $0xc] sm:$0xf] }
 0xb29   :  { %2628 = vmatprep.subr.bf16.mxu1 %v2790_v0  ;;  %2512 = vmatprep.mubr.msk.f32.mxu1 %vm2792_vm1, %v2791_v4 }
 0xb2a   :  { %2631 = vmatprep.subr.bf16.mxu0 %v2790_v0  ;;  %v1352_v33 = vld [vmem:[#allocation5] sm:$0xf] }
 0xb2c   :  { %2630 = vmatpush3.bf16.msra.mxu1 %v2874_v13 }
 0xb2d   :  { %2637 = vmatprep.subr.bf16.mxu1 %v2790_v0 }
 0xbf6   :  { %v1213_v24 = vpop.f32.mrb[8].mxu0 }
 0xbf7   :  { %v1217_v26 = vadd.f32 %v2273_v5, %v1213_v24  ;;  %v2481_v12 = vpop.f32.mrb[9].mxu0 }
 0xbf9   :  { %2726 = vtanh.f32 %v1217_v26  ;;  %v2275_v34 = vmul.f32 -1.442695, %v1217_v26 }
 0xbfa   :  { %v1347_v28 = vpop.f32.mrb[8].mxu1 }
 0xbfb   :  { %v1351_v29 = vadd.f32 %v2277_v9, %v1347_v28  ;;  %v2492_v30 = vpop.f32.mrb[9].mxu1 }
 0xbfd   :  { %2728 = vtanh.f32 %v1351_v29  ;;  %v2279_v35 = vmul.f32 -1.442695, %v1351_v29 }
 0xbfe   :  { %2730 = vpow2.f32 %v2275_v34 }
 0xbff   :  { %2732 = vpow2.f32 %v2279_v35 }
 0xc03   :  { %v2727_v31 = vpop.eup %2726 }
 0xc04   :  { %1232 = vrot.lane.b32.xlu0 %v2727_v31, %s2794_s14 }
 0xc07   :  { %v2729_v13 = vpop.eup %2728 }
 0xc08   :  { %1366 = vrot.lane.b32.xlu1 %v2729_v13, %s2794_s14  ;;  %1227 = vrot.lane.b32.xlu0 %v1218_v32, %s2793_s9  ;;  %v2731_v36 = vpop.eup %2730 }
 0xc09   :  { %v1222_v38 = vadd.f32 1.0, %v2731_v36  ;;  %v2733_v40 = vpop.eup %2732 }
 0xc0a   :  { %v1356_v41 = vadd.f32 1.0, %v2733_v40 }
 0xc0b   :  { %2734 = vrcp.f32 %v1222_v38 }
 0xc0c   :  { %1361 = vrot.lane.b32.xlu1 %v1352_v33, %s2793_s9  ;;  %2736 = vrcp.f32 %v1356_v41 }
 0xc15   :  { %v2735_v42 = vpop.eup %2734 }
 0xc16   :  { %v2737_v45 = vpop.eup %2736 }
 0xc76   :  { %v1233_v43 = vpop.permute.xlu0 %1232 }
 0xc77   :  { %v1235_v44 = vmul.f32 %v2735_v42, %v1233_v43 }
 0xc79   :  { %1237 = vrot.lane.b32.xlu0 %v1235_v44, %s2793_s9 }
 0xc7a   :  { %v1367_v46 = vpop.permute.xlu1 %1366  ;;  %v1228_v48 = vpop.permute.xlu0 %1227 }
 0xc7b   :  { %v1369_v47 = vmul.f32 %v2737_v45, %v1367_v46  ;;  %v1230_v49 = vmul.f32 %v2735_v42, %v1228_v48  ;;  %v1676_v48 = vld [vmem:[%s3353_s2] sm:$0xff] }
 0xc7d   :  { %1371 = vrot.lane.b32.xlu1 %v1369_v47, %s2793_s9 }
 0xc7e   :  { %v1362_v50 = vpop.permute.xlu1 %1361 }
 0xc7f   :  { %v1364_v55 = vmul.f32 %v2737_v45, %v1362_v50 }
 0xceb   :  { %v1238_v52 = vpop.permute.xlu0 %1237 }
 0xcec   :  { %v1240_v54 = vadd.f32 %v1238_v52, %v1230_v49  ;;  %v1677_v49 = vld [vmem:[%s3353_s2 + $0x8] sm:$0xff]  ;;  %v1678_v52 = vld [vmem:[%s3353_s2 + $0x10] sm:$0xff] }
 0xced   :  { %v2632_v50 = vpack.c.bf16 %v1677_v49, %v1676_v48 }
 0xcee   :  { %2738 = vtanh.f32 %v1240_v54 }
 0xcef   :  { %v1372_v56 = vpop.permute.xlu1 %1371 }
 0xcf0   :  { %v1374_v57 = vadd.f32 %v1372_v56, %v1364_v55  ;;  %v1810_v55 = vld [vmem:[%s3354_s3] sm:$0xff] }
 0xcf2   :  { %2740 = vtanh.f32 %v1374_v57 }
 0xcf8   :  { %v2739_v58 = vpop.eup %2738 }
 0xcf9   :  { %1243 = vrot.lane.b32.xlu0 %v2739_v58, %s2794_s14 }
 0xcfc   :  { %v2741_v59 = vpop.eup %2740 }
 0xcfd   :  { %1377 = vrot.lane.b32.xlu1 %v2741_v59, %s2794_s14  ;;  %v1812_v59 = vld [vmem:[%s3354_s3 + $0x10] sm:$0xff] }
 0xd6b   :  { %v1244_v60 = vpop.permute.xlu0 %1243 }
 0xd6c   :  { %v3077_v61 = vmul.f32 %v2735_v42, %v1244_v60  ;;  %v1813_v60 = vld [vmem:[%s3354_s3 + $0x18] sm:$0xff] }
 0xd6e   :  { %1248 = vrot.lane.b32.xlu0 %v3077_v61, %s2793_s9 }
 0xd6f   :  { %v1378_v62 = vpop.permute.xlu1 %1377 }
 0xd70   :  { %v3081_v63 = vmul.f32 %v2737_v45, %v1378_v62  ;;  %v2641_v62 = vpack.c.bf16 %v1813_v60, %v1812_v59 }
 0xd72   :  { %1382 = vrot.lane.b32.xlu1 %v3081_v63, %s2793_s9  ;;  %1253 = vrot.lane.b32.xlu0 %v1240_v54, %s2795_s15  ;;  %v1679_v54 = vld [vmem:[%s3353_s2 + $0x18] sm:$0xff] }
 0xd73   :  { %v2635_v56 = vpack.c.bf16 %v1679_v54, %v1678_v52 }
 0xd76   :  { %1387 = vrot.lane.b32.xlu1 %v1374_v57, %s2795_s15  ;;  %v1811_v57 = vld [vmem:[%s3354_s3 + $0x8] sm:$0xff] }
 0xd77   :  { %v2638_v58 = vpack.c.bf16 %v1811_v57, %v1810_v55 }
 0xde0   :  { %v1249_v1 = vpop.permute.xlu0 %1248 }
 0xde1   :  { %1251 = vst.msk [vmem:[#allocation2] sm:$0xf] %vm59_vm0, %v1249_v1 }
 0xde4   :  { %v1383_v2 = vpop.permute.xlu1 %1382  ;;  %v1254_v3 = vpop.permute.xlu0 %1253 }
 0xde5   :  { %1385 = vst.msk [vmem:[#allocation4] sm:$0xf] %vm59_vm0, %v1383_v2  ;;  %1256 = vst.msk [vmem:[#allocation3] sm:$0xf] %vm59_vm0, %v1254_v3 }
 0xde8   :  { %v1388_v6 = vpop.permute.xlu1 %1387  ;;  %v1407_v7 = vld [vmem:[#allocation2] sm:$0xf] }
 0xde9   :  { %1390 = vst.msk [vmem:[#allocation5] sm:$0xf] %vm59_vm0, %v1388_v6  ;;  %2502 = vmatmul.mubr.msk.f32.vlgmr.msra.gmra.mrb[10].mxu0 %vm70_vm2, %v1407_v7 }
 0xdea   :  { %2523 = vmatprep.mubr.msk.f32.mxu0 %vm2792_vm1, %v2791_v4  ;;  %2633 = vmatpush3.bf16.msra.mxu0 %v2632_v50 }
 0xdeb   :  { %2634 = vmatprep.subr.bf16.mxu0 %v2790_v0 }
 0xdec   :  { %v1541_v8 = vld [vmem:[#allocation4] sm:$0xf]  ;;  %v1486_v5 = vld [vmem:[#allocation3] sm:$0xf] }
 0xded   :  { %2513 = vmatmul.mubr.msk.f32.vlgmr.msra.gmra.mrb[10].mxu1 %vm70_vm2, %v1541_v8 }
 0xdee   :  { %2534 = vmatprep.mubr.msk.f32.mxu1 %vm2792_vm1, %v2791_v4  ;;  %2636 = vmatpush3.bf16.msra.mxu0 %v2635_v56 }
 0xdef   :  { %2639 = vmatpush3.bf16.msra.mxu1 %v2638_v58  ;;  %2643 = vmatprep.subr.bf16.mxu0 %v2790_v0 }
 0xdf0   :  { %v1620_v24 = vld [vmem:[#allocation5] sm:$0xf]  ;;  %2640 = vmatprep.subr.bf16.mxu1 %v2790_v0 }
 0xdf3   :  { %2642 = vmatpush3.bf16.msra.mxu1 %v2641_v62 }
 0xdf4   :  { %2649 = vmatprep.subr.bf16.mxu1 %v2790_v0 }
 0xebc   :  { %v1481_v11 = vpop.f32.mrb[10].mxu0 }
 0xebd   :  { %v1485_v14 = vadd.f32 %v2281_v10, %v1481_v11  ;;  %v2503_v16 = vpop.f32.mrb[11].mxu0 }
 0xebf   :  { %2742 = vtanh.f32 %v1485_v14  ;;  %v2283_v26 = vmul.f32 -1.442695, %v1485_v14 }
 0xec0   :  { %v1615_v19 = vpop.f32.mrb[10].mxu1 }
 0xec1   :  { %v1619_v20 = vadd.f32 %v2285_v18, %v1615_v19  ;;  %v2514_v21 = vpop.f32.mrb[11].mxu1  ;;  %v2289_v18 = vld [vmem:[%s3355_s0 + $0x18] sm:$0xf] }
 0xec3   :  { %2744 = vtanh.f32 %v1619_v20  ;;  %v2287_v12 = vmul.f32 -1.442695, %v1619_v20 }
 0xec4   :  { %2746 = vpow2.f32 %v2283_v26 }
 0xec5   :  { %2748 = vpow2.f32 %v2287_v12 }
 0xec9   :  { %v2743_v22 = vpop.eup %2742 }
 0xeca   :  { %1500 = vrot.lane.b32.xlu0 %v2743_v22, %s2794_s14  ;;  %v2293_v22 = vld [vmem:[%s3356_s1 + $0x4] sm:$0xf] }
 0xecd   :  { %v2745_v23 = vpop.eup %2744 }
 0xece   :  { %1634 = vrot.lane.b32.xlu1 %v2745_v23, %s2794_s14  ;;  %1495 = vrot.lane.b32.xlu0 %v1486_v5, %s2793_s9  ;;  %v2747_v9 = vpop.eup %2746 }
 0xecf   :  { %v1490_v28 = vadd.f32 1.0, %v2747_v9  ;;  %v2749_v29 = vpop.eup %2748 }
 0xed0   :  { %v1624_v30 = vadd.f32 1.0, %v2749_v29 }
 0xed1   :  { %2750 = vrcp.f32 %v1490_v28 }
 0xed2   :  { %1629 = vrot.lane.b32.xlu1 %v1620_v24, %s2793_s9  ;;  %2752 = vrcp.f32 %v1624_v30 }
 0xedb   :  { %v2751_v31 = vpop.eup %2750 }
 0xedc   :  { %v2753_v33 = vpop.eup %2752 }
 0xf3c   :  { %v1501_v13 = vpop.permute.xlu0 %1500 }
 0xf3d   :  { %v1503_v32 = vmul.f32 %v2751_v31, %v1501_v13 }
 0xf3f   :  { %1505 = vrot.lane.b32.xlu0 %v1503_v32, %s2793_s9 }
 0xf40   :  { %v1635_v34 = vpop.permute.xlu1 %1634  ;;  %v1496_v36 = vpop.permute.xlu0 %1495 }
 0xf41   :  { %v1637_v35 = vmul.f32 %v2753_v33, %v1635_v34  ;;  %v1498_v38 = vmul.f32 %v2751_v31, %v1496_v36 }
 0xf43   :  { %1639 = vrot.lane.b32.xlu1 %v1637_v35, %s2793_s9 }
 0xf44   :  { %v1630_v40 = vpop.permute.xlu1 %1629 }
 0xf45   :  { %v1632_v43 = vmul.f32 %v2753_v33, %v1630_v40 }
 0xfb1   :  { %v1506_v41 = vpop.permute.xlu0 %1505 }
 0xfb2   :  { %v1508_v42 = vadd.f32 %v1506_v41, %v1498_v38 }
 0xfb4   :  { %2754 = vtanh.f32 %v1508_v42 }
 0xfb5   :  { %v1640_v44 = vpop.permute.xlu1 %1639 }
 0xfb6   :  { %v1642_v45 = vadd.f32 %v1640_v44, %v1632_v43 }
 0xfb8   :  { %2756 = vtanh.f32 %v1642_v45 }
 0xfbe   :  { %v2755_v46 = vpop.eup %2754 }
 0xfbf   :  { %1511 = vrot.lane.b32.xlu0 %v2755_v46, %s2794_s14 }
 0xfc2   :  { %v2757_v47 = vpop.eup %2756 }
 0xfc3   :  { %1645 = vrot.lane.b32.xlu1 %v2757_v47, %s2794_s14 }
0x1031   :  { %v1512_v1 = vpop.permute.xlu0 %1511 }
0x1032   :  { %v3138_v2 = vmul.f32 %v2751_v31, %v1512_v1  ;;  %v2297_v1 = vld [vmem:[%s3355_s0 + $0x1c] sm:$0xf] }
0x1034   :  { %1516 = vrot.lane.b32.xlu0 %v3138_v2, %s2793_s9 }
0x1035   :  { %v1646_v3 = vpop.permute.xlu1 %1645 }
0x1036   :  { %v3143_v6 = vmul.f32 %v2753_v33, %v1646_v3 }
0x1038   :  { %1650 = vrot.lane.b32.xlu1 %v3143_v6, %s2793_s9  ;;  %1521 = vrot.lane.b32.xlu0 %v1508_v42, %s2795_s15 }
0x103c   :  { %1655 = vrot.lane.b32.xlu1 %v1642_v45, %s2795_s15 }
0x10a6   :  { %v1517_v7 = vpop.permute.xlu0 %1516 }
0x10a7   :  { %1519 = vst.msk [vmem:[#allocation2] sm:$0xf] %vm59_vm0, %v1517_v7 }
0x10aa   :  { %v1651_v8 = vpop.permute.xlu1 %1650  ;;  %v1522_v10 = vpop.permute.xlu0 %1521 }
0x10ab   :  { %1653 = vst.msk [vmem:[#allocation4] sm:$0xf] %vm59_vm0, %v1651_v8  ;;  %1524 = vst.msk [vmem:[#allocation3] sm:$0xf] %vm59_vm0, %v1522_v10  ;;  %v2075_v10 = vld [vmem:[%s3356_s1] sm:$0xf] }
0x10ae   :  { %v1656_v11 = vpop.permute.xlu1 %1655  ;;  %v1675_v14 = vld [vmem:[#allocation2] sm:$0xf] }
0x10af   :  { %1658 = vst.msk [vmem:[#allocation5] sm:$0xf] %vm59_vm0, %v1656_v11  ;;  %2524 = vmatmul.mubr.msk.f32.vlgmr.msra.gmra.mrb[12].mxu0 %vm70_vm2, %v1675_v14 }
0x10b0   :  { %2645 = vmatpush3.bf16.msra.mxu0 %v2632_v50  ;;  %2545 = vmatprep.mubr.msk.f32.mxu0 %vm2792_vm1, %v2791_v4 }
0x10b1   :  { %2646 = vmatprep.subr.bf16.mxu0 %v2790_v0 }
0x10b2   :  { %v1809_v16 = vld [vmem:[#allocation4] sm:$0xf]  ;;  %v1754_v26 = vld [vmem:[#allocation3] sm:$0xf] }
0x10b3   :  { %2535 = vmatmul.mubr.msk.f32.vlgmr.msra.gmra.mrb[12].mxu1 %vm70_vm2, %v1809_v16 }
0x10b4   :  { %2648 = vmatpush3.bf16.msra.mxu0 %v2635_v56  ;;  %2651 = vmatpush3.bf16.msra.mxu1 %v2638_v58 }
0x10b5   :  { %2652 = vmatprep.subr.bf16.mxu1 %v2790_v0  ;;  %2556 = vmatprep.mubr.msk.f32.mxu1 %vm2792_vm1, %v2791_v4 }
0x10b6   :  { %v1888_v12 = vld [vmem:[#allocation5] sm:$0xf] }
0x10b8   :  { %2654 = vmatpush3.bf16.msra.mxu1 %v2641_v62 }
0x1182   :  { %v1749_v19 = vpop.f32.mrb[12].mxu0 }
0x1183   :  { %v1753_v20 = vadd.f32 %v2289_v18, %v1749_v19  ;;  %v2525_v21 = vpop.f32.mrb[13].mxu0 }
0x1185   :  { %2758 = vtanh.f32 %v1753_v20  ;;  %v2291_v9 = vmul.f32 -1.442695, %v1753_v20 }
0x1186   :  { %v1883_v23 = vpop.f32.mrb[12].mxu1 }
0x1187   :  { %v1887_v5 = vadd.f32 %v2293_v22, %v1883_v23  ;;  %v2536_v24 = vpop.f32.mrb[13].mxu1 }
0x1189   :  { %2760 = vtanh.f32 %v1887_v5  ;;  %v2295_v28 = vmul.f32 -1.442695, %v1887_v5 }
0x118a   :  { %2762 = vpow2.f32 %v2291_v9 }
0x118b   :  { %2764 = vpow2.f32 %v2295_v28 }
0x118f   :  { %v2759_v0 = vpop.eup %2758 }
0x1190   :  { %1768 = vrot.lane.b32.xlu0 %v2759_v0, %s2794_s14 }
0x1193   :  { %v2761_v4 = vpop.eup %2760 }
0x1194   :  { %1902 = vrot.lane.b32.xlu1 %v2761_v4, %s2794_s14  ;;  %1763 = vrot.lane.b32.xlu0 %v1754_v26, %s2793_s9  ;;  %v2763_v29 = vpop.eup %2762 }
0x1195   :  { %v1758_v30 = vadd.f32 1.0, %v2763_v29  ;;  %v2765_v31 = vpop.eup %2764 }
0x1196   :  { %v1892_v13 = vadd.f32 1.0, %v2765_v31 }
0x1197   :  { %2766 = vrcp.f32 %v1758_v30 }
0x1198   :  { %1897 = vrot.lane.b32.xlu1 %v1888_v12, %s2793_s9  ;;  %2768 = vrcp.f32 %v1892_v13 }
0x11a1   :  { %v2767_v32 = vpop.eup %2766 }
0x11a2   :  { %v2769_v35 = vpop.eup %2768 }
0x1202   :  { %v1769_v33 = vpop.permute.xlu0 %1768 }
0x1203   :  { %v1771_v34 = vmul.f32 %v2767_v32, %v1769_v33 }
0x1205   :  { %1773 = vrot.lane.b32.xlu0 %v1771_v34, %s2793_s9 }
0x1206   :  { %v1903_v36 = vpop.permute.xlu1 %1902  ;;  %v1764_v40 = vpop.permute.xlu0 %1763 }
0x1207   :  { %v1905_v38 = vmul.f32 %v2769_v35, %v1903_v36  ;;  %v1766_v41 = vmul.f32 %v2767_v32, %v1764_v40  ;;  %v2796_v36 = vmov 1983009808   ;;  %v190_v40 = vlaneseq }
0x1209   :  { %1907 = vrot.lane.b32.xlu1 %v1905_v38, %s2793_s9  ;;  %v188_v38 = vunpack.c.l.s4 %v2796_v36 }
0x120a   :  { %v1898_v42 = vpop.permute.xlu1 %1897 }
0x120b   :  { %v1900_v45 = vmul.f32 %v2769_v35, %v1898_v42 }
0x1277   :  { %v1774_v43 = vpop.permute.xlu0 %1773 }
0x1278   :  { %v1776_v44 = vadd.f32 %v1774_v43, %v1766_v41  ;;  %v189_v43 = vunpack.c.0.s8 %v188_v38 }
0x127a   :  { %2770 = vtanh.f32 %v1776_v44 }
0x127b   :  { %v1908_v46 = vpop.permute.xlu1 %1907 }
0x127c   :  { %v1910_v47 = vadd.f32 %v1908_v46, %v1900_v45  ;;  %v185_v45 = vpack.c.bf16 %v2909_v51, %v2909_v51  ;;  %v587_v51 = vpack.c.bf16 %v2955_v39, %v2955_v39 }
0x127e   :  { %2772 = vtanh.f32 %v1910_v47 }
0x1284   :  { %v2771_v48 = vpop.eup %2770 }
0x1285   :  { %1779 = vrot.lane.b32.xlu0 %v2771_v48, %s2794_s14  ;;  %v319_v48 = vpack.c.bf16 %v2913_v53, %v2913_v53 }
0x1288   :  { %v2773_v49 = vpop.eup %2772 }
0x1289   :  { %1913 = vrot.lane.b32.xlu1 %v2773_v49, %s2794_s14  ;;  %v453_v49 = vpack.c.bf16 %v2951_v37, %v2951_v37  ;;  %v855_v37 = vpack.c.bf16 %v2997_v27, %v2997_v27 }
0x12f7   :  { %v1780_v50 = vpop.permute.xlu0 %1779 }
0x12f8   :  { %v3175_v52 = vmul.f32 %v2767_v32, %v1780_v50 }
0x12fa   :  { %1784 = vrot.lane.b32.xlu0 %v3175_v52, %s2793_s9 }
0x12fb   :  { %v1914_v54 = vpop.permute.xlu1 %1913 }
0x12fc   :  { %v3179_v55 = vmul.f32 %v2769_v35, %v1914_v54 }
0x12fe   :  { %1918 = vrot.lane.b32.xlu1 %v3179_v55, %s2793_s9  ;;  %1789 = vrot.lane.b32.xlu0 %v1776_v44, %s2795_s15  ;;  %v191_v44 = vshrl.u32 %v190_v40, 7 }
0x1300   :  { %v3216_v46 = vsub.s32 %v189_v43, %v191_v44 }
0x1302   :  { %1923 = vrot.lane.b32.xlu1 %v1910_v47, %s2795_s15  ;;  %v193_v50 = vrot.slane %v185_v45, %v3216_v46  ;;  %v461_v53 = vrot.slane %v453_v49, %v3216_v46  ;;  %v863_v27 = vrot.slane %v855_v37, %v3216_v46 }
0x136c   :  { %v1785_v56 = vpop.permute.xlu0 %1784 }
0x136d   :  { %1787 = vst.msk [vmem:[#allocation2] sm:$0xf] %vm59_vm0, %v1785_v56  ;;  %v721_v56 = vpack.c.bf16 %v2993_v25, %v2993_v25 }
0x136f   :  { %v729_v39 = vrot.slane %v721_v56, %v3216_v46 }
0x1370   :  { %v1919_v57 = vpop.permute.xlu1 %1918  ;;  %v1790_v58 = vpop.permute.xlu0 %1789 }
0x1371   :  { %1921 = vst.msk [vmem:[#allocation4] sm:$0xf] %vm59_vm0, %v1919_v57  ;;  %1792 = vst.msk [vmem:[#allocation3] sm:$0xf] %vm59_vm0, %v1790_v58  ;;  %v327_v57 = vrot.slane %v319_v48, %v3216_v46  ;;  %v989_v58 = vpack.c.bf16 %v3035_v15, %v3035_v15 }
0x1373   :  { %v997_v25 = vrot.slane %v989_v58, %v3216_v46 }
0x1374   :  { %v1924_v59 = vpop.permute.xlu1 %1923  ;;  %v1943_v60 = vld [vmem:[#allocation2] sm:$0xf] }
0x1375   :  { %1926 = vst.msk [vmem:[#allocation5] sm:$0xf] %vm59_vm0, %v1924_v59  ;;  %2546 = vmatmul.mubr.msk.f32.vlgmr.msra.gmra.mrb[14].mxu0 %vm70_vm2, %v1943_v60  ;;  %v595_v59 = vrot.slane %v587_v51, %v3216_v46  ;;  %v1123_v60 = vpack.c.bf16 %v3039_v17, %v3039_v17 }
0x1377   :  { %v1131_v15 = vrot.slane %v1123_v60, %v3216_v46 }
0x1378   :  { %v2076_v62 = vld [vmem:[#allocation4] sm:$0xf]  ;;  %v2022_v20 = vld [vmem:[#allocation3] sm:$0xf] }
0x1379   :  { %2557 = vmatmul.mubr.msk.f32.vlgmr.msra.gmra.mrb[14].mxu1 %vm70_vm2, %v2076_v62  ;;  %v1257_v62 = vpack.c.bf16 %v3077_v61, %v3077_v61 }
0x137c   :  { %v2155_v21 = vld [vmem:[#allocation5] sm:$0xf] }
0x1448   :  { %v2017_v3 = vpop.f32.mrb[14].mxu0 }
0x1449   :  { %v2021_v7 = vadd.f32 %v2297_v1, %v2017_v3  ;;  %v2547_v8 = vpop.f32.mrb[15].mxu0  ;;  %v1265_v1 = vrot.slane %v1257_v62, %v3216_v46  ;;  %v1391_v3 = vpack.c.bf16 %v3081_v63, %v3081_v63 }
0x144a   :  { %v1659_v8 = vpack.c.bf16 %v3143_v6, %v3143_v6 }
0x144b   :  { %2774 = vtanh.f32 %v2021_v7  ;;  %v2299_v22 = vmul.f32 -1.442695, %v2021_v7  ;;  %v1525_v7 = vpack.c.bf16 %v3138_v2, %v3138_v2  ;;  %v1399_v17 = vrot.slane %v1391_v3, %v3216_v46 }
0x144c   :  { %v2150_v11 = vpop.f32.mrb[14].mxu1  ;;  %v1667_v63 = vrot.slane %v1659_v8, %v3216_v46 }
0x144d   :  { %v2154_v14 = vadd.f32 %v2150_v11, %v2075_v10  ;;  %v2558_v16 = vpop.f32.mrb[15].mxu1  ;;  %v1533_v61 = vrot.slane %v1525_v7, %v3216_v46  ;;  %v1793_v10 = vpack.c.bf16 %v3175_v52, %v3175_v52  ;;  %v1927_v11 = vpack.c.bf16 %v3179_v55, %v3179_v55 }
0x144f   :  { %2776 = vtanh.f32 %v2154_v14  ;;  %v2302_v23 = vmul.f32 -1.442695, %v2154_v14  ;;  %v1801_v2 = vrot.slane %v1793_v10, %v3216_v46  ;;  %v1935_v6 = vrot.slane %v1927_v11, %v3216_v46 }
0x1450   :  { %2778 = vpow2.f32 %v2299_v22 }
0x1451   :  { %2780 = vpow2.f32 %v2302_v23 }
0x1455   :  { %v2775_v18 = vpop.eup %2774 }
0x1456   :  { %2036 = vrot.lane.b32.xlu0 %v2775_v18, %s2794_s14 }
0x1459   :  { %v2777_v19 = vpop.eup %2776 }
0x145a   :  { %2169 = vrot.lane.b32.xlu1 %v2777_v19, %s2794_s14  ;;  %2031 = vrot.lane.b32.xlu0 %v2022_v20, %s2793_s9  ;;  %v2779_v5 = vpop.eup %2778 }
0x145b   :  { %v2026_v24 = vadd.f32 1.0, %v2779_v5  ;;  %v2781_v0 = vpop.eup %2780 }
0x145c   :  { %v2159_v4 = vadd.f32 1.0, %v2781_v0 }
0x145d   :  { %2782 = vrcp.f32 %v2026_v24 }
0x145e   :  { %2164 = vrot.lane.b32.xlu1 %v2155_v21, %s2793_s9  ;;  %2784 = vrcp.f32 %v2159_v4 }
0x1467   :  { %v3201_v26 = vpop.eup %2782 }
0x1468   :  { %v3205_v28 = vpop.eup %2784 }
0x14c8   :  { %v2037_v12 = vpop.permute.xlu0 %2036 }
0x14c9   :  { %v2039_v9 = vmul.f32 %v3201_v26, %v2037_v12 }
0x14cb   :  { %2041 = vrot.lane.b32.xlu0 %v2039_v9, %s2793_s9 }
0x14cc   :  { %v2170_v29 = vpop.permute.xlu1 %2169  ;;  %v2032_v31 = vpop.permute.xlu0 %2031 }
0x14cd   :  { %v2172_v30 = vmul.f32 %v3205_v28, %v2170_v29  ;;  %v2034_v13 = vmul.f32 %v3201_v26, %v2032_v31 }
0x14cf   :  { %2174 = vrot.lane.b32.xlu1 %v2172_v30, %s2793_s9 }
0x14d0   :  { %v2165_v32 = vpop.permute.xlu1 %2164 }
0x14d1   :  { %v2167_v35 = vmul.f32 %v3205_v28, %v2165_v32 }
0x153d   :  { %v2042_v33 = vpop.permute.xlu0 %2041 }
0x153e   :  { %v2044_v34 = vadd.f32 %v2042_v33, %v2034_v13 }
0x1540   :  { %2786 = vtanh.f32 %v2044_v34 }
0x1541   :  { %v2175_v41 = vpop.permute.xlu1 %2174 }
0x1542   :  { %v3211_v42 = vadd.f32 %v2175_v41, %v2167_v35 }
0x1544   :  { %2788 = vtanh.f32 %v3211_v42 }
0x154a   :  { %v2787_v47 = vpop.eup %2786 }
0x154b   :  { %2047 = vrot.lane.b32.xlu0 %v2787_v47, %s2794_s14 }
0x154e   :  { %v2789_v54 = vpop.eup %2788 }
0x154f   :  { %2180 = vrot.lane.b32.xlu1 %v2789_v54, %s2794_s14  ;;  %194 = vrot.lane.b32.xlu0 %v193_v50, %s2793_s9 }
0x1553   :  { %328 = vrot.lane.b32.xlu1 %v327_v57, %s2793_s9  ;;  %462 = vrot.lane.b32.xlu0 %v461_v53, %s2793_s9 }
0x1557   :  { %596 = vrot.lane.b32.xlu1 %v595_v59, %s2793_s9  ;;  %730 = vrot.lane.b32.xlu0 %v729_v39, %s2793_s9 }
0x155b   :  { %864 = vrot.lane.b32.xlu1 %v863_v27, %s2793_s9  ;;  %998 = vrot.lane.b32.xlu0 %v997_v25, %s2793_s9 }
0x155f   :  { %1132 = vrot.lane.b32.xlu1 %v1131_v15, %s2793_s9  ;;  %1266 = vrot.lane.b32.xlu0 %v1265_v1, %s2793_s9 }
0x1563   :  { %1400 = vrot.lane.b32.xlu1 %v1399_v17, %s2793_s9  ;;  %1534 = vrot.lane.b32.xlu0 %v1533_v61, %s2793_s9 }
0x1567   :  { %1668 = vrot.lane.b32.xlu1 %v1667_v63, %s2793_s9  ;;  %1802 = vrot.lane.b32.xlu0 %v1801_v2, %s2793_s9 }
0x156b   :  { %1936 = vrot.lane.b32.xlu1 %v1935_v6, %s2793_s9 }
0x156f   :  { %2057 = vrot.lane.b32.xlu1 %v2044_v34, %s2795_s15 }
0x15bd   :  { %v2048_v52 = vpop.permute.xlu0 %2047 }
0x15be   :  { %v2050_v14 = vmul.f32 %v3201_v26, %v2048_v52 }
0x15c0   :  { %v2061_v16 = vpack.c.bf16 %v2050_v14, %v2050_v14  ;;  %2052 = vrot.lane.b32.xlu0 %v2050_v14, %s2793_s9 }
0x15c1   :  { %v2181_v18 = vpop.permute.xlu1 %2180  ;;  %v195_v19 = vpop.permute.xlu0 %194 }
0x15c2   :  { %v2069_v55 = vrot.slane %v2061_v16, %v3216_v46  ;;  %v2183_v20 = vmul.f32 %v3205_v28, %v2181_v18  ;;  %198 = vst.msk [vmem:[%s3357_s4] sm:$0x3] %vm197_vm3, %v195_v19 }
0x15c4   :  { %v2194_v21 = vpack.c.bf16 %v2183_v20, %v2183_v20  ;;  %2185 = vrot.lane.b32.xlu1 %v2183_v20, %s2793_s9  ;;  %2070 = vrot.lane.b32.xlu0 %v2069_v55, %s2793_s9 }
0x15c5   :  { %v329_v22 = vpop.permute.xlu1 %328  ;;  %v463_v23 = vpop.permute.xlu0 %462 }
0x15c6   :  { %v2202_v5 = vrot.slane %v2194_v21, %v3216_v46  ;;  %2248 = vst.msk [vmem:[%s3358_s5 + $0xe] sm:$0x3] %vm197_vm3, %v329_v22  ;;  %2252 = vst.msk [vmem:[%s3357_s4 + $0x2] sm:$0x3] %vm197_vm3, %v463_v23 }
0x15c8   :  { %2203 = vrot.lane.b32.xlu1 %v2202_v5, %s2793_s9  ;;  %2190 = vrot.lane.b32.xlu0 %v3211_v42, %s2795_s15 }
0x15c9   :  { %v597_v24 = vpop.permute.xlu1 %596  ;;  %v731_v0 = vpop.permute.xlu0 %730 }
0x15ca   :  { %2256 = vst.msk [vmem:[%s3358_s5 + $0xc] sm:$0x3] %vm197_vm3, %v597_v24  ;;  %2260 = vst.msk [vmem:[%s3357_s4 + $0x4] sm:$0x3] %vm197_vm3, %v731_v0 }
0x15cd   :  { %v865_v4 = vpop.permute.xlu1 %864  ;;  %v999_v26 = vpop.permute.xlu0 %998 }
0x15ce   :  { %2264 = vst.msk [vmem:[%s3358_s5 + $0xa] sm:$0x3] %vm197_vm3, %v865_v4  ;;  %2268 = vst.msk [vmem:[%s3357_s4 + $0x6] sm:$0x3] %vm197_vm3, %v999_v26 }
0x15d1   :  { %v1133_v12 = vpop.permute.xlu1 %1132  ;;  %v1267_v9 = vpop.permute.xlu0 %1266 }
0x15d2   :  { %2272 = vst.msk [vmem:[%s3358_s5 + $0x8] sm:$0x3] %vm197_vm3, %v1133_v12  ;;  %2276 = vst.msk [vmem:[%s3357_s4 + $0x8] sm:$0x3] %vm197_vm3, %v1267_v9 }
0x15d5   :  { %v1401_v28 = vpop.permute.xlu1 %1400  ;;  %v1535_v29 = vpop.permute.xlu0 %1534 }
0x15d6   :  { %2280 = vst.msk [vmem:[%s3358_s5 + $0x6] sm:$0x3] %vm197_vm3, %v1401_v28  ;;  %2284 = vst.msk [vmem:[%s3357_s4 + $0xa] sm:$0x3] %vm197_vm3, %v1535_v29 }
0x15d9   :  { %v1669_v30 = vpop.permute.xlu1 %1668  ;;  %v1803_v31 = vpop.permute.xlu0 %1802 }
0x15da   :  { %2288 = vst.msk [vmem:[%s3358_s5 + $0x4] sm:$0x3] %vm197_vm3, %v1669_v30  ;;  %2292 = vst.msk [vmem:[%s3357_s4 + $0xc] sm:$0x3] %vm197_vm3, %v1803_v31 }
0x15dd   :  { %v1937_v13 = vpop.permute.xlu1 %1936 }
0x15de   :  { %2296 = vst.msk [vmem:[%s3358_s5 + $0x2] sm:$0x3] %vm197_vm3, %v1937_v13 }
0x15e1   :  { %v2058_v32 = vpop.permute.xlu1 %2057 }
0x15e2   :  { %2060 = vst.msk [vmem:[#allocation3] sm:$0xf] %vm59_vm0, %v2058_v32 }
0x1632   :  { %v2053_v33 = vpop.permute.xlu0 %2052 }
0x1633   :  { %2055 = vst.msk [vmem:[#allocation2] sm:$0xf] %vm59_vm0, %v2053_v33 }
0x1636   :  { %v2186_v34 = vpop.permute.xlu1 %2185  ;;  %v2071_v35 = vpop.permute.xlu0 %2070 }
0x1637   :  { %2188 = vst.msk [vmem:[#allocation4] sm:$0xf] %vm59_vm0, %v2186_v34 }
0x1638   :  { %2300 = vst.msk [vmem:[%s3357_s4 + $0xe] sm:$0x3] %vm197_vm3, %v2071_v35 }
0x163a   :  { %v2204_v36 = vpop.permute.xlu1 %2203  ;;  %v2191_v38 = vpop.permute.xlu0 %2190 }
0x163b   :  { %2206 = vst.msk [vmem:[%s3358_s5] sm:$0x3] %vm197_vm3, %v2204_v36 }
0x163c   :  { %2193 = vst.msk [vmem:[#allocation5] sm:$0xf] %vm59_vm0, %v2191_v38 }

</bundles_post_ra>
